<compile_context>
chip_gen: v7x
topology: tpu7x:2x2x1
jax: 0.10.0
libtpu: 0.0.40
codegen_flags: <defaults>
</compile_context>

<pallas_src>
import math
import functools

import jax
import jax.numpy as jnp
from jax.experimental import pallas as pl
from jax.experimental.pallas import tpu as pltpu


# ----------------------------- in-kernel helpers -----------------------------

def _norm_unbiased(x, alpha, bias, eps=1e-6):
    """PyTorch `Norm`: alpha*(x-mean)/(std+eps)+bias, std uses Bessel (n-1)."""
    d = x.shape[-1]
    mean = jnp.mean(x, axis=-1, keepdims=True)
    centered = x - mean
    var = jnp.sum(centered * centered, axis=-1, keepdims=True) * (1.0 / (d - 1))
    inv = pl.reciprocal(jnp.sqrt(var) + eps)        # exact; alpha folded below
    return centered * (alpha * inv) + bias


def _softmax_last_approx(x):
    """Attention-internal softmax; approx reciprocal runs on the idle EUP slot."""
    m = jnp.max(x, axis=-1, keepdims=True)
    e = jnp.exp(x - m)
    return e * pl.reciprocal(jnp.sum(e, axis=-1, keepdims=True), approx=True)


# ----------------------------- fused forward kernel -----------------------------

def fused_forward_kernel(x_ref, pe_ref, wqkv_ref, wo_ref, w1_ref, w2_ref,
                         lvec_ref, lb1_ref, hvec_ref, ws1_ref, ws2_ref, bs2_ref,
                         o_ref, *, n_layer, heads, lb, ub, n_output):
    BB, T, D = x_ref.shape
    d_k = D // heads
    rows = BB * T
    scale = 1.0 / math.sqrt(d_k)

    # ---- PositionalEncoder (dropout = identity): x*sqrt(D) + pe ----
    x = x_ref[...].astype(jnp.float32) * math.sqrt(D) + pe_ref[...]     # (BB,T,D)
    x = x.reshape(rows, D)                                              # batch-folded

    # ---- N encoder layers, statically unrolled; everything stays in VMEM ----
    for l in range(n_layer):
        vec = lvec_ref[l]                              # (9, D) packed per-layer vecs
        n1_a, n1_b = vec[0:1], vec[1:2]
        bq_v, bk_v, bv_v, bo_v = vec[2:3], vec[3:4], vec[4:5], vec[5:6]
        n2_a, n2_b, b2_v = vec[6:7], vec[7:8], vec[8:9]

        # sublayer 1: Norm -> MultiHeadAttention -> residual
        x2 = _norm_unbiased(x, n1_a, n1_b)

        # per-head Q/K/V projections on the batch-folded (rows, D) slab.
        # Weights are pre-split per head host-side, so these are plain 2-D matmuls
        # (no lane-splitting reshape / transpose of activations).
        qs, ks, vs = [], [], []
        for h in range(heads):
            csl = slice(h * d_k, (h + 1) * d_k)
            qs.append(jnp.dot(x2, wqkv_ref[l, 0, h],
                              preferred_element_type=jnp.float32) + bq_v[:, csl])
            ks.append(jnp.dot(x2, wqkv_ref[l, 1, h],
                              preferred_element_type=jnp.float32) + bk_v[:, csl])
            vs.append(jnp.dot(x2, wqkv_ref[l, 2, h],
                              preferred_element_type=jnp.float32) + bv_v[:, csl])

        # attention is per batch element (rows are batch-folded, so slice them back)
        per_b = []
        for b in range(BB):
            rsl = slice(b * T, (b + 1) * T)
            acc = jnp.zeros((T, D), jnp.float32)
            for h in range(heads):
                q_h, k_h, v_h = qs[h][rsl], ks[h][rsl], vs[h][rsl]
                s = jnp.einsum('td,sd->ts', q_h, k_h,
                               preferred_element_type=jnp.float32) * scale
                p = _softmax_last_approx(s)
                a_h = jnp.dot(p, v_h, preferred_element_type=jnp.float32)  # (T, d_k)
                # fold "concat heads -> out linear" into per-head partial matmuls
                acc = acc + jnp.dot(a_h, wo_ref[l, h],
                                    preferred_element_type=jnp.float32)
            per_b.append(acc)
        attn_out = per_b[0] if BB == 1 else jnp.concatenate(per_b, axis=0)
        x = x + attn_out + bo_v

        # sublayer 2: Norm -> FeedForward (ReLU) -> residual
        # (w1/b1/w2 are zero-padded 400->512; padding contributes exactly 0)
        x2 = _norm_unbiased(x, n2_a, n2_b)
        h1 = jnp.maximum(
            jnp.dot(x2, w1_ref[l], preferred_element_type=jnp.float32) + lb1_ref[l],
            0.0)
        x = x + jnp.dot(h1, w2_ref[l], preferred_element_type=jnp.float32) + b2_v

    # ---- final encoder Norm + temporal max pool (AdaptiveMaxPool1d(1) over time) ----
    hv = hvec_ref[...]                                   # (5, D) packed head vectors
    nf_a, nf_b, bs1_v, ln_g, ln_b = hv[0:1], hv[1:2], hv[2:3], hv[3:4], hv[4:5]

    xn = _norm_unbiased(x, nf_a, nf_b)
    feats = jnp.max(xn.reshape(BB, T, D), axis=1)                        # (BB, D)

    # ---- score_layer: Linear -> LayerNorm -> SiLU -> (Dropout=id) -> Linear ----
    hid = jnp.dot(feats, ws1_ref[...], preferred_element_type=jnp.float32) + bs1_v
    mu = jnp.mean(hid, axis=-1, keepdims=True)
    var = jnp.mean((hid - mu) ** 2, axis=-1, keepdims=True)   # biased (torch.LayerNorm)
    hid = (hid - mu) * pl.reciprocal(jnp.sqrt(var + 1e-5)) * ln_g + ln_b
    hid = hid * (1.0 / (1.0 + jnp.exp(-hid)))                 # SiLU
    scores = jnp.dot(hid, ws2_ref[...],
                     preferred_element_type=jnp.float32) + bs2_ref[...]  # (BB, n_out)

    # ---- softmax -> clamp(lb, ub) -> renormalize (EXACT math: this is the output) ----
    m = jnp.max(scores, axis=-1, keepdims=True)
    e = jnp.exp(scores - m)
    w = e / jnp.sum(e, axis=-1, keepdims=True)
    w = jnp.clip(w, lb, ub)
    w = w / (jnp.sum(w, axis=-1, keepdims=True) + 1e-8)

    # lane-dense store: pad n_output -> 128 lanes with zeros, wrapper slices them off
    pad = o_ref.shape[-1] - n_output
    if pad > 0:
        w = jnp.concatenate([w, jnp.zeros((BB, pad), jnp.float32)], axis=-1)
    o_ref[...] = w.reshape(BB, 1, -1).astype(o_ref.dtype)


# ----------------------------- pallas_call wrapper -----------------------------

def _full_spec(shape):
    """Whole-array VMEM block, identical at every grid step (no re-DMA)."""
    zeros = (0,) * len(shape)
    return pl.BlockSpec(shape, lambda b: zeros)


def portfolio_transformer_forward(x, params, *, heads, n_output, lb, ub):
    B, T, D = x.shape
    n_layer = params['wqkv'].shape[0]

    # 2-way grid so v7x's two TensorCores both get work; batch folded inside a step.
    n_splits = 2 if (B >= 2 and B % 2 == 0) else 1
    BB = B // n_splits
    out_pad = max(128, ((n_output + 127) // 128) * 128)

    pe = positional_encoding(T, D)

    weight_args = (
        pe,
        params['wqkv'], params['wo'], params['w1'], params['w2'],
        params['lvec'], params['lb1'],
        params['hvec'], params['ws1'], params['ws2'], params['bs2'],
    )

    in_specs = [pl.BlockSpec((BB, T, D), lambda b: (b, 0, 0))]
    in_specs += [_full_spec(w.shape) for w in weight_args]

    out = pl.pallas_call(
        functools.partial(fused_forward_kernel, n_layer=n_layer, heads=heads,
                          lb=lb, ub=ub, n_output=n_output),
        out_shape=jax.ShapeDtypeStruct((B, 1, out_pad), x.dtype),
        grid=(n_splits,),
        in_specs=in_specs,
        out_specs=pl.BlockSpec((BB, 1, out_pad), lambda b: (b, 0, 0)),
        compiler_params=pltpu.CompilerParams(
            dimension_semantics=("parallel",),
            vmem_limit_bytes=32 * 1024 * 1024),
    )(x, *weight_args)
    return out.reshape(B, out_pad)[:, :n_output]


# ----------------------------- model glue -----------------------------

def positional_encoding(T, D):
    # reproduces the (slightly unusual) PyTorch loop:
    #   pe[pos, i]   = sin(pos / 10000**(2*i/D))
    #   pe[pos, i+1] = cos(pos / 10000**(2*(i+1)/D))
    pos = jnp.arange(T, dtype=jnp.float32)[:, None]
    i = jnp.arange(0, D, 2, dtype=jnp.float32)[None, :]
    sin_p = jnp.sin(pos / jnp.power(10000.0, 2.0 * i / D))
    cos_p = jnp.cos(pos / jnp.power(10000.0, 2.0 * (i + 1.0) / D))
    return jnp.stack([sin_p, cos_p], axis=-1).reshape(T, D)


def init_params(key, d_model, d_ff, d_ff_pad, n_layer, n_output, heads):
    d_k = d_model // heads

    def linear(key, fan_in, fan_out):
        k1, k2 = jax.random.split(key)
        bound = 1.0 / math.sqrt(fan_in)
        w = jax.random.uniform(k1, (fan_in, fan_out), jnp.float32, -bound, bound)
        b = jax.random.uniform(k2, (fan_out,), jnp.float32, -bound, bound)
        return w, b

    keys = jax.random.split(key, n_layer + 1)
    pad = d_ff_pad - d_ff

    wqkv, wo, w1, w2, lvec, lb1 = [], [], [], [], [], []
    for l in range(n_layer):
        ks = jax.random.split(keys[l], 6)
        wq, bq = linear(ks[0], d_model, d_model)
        wk, bk = linear(ks[1], d_model, d_model)
        wv, bv = linear(ks[2], d_model, d_model)
        wo_l, bo_l = linear(ks[3], d_model, d_model)
        w1_l, b1_l = linear(ks[4], d_model, d_ff)
        w2_l, b2_l = linear(ks[5], d_ff, d_model)

        # Pre-split Q/K/V weights per head -> (3, H, D, d_k); output-projection
        # weight per head along its input rows -> (H, d_k, D).  Host-side only, so
        # the kernel never reshapes / transposes activations to split or merge heads.
        wqkv.append(jnp.stack(
            [w.reshape(d_model, heads, d_k).transpose(1, 0, 2) for w in (wq, wk, wv)],
            axis=0))
        wo.append(wo_l.reshape(heads, d_k, d_model))
        # zero-pad d_ff to a multiple of 128 (bit-identical: relu(0)=0, zero w2 rows)
        w1.append(jnp.pad(w1_l, ((0, 0), (0, pad))))
        w2.append(jnp.pad(w2_l, ((0, pad), (0, 0))))
        lb1.append(jnp.pad(b1_l, (0, pad)).reshape(1, d_ff_pad))
        # pack all tiny per-layer D-vectors into one (9, D) stack
        lvec.append(jnp.stack([
            jnp.ones((d_model,), jnp.float32),    # norm_1 alpha
            jnp.zeros((d_model,), jnp.float32),   # norm_1 bias
            bq, bk, bv, bo_l,
            jnp.ones((d_model,), jnp.float32),    # norm_2 alpha
            jnp.zeros((d_model,), jnp.float32),   # norm_2 bias
            b2_l,
        ], axis=0))

    ks = jax.random.split(keys[-1], 2)
    ws1, bs1 = linear(ks[0], d_model, d_model)
    ws2, bs2 = linear(ks[1], d_model, n_output)

    hvec = jnp.stack([
        jnp.ones((d_model,), jnp.float32),        # final encoder Norm alpha
        jnp.zeros((d_model,), jnp.float32),       # final encoder Norm bias
        bs1,                                      # score_layer linear_1 bias
        jnp.ones((d_model,), jnp.float32),        # LayerNorm gamma
        jnp.zeros((d_model,), jnp.float32),       # LayerNorm beta
    ], axis=0)

    return dict(
        wqkv=jnp.stack(wqkv), wo=jnp.stack(wo),
        w1=jnp.stack(w1), w2=jnp.stack(w2),
        lvec=jnp.stack(lvec), lb1=jnp.stack(lb1),
        hvec=hvec, ws1=ws1, ws2=ws2, bs2=bs2.reshape(1, n_output),
    )


# ----------------------------- main -----------------------------

if __name__ == "__main__":
    B = 2          # batch
    T = 8          # n_timestep
    D = 32         # n_feature (= d_model)
    HEADS = 4
    N_LAYER = 2
    D_FF = 400
    D_FF_PAD = 512  # padded to 4x128 lanes (zero-padded, numerically identical)
    N_OUTPUT = 32   # n_stocks
    LB, UB = 0.0, 0.1

    key = jax.random.PRNGKey(0)
    k_x, k_p = jax.random.split(key)
    x = jax.random.normal(k_x, (B, T, D), dtype=jnp.float32)
    params = init_params(k_p, D, D_FF, D_FF_PAD, N_LAYER, N_OUTPUT, HEADS)

    fwd = jax.jit(functools.partial(portfolio_transformer_forward,
                                    heads=HEADS, n_output=N_OUTPUT, lb=LB, ub=UB))
    weights = fwd(x, params)
    weights = jax.block_until_ready(weights)

    assert weights.shape == (B, N_OUTPUT)
    assert bool(jnp.all(jnp.isfinite(weights)))
    print("KERNEL_OK")
</pallas_src>

<mosaic_0001>
module attributes {stable_mosaic.version = 11 : i64} {
  func.func @fused_forward_kernel(%arg0: i32, %arg1: memref<1x8x32xf32, #tpu.memory_space<vmem>>, %arg2: memref<8x32xf32, #tpu.memory_space<vmem>>, %arg3: memref<2x3x4x32x8xf32, #tpu.memory_space<vmem>>, %arg4: memref<2x4x8x32xf32, #tpu.memory_space<vmem>>, %arg5: memref<2x32x512xf32, #tpu.memory_space<vmem>>, %arg6: memref<2x512x32xf32, #tpu.memory_space<vmem>>, %arg7: memref<2x9x32xf32, #tpu.memory_space<vmem>>, %arg8: memref<2x1x512xf32, #tpu.memory_space<vmem>>, %arg9: memref<5x32xf32, #tpu.memory_space<vmem>>, %arg10: memref<32x32xf32, #tpu.memory_space<vmem>>, %arg11: memref<32x32xf32, #tpu.memory_space<vmem>>, %arg12: memref<1x32xf32, #tpu.memory_space<vmem>>, %arg13: memref<1x1x128xf32, #tpu.memory_space<vmem>>) attributes {dimension_semantics = [#tpu.dimension_semantics<parallel>], iteration_bounds = array<i64: 2>, scalar_prefetch = 0 : i64, scratch_operands = 0 : i64, tpu.core_type = #tpu.core_type<tc>, window_params = [{transform_indices = @transform_0, window_bounds = array<i64: 1, 8, 32>}, {pipeline_mode = #tpu.pipeline_mode<synchronous>, transform_indices = @transform_1, window_bounds = array<i64: 8, 32>}, {pipeline_mode = #tpu.pipeline_mode<synchronous>, transform_indices = @transform_2, window_bounds = array<i64: 2, 3, 4, 32, 8>}, {pipeline_mode = #tpu.pipeline_mode<synchronous>, transform_indices = @transform_3, window_bounds = array<i64: 2, 4, 8, 32>}, {pipeline_mode = #tpu.pipeline_mode<synchronous>, transform_indices = @transform_4, window_bounds = array<i64: 2, 32, 512>}, {pipeline_mode = #tpu.pipeline_mode<synchronous>, transform_indices = @transform_5, window_bounds = array<i64: 2, 512, 32>}, {pipeline_mode = #tpu.pipeline_mode<synchronous>, transform_indices = @transform_6, window_bounds = array<i64: 2, 9, 32>}, {pipeline_mode = #tpu.pipeline_mode<synchronous>, transform_indices = @transform_7, window_bounds = array<i64: 2, 1, 512>}, {pipeline_mode = #tpu.pipeline_mode<synchronous>, transform_indices = @transform_8, window_bounds = array<i64: 5, 32>}, {pipeline_mode = #tpu.pipeline_mode<synchronous>, transform_indices = @transform_9, window_bounds = array<i64: 32, 32>}, {pipeline_mode = #tpu.pipeline_mode<synchronous>, transform_indices = @transform_10, window_bounds = array<i64: 32, 32>}, {pipeline_mode = #tpu.pipeline_mode<synchronous>, transform_indices = @transform_11, window_bounds = array<i64: 1, 32>}, {transform_indices = @transform_12, window_bounds = array<i64: 1, 1, 128>}]} {
    %c0 = arith.constant 0 : index
    %c0_0 = arith.constant 0 : index
    %c0_1 = arith.constant 0 : index
    %0 = vector.load %arg1[%c0, %c0_0, %c0_1] : memref<1x8x32xf32, #tpu.memory_space<vmem>>, vector<1x8x32xf32>
    %cst = arith.constant 5.65685415 : f32
    %1 = vector.broadcast %cst : f32 to vector<1x8x32xf32>
    %2 = arith.mulf %0, %1 : vector<1x8x32xf32>
    %c0_2 = arith.constant 0 : index
    %c0_3 = arith.constant 0 : index
    %3 = vector.load %arg2[%c0_2, %c0_3] : memref<8x32xf32, #tpu.memory_space<vmem>>, vector<8x32xf32>
    %4 = vector.shape_cast %3 : vector<8x32xf32> to vector<1x8x32xf32>
    %5 = arith.addf %2, %4 : vector<1x8x32xf32>
    %6 = vector.shape_cast %5 : vector<1x8x32xf32> to vector<8x32xf32>
    %c0_4 = arith.constant 0 : index
    %c0_5 = arith.constant 0 : index
    %c0_6 = arith.constant 0 : index
    %7 = vector.load %arg7[%c0_4, %c0_5, %c0_6] : memref<2x9x32xf32, #tpu.memory_space<vmem>>, vector<1x9x32xf32>
    %8 = vector.shape_cast %7 : vector<1x9x32xf32> to vector<9x32xf32>
    %9 = vector.extract_strided_slice %8 {offsets = [0, 0], sizes = [1, 32], strides = [1, 1]} : vector<9x32xf32> to vector<1x32xf32>
    %10 = vector.extract_strided_slice %8 {offsets = [1, 0], sizes = [1, 32], strides = [1, 1]} : vector<9x32xf32> to vector<1x32xf32>
    %11 = vector.extract_strided_slice %8 {offsets = [2, 0], sizes = [1, 32], strides = [1, 1]} : vector<9x32xf32> to vector<1x32xf32>
    %12 = vector.extract_strided_slice %8 {offsets = [3, 0], sizes = [1, 32], strides = [1, 1]} : vector<9x32xf32> to vector<1x32xf32>
    %13 = vector.extract_strided_slice %8 {offsets = [4, 0], sizes = [1, 32], strides = [1, 1]} : vector<9x32xf32> to vector<1x32xf32>
    %14 = vector.extract_strided_slice %8 {offsets = [5, 0], sizes = [1, 32], strides = [1, 1]} : vector<9x32xf32> to vector<1x32xf32>
    %15 = vector.extract_strided_slice %8 {offsets = [6, 0], sizes = [1, 32], strides = [1, 1]} : vector<9x32xf32> to vector<1x32xf32>
    %16 = vector.extract_strided_slice %8 {offsets = [7, 0], sizes = [1, 32], strides = [1, 1]} : vector<9x32xf32> to vector<1x32xf32>
    %17 = vector.extract_strided_slice %8 {offsets = [8, 0], sizes = [1, 32], strides = [1, 1]} : vector<9x32xf32> to vector<1x32xf32>
    %cst_7 = arith.constant dense<0.000000e+00> : vector<8xf32>
    %18 = vector.multi_reduction <add>, %6, %cst_7 [1] : vector<8x32xf32> to vector<8xf32>
    %19 = vector.shape_cast %18 : vector<8xf32> to vector<8x1xf32>
    %cst_8 = arith.constant 3.200000e+01 : f32
    %20 = vector.broadcast %cst_8 : f32 to vector<8x1xf32>
    %21 = arith.divf %19, %20 : vector<8x1xf32>
    %22 = vector.broadcast %21 : vector<8x1xf32> to vector<8x32xf32>
    %23 = arith.subf %6, %22 : vector<8x32xf32>
    %24 = arith.mulf %23, %23 : vector<8x32xf32>
    %cst_9 = arith.constant dense<0.000000e+00> : vector<8xf32>
    %25 = vector.multi_reduction <add>, %24, %cst_9 [1] : vector<8x32xf32> to vector<8xf32>
    %26 = vector.shape_cast %25 : vector<8xf32> to vector<8x1xf32>
    %cst_10 = arith.constant 0.0322580636 : f32
    %27 = vector.broadcast %cst_10 : f32 to vector<8x1xf32>
    %28 = arith.mulf %26, %27 : vector<8x1xf32>
    %29 = math.sqrt %28 : vector<8x1xf32>
    %cst_11 = arith.constant 9.99999997E-7 : f32
    %30 = vector.broadcast %cst_11 : f32 to vector<8x1xf32>
    %31 = arith.addf %29, %30 : vector<8x1xf32>
    %32 = tpu.reciprocal %31 : vector<8x1xf32> -> vector<8x1xf32>
    %33 = vector.broadcast %9 : vector<1x32xf32> to vector<8x32xf32>
    %34 = vector.broadcast %32 : vector<8x1xf32> to vector<8x32xf32>
    %35 = arith.mulf %33, %34 : vector<8x32xf32>
    %36 = arith.mulf %23, %35 : vector<8x32xf32>
    %37 = vector.broadcast %10 : vector<1x32xf32> to vector<8x32xf32>
    %38 = arith.addf %36, %37 : vector<8x32xf32>
    %c0_12 = arith.constant 0 : index
    %c0_13 = arith.constant 0 : index
    %c0_14 = arith.constant 0 : index
    %c0_15 = arith.constant 0 : index
    %c0_16 = arith.constant 0 : index
    %39 = vector.load %arg3[%c0_12, %c0_13, %c0_14, %c0_15, %c0_16] : memref<2x3x4x32x8xf32, #tpu.memory_space<vmem>>, vector<1x1x1x32x8xf32>
    %40 = vector.shape_cast %39 : vector<1x1x1x32x8xf32> to vector<32x8xf32>
    %cst_17 = arith.constant dense<0.000000e+00> : vector<8x8xf32>
    %41 = tpu.matmul %38, %40, %cst_17 {dimension_numbers = #tpu.dot_dimension_numbers<[1], [0], [0], [1], [0, 0, 1, 1], [], []>} : vector<8x32xf32>, vector<32x8xf32>, vector<8x8xf32> -> vector<8x8xf32>
    %42 = vector.extract_strided_slice %11 {offsets = [0, 0], sizes = [1, 8], strides = [1, 1]} : vector<1x32xf32> to vector<1x8xf32>
    %43 = vector.broadcast %42 : vector<1x8xf32> to vector<8x8xf32>
    %44 = arith.addf %41, %43 : vector<8x8xf32>
    %c0_18 = arith.constant 0 : index
    %c1 = arith.constant 1 : index
    %c0_19 = arith.constant 0 : index
    %c0_20 = arith.constant 0 : index
    %c0_21 = arith.constant 0 : index
    %45 = vector.load %arg3[%c0_18, %c1, %c0_19, %c0_20, %c0_21] : memref<2x3x4x32x8xf32, #tpu.memory_space<vmem>>, vector<1x1x1x32x8xf32>
    %46 = vector.shape_cast %45 : vector<1x1x1x32x8xf32> to vector<32x8xf32>
    %cst_22 = arith.constant dense<0.000000e+00> : vector<8x8xf32>
    %47 = tpu.matmul %38, %46, %cst_22 {dimension_numbers = #tpu.dot_dimension_numbers<[1], [0], [0], [1], [0, 0, 1, 1], [], []>} : vector<8x32xf32>, vector<32x8xf32>, vector<8x8xf32> -> vector<8x8xf32>
    %48 = vector.extract_strided_slice %12 {offsets = [0, 0], sizes = [1, 8], strides = [1, 1]} : vector<1x32xf32> to vector<1x8xf32>
    %49 = vector.broadcast %48 : vector<1x8xf32> to vector<8x8xf32>
    %50 = arith.addf %47, %49 : vector<8x8xf32>
    %c0_23 = arith.constant 0 : index
    %c2 = arith.constant 2 : index
    %c0_24 = arith.constant 0 : index
    %c0_25 = arith.constant 0 : index
    %c0_26 = arith.constant 0 : index
    %51 = vector.load %arg3[%c0_23, %c2, %c0_24, %c0_25, %c0_26] : memref<2x3x4x32x8xf32, #tpu.memory_space<vmem>>, vector<1x1x1x32x8xf32>
    %52 = vector.shape_cast %51 : vector<1x1x1x32x8xf32> to vector<32x8xf32>
    %cst_27 = arith.constant dense<0.000000e+00> : vector<8x8xf32>
    %53 = tpu.matmul %38, %52, %cst_27 {dimension_numbers = #tpu.dot_dimension_numbers<[1], [0], [0], [1], [0, 0, 1, 1], [], []>} : vector<8x32xf32>, vector<32x8xf32>, vector<8x8xf32> -> vector<8x8xf32>
    %54 = vector.extract_strided_slice %13 {offsets = [0, 0], sizes = [1, 8], strides = [1, 1]} : vector<1x32xf32> to vector<1x8xf32>
    %55 = vector.broadcast %54 : vector<1x8xf32> to vector<8x8xf32>
    %56 = arith.addf %53, %55 : vector<8x8xf32>
    %c0_28 = arith.constant 0 : index
    %c0_29 = arith.constant 0 : index
    %c1_30 = arith.constant 1 : index
    %c0_31 = arith.constant 0 : index
    %c0_32 = arith.constant 0 : index
    %57 = vector.load %arg3[%c0_28, %c0_29, %c1_30, %c0_31, %c0_32] : memref<2x3x4x32x8xf32, #tpu.memory_space<vmem>>, vector<1x1x1x32x8xf32>
    %58 = vector.shape_cast %57 : vector<1x1x1x32x8xf32> to vector<32x8xf32>
    %cst_33 = arith.constant dense<0.000000e+00> : vector<8x8xf32>
    %59 = tpu.matmul %38, %58, %cst_33 {dimension_numbers = #tpu.dot_dimension_numbers<[1], [0], [0], [1], [0, 0, 1, 1], [], []>} : vector<8x32xf32>, vector<32x8xf32>, vector<8x8xf32> -> vector<8x8xf32>
    %60 = vector.extract_strided_slice %11 {offsets = [0, 8], sizes = [1, 8], strides = [1, 1]} : vector<1x32xf32> to vector<1x8xf32>
    %61 = vector.broadcast %60 : vector<1x8xf32> to vector<8x8xf32>
    %62 = arith.addf %59, %61 : vector<8x8xf32>
    %c0_34 = arith.constant 0 : index
    %c1_35 = arith.constant 1 : index
    %c1_36 = arith.constant 1 : index
    %c0_37 = arith.constant 0 : index
    %c0_38 = arith.constant 0 : index
    %63 = vector.load %arg3[%c0_34, %c1_35, %c1_36, %c0_37, %c0_38] : memref<2x3x4x32x8xf32, #tpu.memory_space<vmem>>, vector<1x1x1x32x8xf32>
    %64 = vector.shape_cast %63 : vector<1x1x1x32x8xf32> to vector<32x8xf32>
    %cst_39 = arith.constant dense<0.000000e+00> : vector<8x8xf32>
    %65 = tpu.matmul %38, %64, %cst_39 {dimension_numbers = #tpu.dot_dimension_numbers<[1], [0], [0], [1], [0, 0, 1, 1], [], []>} : vector<8x32xf32>, vector<32x8xf32>, vector<8x8xf32> -> vector<8x8xf32>
    %66 = vector.extract_strided_slice %12 {offsets = [0, 8], sizes = [1, 8], strides = [1, 1]} : vector<1x32xf32> to vector<1x8xf32>
    %67 = vector.broadcast %66 : vector<1x8xf32> to vector<8x8xf32>
    %68 = arith.addf %65, %67 : vector<8x8xf32>
    %c0_40 = arith.constant 0 : index
    %c2_41 = arith.constant 2 : index
    %c1_42 = arith.constant 1 : index
    %c0_43 = arith.constant 0 : index
    %c0_44 = arith.constant 0 : index
    %69 = vector.load %arg3[%c0_40, %c2_41, %c1_42, %c0_43, %c0_44] : memref<2x3x4x32x8xf32, #tpu.memory_space<vmem>>, vector<1x1x1x32x8xf32>
    %70 = vector.shape_cast %69 : vector<1x1x1x32x8xf32> to vector<32x8xf32>
    %cst_45 = arith.constant dense<0.000000e+00> : vector<8x8xf32>
    %71 = tpu.matmul %38, %70, %cst_45 {dimension_numbers = #tpu.dot_dimension_numbers<[1], [0], [0], [1], [0, 0, 1, 1], [], []>} : vector<8x32xf32>, vector<32x8xf32>, vector<8x8xf32> -> vector<8x8xf32>
    %72 = vector.extract_strided_slice %13 {offsets = [0, 8], sizes = [1, 8], strides = [1, 1]} : vector<1x32xf32> to vector<1x8xf32>
    %73 = vector.broadcast %72 : vector<1x8xf32> to vector<8x8xf32>
    %74 = arith.addf %71, %73 : vector<8x8xf32>
    %c0_46 = arith.constant 0 : index
    %c0_47 = arith.constant 0 : index
    %c2_48 = arith.constant 2 : index
    %c0_49 = arith.constant 0 : index
    %c0_50 = arith.constant 0 : index
    %75 = vector.load %arg3[%c0_46, %c0_47, %c2_48, %c0_49, %c0_50] : memref<2x3x4x32x8xf32, #tpu.memory_space<vmem>>, vector<1x1x1x32x8xf32>
    %76 = vector.shape_cast %75 : vector<1x1x1x32x8xf32> to vector<32x8xf32>
    %cst_51 = arith.constant dense<0.000000e+00> : vector<8x8xf32>
    %77 = tpu.matmul %38, %76, %cst_51 {dimension_numbers = #tpu.dot_dimension_numbers<[1], [0], [0], [1], [0, 0, 1, 1], [], []>} : vector<8x32xf32>, vector<32x8xf32>, vector<8x8xf32> -> vector<8x8xf32>
    %78 = vector.extract_strided_slice %11 {offsets = [0, 16], sizes = [1, 8], strides = [1, 1]} : vector<1x32xf32> to vector<1x8xf32>
    %79 = vector.broadcast %78 : vector<1x8xf32> to vector<8x8xf32>
    %80 = arith.addf %77, %79 : vector<8x8xf32>
    %c0_52 = arith.constant 0 : index
    %c1_53 = arith.constant 1 : index
    %c2_54 = arith.constant 2 : index
    %c0_55 = arith.constant 0 : index
    %c0_56 = arith.constant 0 : index
    %81 = vector.load %arg3[%c0_52, %c1_53, %c2_54, %c0_55, %c0_56] : memref<2x3x4x32x8xf32, #tpu.memory_space<vmem>>, vector<1x1x1x32x8xf32>
    %82 = vector.shape_cast %81 : vector<1x1x1x32x8xf32> to vector<32x8xf32>
    %cst_57 = arith.constant dense<0.000000e+00> : vector<8x8xf32>
    %83 = tpu.matmul %38, %82, %cst_57 {dimension_numbers = #tpu.dot_dimension_numbers<[1], [0], [0], [1], [0, 0, 1, 1], [], []>} : vector<8x32xf32>, vector<32x8xf32>, vector<8x8xf32> -> vector<8x8xf32>
    %84 = vector.extract_strided_slice %12 {offsets = [0, 16], sizes = [1, 8], strides = [1, 1]} : vector<1x32xf32> to vector<1x8xf32>
    %85 = vector.broadcast %84 : vector<1x8xf32> to vector<8x8xf32>
    %86 = arith.addf %83, %85 : vector<8x8xf32>
    %c0_58 = arith.constant 0 : index
    %c2_59 = arith.constant 2 : index
    %c2_60 = arith.constant 2 : index
    %c0_61 = arith.constant 0 : index
    %c0_62 = arith.constant 0 : index
    %87 = vector.load %arg3[%c0_58, %c2_59, %c2_60, %c0_61, %c0_62] : memref<2x3x4x32x8xf32, #tpu.memory_space<vmem>>, vector<1x1x1x32x8xf32>
    %88 = vector.shape_cast %87 : vector<1x1x1x32x8xf32> to vector<32x8xf32>
    %cst_63 = arith.constant dense<0.000000e+00> : vector<8x8xf32>
    %89 = tpu.matmul %38, %88, %cst_63 {dimension_numbers = #tpu.dot_dimension_numbers<[1], [0], [0], [1], [0, 0, 1, 1], [], []>} : vector<8x32xf32>, vector<32x8xf32>, vector<8x8xf32> -> vector<8x8xf32>
    %90 = vector.extract_strided_slice %13 {offsets = [0, 16], sizes = [1, 8], strides = [1, 1]} : vector<1x32xf32> to vector<1x8xf32>
    %91 = vector.broadcast %90 : vector<1x8xf32> to vector<8x8xf32>
    %92 = arith.addf %89, %91 : vector<8x8xf32>
    %c0_64 = arith.constant 0 : index
    %c0_65 = arith.constant 0 : index
    %c3 = arith.constant 3 : index
    %c0_66 = arith.constant 0 : index
    %c0_67 = arith.constant 0 : index
    %93 = vector.load %arg3[%c0_64, %c0_65, %c3, %c0_66, %c0_67] : memref<2x3x4x32x8xf32, #tpu.memory_space<vmem>>, vector<1x1x1x32x8xf32>
    %94 = vector.shape_cast %93 : vector<1x1x1x32x8xf32> to vector<32x8xf32>
    %cst_68 = arith.constant dense<0.000000e+00> : vector<8x8xf32>
    %95 = tpu.matmul %38, %94, %cst_68 {dimension_numbers = #tpu.dot_dimension_numbers<[1], [0], [0], [1], [0, 0, 1, 1], [], []>} : vector<8x32xf32>, vector<32x8xf32>, vector<8x8xf32> -> vector<8x8xf32>
    %96 = vector.extract_strided_slice %11 {offsets = [0, 24], sizes = [1, 8], strides = [1, 1]} : vector<1x32xf32> to vector<1x8xf32>
    %97 = vector.broadcast %96 : vector<1x8xf32> to vector<8x8xf32>
    %98 = arith.addf %95, %97 : vector<8x8xf32>
    %c0_69 = arith.constant 0 : index
    %c1_70 = arith.constant 1 : index
    %c3_71 = arith.constant 3 : index
    %c0_72 = arith.constant 0 : index
    %c0_73 = arith.constant 0 : index
    %99 = vector.load %arg3[%c0_69, %c1_70, %c3_71, %c0_72, %c0_73] : memref<2x3x4x32x8xf32, #tpu.memory_space<vmem>>, vector<1x1x1x32x8xf32>
    %100 = vector.shape_cast %99 : vector<1x1x1x32x8xf32> to vector<32x8xf32>
    %cst_74 = arith.constant dense<0.000000e+00> : vector<8x8xf32>
    %101 = tpu.matmul %38, %100, %cst_74 {dimension_numbers = #tpu.dot_dimension_numbers<[1], [0], [0], [1], [0, 0, 1, 1], [], []>} : vector<8x32xf32>, vector<32x8xf32>, vector<8x8xf32> -> vector<8x8xf32>
    %102 = vector.extract_strided_slice %12 {offsets = [0, 24], sizes = [1, 8], strides = [1, 1]} : vector<1x32xf32> to vector<1x8xf32>
    %103 = vector.broadcast %102 : vector<1x8xf32> to vector<8x8xf32>
    %104 = arith.addf %101, %103 : vector<8x8xf32>
    %c0_75 = arith.constant 0 : index
    %c2_76 = arith.constant 2 : index
    %c3_77 = arith.constant 3 : index
    %c0_78 = arith.constant 0 : index
    %c0_79 = arith.constant 0 : index
    %105 = vector.load %arg3[%c0_75, %c2_76, %c3_77, %c0_78, %c0_79] : memref<2x3x4x32x8xf32, #tpu.memory_space<vmem>>, vector<1x1x1x32x8xf32>
    %106 = vector.shape_cast %105 : vector<1x1x1x32x8xf32> to vector<32x8xf32>
    %cst_80 = arith.constant dense<0.000000e+00> : vector<8x8xf32>
    %107 = tpu.matmul %38, %106, %cst_80 {dimension_numbers = #tpu.dot_dimension_numbers<[1], [0], [0], [1], [0, 0, 1, 1], [], []>} : vector<8x32xf32>, vector<32x8xf32>, vector<8x8xf32> -> vector<8x8xf32>
    %108 = vector.extract_strided_slice %13 {offsets = [0, 24], sizes = [1, 8], strides = [1, 1]} : vector<1x32xf32> to vector<1x8xf32>
    %109 = vector.broadcast %108 : vector<1x8xf32> to vector<8x8xf32>
    %110 = arith.addf %107, %109 : vector<8x8xf32>
    %cst_81 = arith.constant 0.000000e+00 : f32
    %111 = vector.broadcast %cst_81 : f32 to vector<8x32xf32>
    "tpu.trace_start"() <{level = 10 : i32, message = "td,sd->ts"}> : () -> ()
    %cst_82 = arith.constant dense<0.000000e+00> : vector<8x8xf32>
    %112 = tpu.matmul %44, %50, %cst_82 {dimension_numbers = #tpu.dot_dimension_numbers<[1], [1], [0], [0], [0, 0, 1, 0], [], []>} : vector<8x8xf32>, vector<8x8xf32>, vector<8x8xf32> -> vector<8x8xf32>
    "tpu.trace_stop"() : () -> ()
    %cst_83 = arith.constant 0.353553385 : f32
    %113 = vector.broadcast %cst_83 : f32 to vector<8x8xf32>
    %114 = arith.mulf %112, %113 : vector<8x8xf32>
    %cst_84 = arith.constant dense<0xFF800000> : vector<8xf32>
    %115 = vector.multi_reduction <maximumf>, %114, %cst_84 [1] : vector<8x8xf32> to vector<8xf32>
    %116 = vector.shape_cast %115 : vector<8xf32> to vector<8x1xf32>
    %117 = vector.broadcast %116 : vector<8x1xf32> to vector<8x8xf32>
    %118 = arith.subf %114, %117 : vector<8x8xf32>
    %119 = math.exp %118 : vector<8x8xf32>
    %cst_85 = arith.constant dense<0.000000e+00> : vector<8xf32>
    %120 = vector.multi_reduction <add>, %119, %cst_85 [1] : vector<8x8xf32> to vector<8xf32>
    %121 = vector.shape_cast %120 : vector<8xf32> to vector<8x1xf32>
    %122 = tpu.reciprocal %121 {approx = true} : vector<8x1xf32> -> vector<8x1xf32>
    %123 = vector.broadcast %122 : vector<8x1xf32> to vector<8x8xf32>
    %124 = arith.mulf %119, %123 : vector<8x8xf32>
    %cst_86 = arith.constant dense<0.000000e+00> : vector<8x8xf32>
    %125 = tpu.matmul %124, %56, %cst_86 {dimension_numbers = #tpu.dot_dimension_numbers<[1], [0], [0], [1], [0, 0, 1, 1], [], []>} : vector<8x8xf32>, vector<8x8xf32>, vector<8x8xf32> -> vector<8x8xf32>
    %c0_87 = arith.constant 0 : index
    %c0_88 = arith.constant 0 : index
    %c0_89 = arith.constant 0 : index
    %c0_90 = arith.constant 0 : index
    %126 = vector.load %arg4[%c0_87, %c0_88, %c0_89, %c0_90] : memref<2x4x8x32xf32, #tpu.memory_space<vmem>>, vector<1x1x8x32xf32>
    %127 = vector.shape_cast %126 : vector<1x1x8x32xf32> to vector<8x32xf32>
    %cst_91 = arith.constant dense<0.000000e+00> : vector<8x32xf32>
    %128 = tpu.matmul %125, %127, %cst_91 {dimension_numbers = #tpu.dot_dimension_numbers<[1], [0], [0], [1], [0, 0, 1, 1], [], []>} : vector<8x8xf32>, vector<8x32xf32>, vector<8x32xf32> -> vector<8x32xf32>
    %129 = arith.addf %111, %128 : vector<8x32xf32>
    "tpu.trace_start"() <{level = 10 : i32, message = "td,sd->ts"}> : () -> ()
    %cst_92 = arith.constant dense<0.000000e+00> : vector<8x8xf32>
    %130 = tpu.matmul %62, %68, %cst_92 {dimension_numbers = #tpu.dot_dimension_numbers<[1], [1], [0], [0], [0, 0, 1, 0], [], []>} : vector<8x8xf32>, vector<8x8xf32>, vector<8x8xf32> -> vector<8x8xf32>
    "tpu.trace_stop"() : () -> ()
    %cst_93 = arith.constant 0.353553385 : f32
    %131 = vector.broadcast %cst_93 : f32 to vector<8x8xf32>
    %132 = arith.mulf %130, %131 : vector<8x8xf32>
    %cst_94 = arith.constant dense<0xFF800000> : vector<8xf32>
    %133 = vector.multi_reduction <maximumf>, %132, %cst_94 [1] : vector<8x8xf32> to vector<8xf32>
    %134 = vector.shape_cast %133 : vector<8xf32> to vector<8x1xf32>
    %135 = vector.broadcast %134 : vector<8x1xf32> to vector<8x8xf32>
    %136 = arith.subf %132, %135 : vector<8x8xf32>
    %137 = math.exp %136 : vector<8x8xf32>
    %cst_95 = arith.constant dense<0.000000e+00> : vector<8xf32>
    %138 = vector.multi_reduction <add>, %137, %cst_95 [1] : vector<8x8xf32> to vector<8xf32>
    %139 = vector.shape_cast %138 : vector<8xf32> to vector<8x1xf32>
    %140 = tpu.reciprocal %139 {approx = true} : vector<8x1xf32> -> vector<8x1xf32>
    %141 = vector.broadcast %140 : vector<8x1xf32> to vector<8x8xf32>
    %142 = arith.mulf %137, %141 : vector<8x8xf32>
    %cst_96 = arith.constant dense<0.000000e+00> : vector<8x8xf32>
    %143 = tpu.matmul %142, %74, %cst_96 {dimension_numbers = #tpu.dot_dimension_numbers<[1], [0], [0], [1], [0, 0, 1, 1], [], []>} : vector<8x8xf32>, vector<8x8xf32>, vector<8x8xf32> -> vector<8x8xf32>
    %c0_97 = arith.constant 0 : index
    %c1_98 = arith.constant 1 : index
    %c0_99 = arith.constant 0 : index
    %c0_100 = arith.constant 0 : index
    %144 = vector.load %arg4[%c0_97, %c1_98, %c0_99, %c0_100] : memref<2x4x8x32xf32, #tpu.memory_space<vmem>>, vector<1x1x8x32xf32>
    %145 = vector.shape_cast %144 : vector<1x1x8x32xf32> to vector<8x32xf32>
    %cst_101 = arith.constant dense<0.000000e+00> : vector<8x32xf32>
    %146 = tpu.matmul %143, %145, %cst_101 {dimension_numbers = #tpu.dot_dimension_numbers<[1], [0], [0], [1], [0, 0, 1, 1], [], []>} : vector<8x8xf32>, vector<8x32xf32>, vector<8x32xf32> -> vector<8x32xf32>
    %147 = arith.addf %129, %146 : vector<8x32xf32>
    "tpu.trace_start"() <{level = 10 : i32, message = "td,sd->ts"}> : () -> ()
    %cst_102 = arith.constant dense<0.000000e+00> : vector<8x8xf32>
    %148 = tpu.matmul %80, %86, %cst_102 {dimension_numbers = #tpu.dot_dimension_numbers<[1], [1], [0], [0], [0, 0, 1, 0], [], []>} : vector<8x8xf32>, vector<8x8xf32>, vector<8x8xf32> -> vector<8x8xf32>
    "tpu.trace_stop"() : () -> ()
    %cst_103 = arith.constant 0.353553385 : f32
    %149 = vector.broadcast %cst_103 : f32 to vector<8x8xf32>
    %150 = arith.mulf %148, %149 : vector<8x8xf32>
    %cst_104 = arith.constant dense<0xFF800000> : vector<8xf32>
    %151 = vector.multi_reduction <maximumf>, %150, %cst_104 [1] : vector<8x8xf32> to vector<8xf32>
    %152 = vector.shape_cast %151 : vector<8xf32> to vector<8x1xf32>
    %153 = vector.broadcast %152 : vector<8x1xf32> to vector<8x8xf32>
    %154 = arith.subf %150, %153 : vector<8x8xf32>
    %155 = math.exp %154 : vector<8x8xf32>
    %cst_105 = arith.constant dense<0.000000e+00> : vector<8xf32>
    %156 = vector.multi_reduction <add>, %155, %cst_105 [1] : vector<8x8xf32> to vector<8xf32>
    %157 = vector.shape_cast %156 : vector<8xf32> to vector<8x1xf32>
    %158 = tpu.reciprocal %157 {approx = true} : vector<8x1xf32> -> vector<8x1xf32>
    %159 = vector.broadcast %158 : vector<8x1xf32> to vector<8x8xf32>
    %160 = arith.mulf %155, %159 : vector<8x8xf32>
    %cst_106 = arith.constant dense<0.000000e+00> : vector<8x8xf32>
    %161 = tpu.matmul %160, %92, %cst_106 {dimension_numbers = #tpu.dot_dimension_numbers<[1], [0], [0], [1], [0, 0, 1, 1], [], []>} : vector<8x8xf32>, vector<8x8xf32>, vector<8x8xf32> -> vector<8x8xf32>
    %c0_107 = arith.constant 0 : index
    %c2_108 = arith.constant 2 : index
    %c0_109 = arith.constant 0 : index
    %c0_110 = arith.constant 0 : index
    %162 = vector.load %arg4[%c0_107, %c2_108, %c0_109, %c0_110] : memref<2x4x8x32xf32, #tpu.memory_space<vmem>>, vector<1x1x8x32xf32>
    %163 = vector.shape_cast %162 : vector<1x1x8x32xf32> to vector<8x32xf32>
    %cst_111 = arith.constant dense<0.000000e+00> : vector<8x32xf32>
    %164 = tpu.matmul %161, %163, %cst_111 {dimension_numbers = #tpu.dot_dimension_numbers<[1], [0], [0], [1], [0, 0, 1, 1], [], []>} : vector<8x8xf32>, vector<8x32xf32>, vector<8x32xf32> -> vector<8x32xf32>
    %165 = arith.addf %147, %164 : vector<8x32xf32>
    "tpu.trace_start"() <{level = 10 : i32, message = "td,sd->ts"}> : () -> ()
    %cst_112 = arith.constant dense<0.000000e+00> : vector<8x8xf32>
    %166 = tpu.matmul %98, %104, %cst_112 {dimension_numbers = #tpu.dot_dimension_numbers<[1], [1], [0], [0], [0, 0, 1, 0], [], []>} : vector<8x8xf32>, vector<8x8xf32>, vector<8x8xf32> -> vector<8x8xf32>
    "tpu.trace_stop"() : () -> ()
    %cst_113 = arith.constant 0.353553385 : f32
    %167 = vector.broadcast %cst_113 : f32 to vector<8x8xf32>
    %168 = arith.mulf %166, %167 : vector<8x8xf32>
    %cst_114 = arith.constant dense<0xFF800000> : vector<8xf32>
    %169 = vector.multi_reduction <maximumf>, %168, %cst_114 [1] : vector<8x8xf32> to vector<8xf32>
    %170 = vector.shape_cast %169 : vector<8xf32> to vector<8x1xf32>
    %171 = vector.broadcast %170 : vector<8x1xf32> to vector<8x8xf32>
    %172 = arith.subf %168, %171 : vector<8x8xf32>
    %173 = math.exp %172 : vector<8x8xf32>
    %cst_115 = arith.constant dense<0.000000e+00> : vector<8xf32>
    %174 = vector.multi_reduction <add>, %173, %cst_115 [1] : vector<8x8xf32> to vector<8xf32>
    %175 = vector.shape_cast %174 : vector<8xf32> to vector<8x1xf32>
    %176 = tpu.reciprocal %175 {approx = true} : vector<8x1xf32> -> vector<8x1xf32>
    %177 = vector.broadcast %176 : vector<8x1xf32> to vector<8x8xf32>
    %178 = arith.mulf %173, %177 : vector<8x8xf32>
    %cst_116 = arith.constant dense<0.000000e+00> : vector<8x8xf32>
    %179 = tpu.matmul %178, %110, %cst_116 {dimension_numbers = #tpu.dot_dimension_numbers<[1], [0], [0], [1], [0, 0, 1, 1], [], []>} : vector<8x8xf32>, vector<8x8xf32>, vector<8x8xf32> -> vector<8x8xf32>
    %c0_117 = arith.constant 0 : index
    %c3_118 = arith.constant 3 : index
    %c0_119 = arith.constant 0 : index
    %c0_120 = arith.constant 0 : index
    %180 = vector.load %arg4[%c0_117, %c3_118, %c0_119, %c0_120] : memref<2x4x8x32xf32, #tpu.memory_space<vmem>>, vector<1x1x8x32xf32>
    %181 = vector.shape_cast %180 : vector<1x1x8x32xf32> to vector<8x32xf32>
    %cst_121 = arith.constant dense<0.000000e+00> : vector<8x32xf32>
    %182 = tpu.matmul %179, %181, %cst_121 {dimension_numbers = #tpu.dot_dimension_numbers<[1], [0], [0], [1], [0, 0, 1, 1], [], []>} : vector<8x8xf32>, vector<8x32xf32>, vector<8x32xf32> -> vector<8x32xf32>
    %183 = arith.addf %165, %182 : vector<8x32xf32>
    %184 = arith.addf %6, %183 : vector<8x32xf32>
    %185 = vector.broadcast %14 : vector<1x32xf32> to vector<8x32xf32>
    %186 = arith.addf %184, %185 : vector<8x32xf32>
    %cst_122 = arith.constant dense<0.000000e+00> : vector<8xf32>
    %187 = vector.multi_reduction <add>, %186, %cst_122 [1] : vector<8x32xf32> to vector<8xf32>
    %188 = vector.shape_cast %187 : vector<8xf32> to vector<8x1xf32>
    %cst_123 = arith.constant 3.200000e+01 : f32
    %189 = vector.broadcast %cst_123 : f32 to vector<8x1xf32>
    %190 = arith.divf %188, %189 : vector<8x1xf32>
    %191 = vector.broadcast %190 : vector<8x1xf32> to vector<8x32xf32>
    %192 = arith.subf %186, %191 : vector<8x32xf32>
    %193 = arith.mulf %192, %192 : vector<8x32xf32>
    %cst_124 = arith.constant dense<0.000000e+00> : vector<8xf32>
    %194 = vector.multi_reduction <add>, %193, %cst_124 [1] : vector<8x32xf32> to vector<8xf32>
    %195 = vector.shape_cast %194 : vector<8xf32> to vector<8x1xf32>
    %cst_125 = arith.constant 0.0322580636 : f32
    %196 = vector.broadcast %cst_125 : f32 to vector<8x1xf32>
    %197 = arith.mulf %195, %196 : vector<8x1xf32>
    %198 = math.sqrt %197 : vector<8x1xf32>
    %cst_126 = arith.constant 9.99999997E-7 : f32
    %199 = vector.broadcast %cst_126 : f32 to vector<8x1xf32>
    %200 = arith.addf %198, %199 : vector<8x1xf32>
    %201 = tpu.reciprocal %200 : vector<8x1xf32> -> vector<8x1xf32>
    %202 = vector.broadcast %15 : vector<1x32xf32> to vector<8x32xf32>
    %203 = vector.broadcast %201 : vector<8x1xf32> to vector<8x32xf32>
    %204 = arith.mulf %202, %203 : vector<8x32xf32>
    %205 = arith.mulf %192, %204 : vector<8x32xf32>
    %206 = vector.broadcast %16 : vector<1x32xf32> to vector<8x32xf32>
    %207 = arith.addf %205, %206 : vector<8x32xf32>
    %c0_127 = arith.constant 0 : index
    %c0_128 = arith.constant 0 : index
    %c0_129 = arith.constant 0 : index
    %208 = vector.load %arg5[%c0_127, %c0_128, %c0_129] : memref<2x32x512xf32, #tpu.memory_space<vmem>>, vector<1x32x512xf32>
    %209 = vector.shape_cast %208 : vector<1x32x512xf32> to vector<32x512xf32>
    %cst_130 = arith.constant dense<0.000000e+00> : vector<8x512xf32>
    %210 = tpu.matmul %207, %209, %cst_130 {dimension_numbers = #tpu.dot_dimension_numbers<[1], [0], [0], [1], [0, 0, 1, 1], [], []>} : vector<8x32xf32>, vector<32x512xf32>, vector<8x512xf32> -> vector<8x512xf32>
    %c0_131 = arith.constant 0 : index
    %c0_132 = arith.constant 0 : index
    %c0_133 = arith.constant 0 : index
    %211 = vector.load %arg8[%c0_131, %c0_132, %c0_133] : memref<2x1x512xf32, #tpu.memory_space<vmem>>, vector<1x1x512xf32>
    %212 = vector.shape_cast %211 : vector<1x1x512xf32> to vector<1x512xf32>
    %213 = vector.broadcast %212 : vector<1x512xf32> to vector<8x512xf32>
    %214 = arith.addf %210, %213 : vector<8x512xf32>
    %cst_134 = arith.constant 0.000000e+00 : f32
    %215 = vector.broadcast %cst_134 : f32 to vector<8x512xf32>
    %216 = arith.maximumf %214, %215 : vector<8x512xf32>
    %c0_135 = arith.constant 0 : index
    %c0_136 = arith.constant 0 : index
    %c0_137 = arith.constant 0 : index
    %217 = vector.load %arg6[%c0_135, %c0_136, %c0_137] : memref<2x512x32xf32, #tpu.memory_space<vmem>>, vector<1x512x32xf32>
    %218 = vector.shape_cast %217 : vector<1x512x32xf32> to vector<512x32xf32>
    %cst_138 = arith.constant dense<0.000000e+00> : vector<8x32xf32>
    %219 = tpu.matmul %216, %218, %cst_138 {dimension_numbers = #tpu.dot_dimension_numbers<[1], [0], [0], [1], [0, 0, 1, 1], [], []>} : vector<8x512xf32>, vector<512x32xf32>, vector<8x32xf32> -> vector<8x32xf32>
    %220 = arith.addf %186, %219 : vector<8x32xf32>
    %221 = vector.broadcast %17 : vector<1x32xf32> to vector<8x32xf32>
    %222 = arith.addf %220, %221 : vector<8x32xf32>
    %c1_139 = arith.constant 1 : index
    %c0_140 = arith.constant 0 : index
    %c0_141 = arith.constant 0 : index
    %223 = vector.load %arg7[%c1_139, %c0_140, %c0_141] : memref<2x9x32xf32, #tpu.memory_space<vmem>>, vector<1x9x32xf32>
    %224 = vector.shape_cast %223 : vector<1x9x32xf32> to vector<9x32xf32>
    %225 = vector.extract_strided_slice %224 {offsets = [0, 0], sizes = [1, 32], strides = [1, 1]} : vector<9x32xf32> to vector<1x32xf32>
    %226 = vector.extract_strided_slice %224 {offsets = [1, 0], sizes = [1, 32], strides = [1, 1]} : vector<9x32xf32> to vector<1x32xf32>
    %227 = vector.extract_strided_slice %224 {offsets = [2, 0], sizes = [1, 32], strides = [1, 1]} : vector<9x32xf32> to vector<1x32xf32>
    %228 = vector.extract_strided_slice %224 {offsets = [3, 0], sizes = [1, 32], strides = [1, 1]} : vector<9x32xf32> to vector<1x32xf32>
    %229 = vector.extract_strided_slice %224 {offsets = [4, 0], sizes = [1, 32], strides = [1, 1]} : vector<9x32xf32> to vector<1x32xf32>
    %230 = vector.extract_strided_slice %224 {offsets = [5, 0], sizes = [1, 32], strides = [1, 1]} : vector<9x32xf32> to vector<1x32xf32>
    %231 = vector.extract_strided_slice %224 {offsets = [6, 0], sizes = [1, 32], strides = [1, 1]} : vector<9x32xf32> to vector<1x32xf32>
    %232 = vector.extract_strided_slice %224 {offsets = [7, 0], sizes = [1, 32], strides = [1, 1]} : vector<9x32xf32> to vector<1x32xf32>
    %233 = vector.extract_strided_slice %224 {offsets = [8, 0], sizes = [1, 32], strides = [1, 1]} : vector<9x32xf32> to vector<1x32xf32>
    %cst_142 = arith.constant dense<0.000000e+00> : vector<8xf32>
    %234 = vector.multi_reduction <add>, %222, %cst_142 [1] : vector<8x32xf32> to vector<8xf32>
    %235 = vector.shape_cast %234 : vector<8xf32> to vector<8x1xf32>
    %cst_143 = arith.constant 3.200000e+01 : f32
    %236 = vector.broadcast %cst_143 : f32 to vector<8x1xf32>
    %237 = arith.divf %235, %236 : vector<8x1xf32>
    %238 = vector.broadcast %237 : vector<8x1xf32> to vector<8x32xf32>
    %239 = arith.subf %222, %238 : vector<8x32xf32>
    %240 = arith.mulf %239, %239 : vector<8x32xf32>
    %cst_144 = arith.constant dense<0.000000e+00> : vector<8xf32>
    %241 = vector.multi_reduction <add>, %240, %cst_144 [1] : vector<8x32xf32> to vector<8xf32>
    %242 = vector.shape_cast %241 : vector<8xf32> to vector<8x1xf32>
    %cst_145 = arith.constant 0.0322580636 : f32
    %243 = vector.broadcast %cst_145 : f32 to vector<8x1xf32>
    %244 = arith.mulf %242, %243 : vector<8x1xf32>
    %245 = math.sqrt %244 : vector<8x1xf32>
    %cst_146 = arith.constant 9.99999997E-7 : f32
    %246 = vector.broadcast %cst_146 : f32 to vector<8x1xf32>
    %247 = arith.addf %245, %246 : vector<8x1xf32>
    %248 = tpu.reciprocal %247 : vector<8x1xf32> -> vector<8x1xf32>
    %249 = vector.broadcast %225 : vector<1x32xf32> to vector<8x32xf32>
    %250 = vector.broadcast %248 : vector<8x1xf32> to vector<8x32xf32>
    %251 = arith.mulf %249, %250 : vector<8x32xf32>
    %252 = arith.mulf %239, %251 : vector<8x32xf32>
    %253 = vector.broadcast %226 : vector<1x32xf32> to vector<8x32xf32>
    %254 = arith.addf %252, %253 : vector<8x32xf32>
    %c1_147 = arith.constant 1 : index
    %c0_148 = arith.constant 0 : index
    %c0_149 = arith.constant 0 : index
    %c0_150 = arith.constant 0 : index
    %c0_151 = arith.constant 0 : index
    %255 = vector.load %arg3[%c1_147, %c0_148, %c0_149, %c0_150, %c0_151] : memref<2x3x4x32x8xf32, #tpu.memory_space<vmem>>, vector<1x1x1x32x8xf32>
    %256 = vector.shape_cast %255 : vector<1x1x1x32x8xf32> to vector<32x8xf32>
    %cst_152 = arith.constant dense<0.000000e+00> : vector<8x8xf32>
    %257 = tpu.matmul %254, %256, %cst_152 {dimension_numbers = #tpu.dot_dimension_numbers<[1], [0], [0], [1], [0, 0, 1, 1], [], []>} : vector<8x32xf32>, vector<32x8xf32>, vector<8x8xf32> -> vector<8x8xf32>
    %258 = vector.extract_strided_slice %227 {offsets = [0, 0], sizes = [1, 8], strides = [1, 1]} : vector<1x32xf32> to vector<1x8xf32>
    %259 = vector.broadcast %258 : vector<1x8xf32> to vector<8x8xf32>
    %260 = arith.addf %257, %259 : vector<8x8xf32>
    %c1_153 = arith.constant 1 : index
    %c1_154 = arith.constant 1 : index
    %c0_155 = arith.constant 0 : index
    %c0_156 = arith.constant 0 : index
    %c0_157 = arith.constant 0 : index
    %261 = vector.load %arg3[%c1_153, %c1_154, %c0_155, %c0_156, %c0_157] : memref<2x3x4x32x8xf32, #tpu.memory_space<vmem>>, vector<1x1x1x32x8xf32>
    %262 = vector.shape_cast %261 : vector<1x1x1x32x8xf32> to vector<32x8xf32>
    %cst_158 = arith.constant dense<0.000000e+00> : vector<8x8xf32>
    %263 = tpu.matmul %254, %262, %cst_158 {dimension_numbers = #tpu.dot_dimension_numbers<[1], [0], [0], [1], [0, 0, 1, 1], [], []>} : vector<8x32xf32>, vector<32x8xf32>, vector<8x8xf32> -> vector<8x8xf32>
    %264 = vector.extract_strided_slice %228 {offsets = [0, 0], sizes = [1, 8], strides = [1, 1]} : vector<1x32xf32> to vector<1x8xf32>
    %265 = vector.broadcast %264 : vector<1x8xf32> to vector<8x8xf32>
    %266 = arith.addf %263, %265 : vector<8x8xf32>
    %c1_159 = arith.constant 1 : index
    %c2_160 = arith.constant 2 : index
    %c0_161 = arith.constant 0 : index
    %c0_162 = arith.constant 0 : index
    %c0_163 = arith.constant 0 : index
    %267 = vector.load %arg3[%c1_159, %c2_160, %c0_161, %c0_162, %c0_163] : memref<2x3x4x32x8xf32, #tpu.memory_space<vmem>>, vector<1x1x1x32x8xf32>
    %268 = vector.shape_cast %267 : vector<1x1x1x32x8xf32> to vector<32x8xf32>
    %cst_164 = arith.constant dense<0.000000e+00> : vector<8x8xf32>
    %269 = tpu.matmul %254, %268, %cst_164 {dimension_numbers = #tpu.dot_dimension_numbers<[1], [0], [0], [1], [0, 0, 1, 1], [], []>} : vector<8x32xf32>, vector<32x8xf32>, vector<8x8xf32> -> vector<8x8xf32>
    %270 = vector.extract_strided_slice %229 {offsets = [0, 0], sizes = [1, 8], strides = [1, 1]} : vector<1x32xf32> to vector<1x8xf32>
    %271 = vector.broadcast %270 : vector<1x8xf32> to vector<8x8xf32>
    %272 = arith.addf %269, %271 : vector<8x8xf32>
    %c1_165 = arith.constant 1 : index
    %c0_166 = arith.constant 0 : index
    %c1_167 = arith.constant 1 : index
    %c0_168 = arith.constant 0 : index
    %c0_169 = arith.constant 0 : index
    %273 = vector.load %arg3[%c1_165, %c0_166, %c1_167, %c0_168, %c0_169] : memref<2x3x4x32x8xf32, #tpu.memory_space<vmem>>, vector<1x1x1x32x8xf32>
    %274 = vector.shape_cast %273 : vector<1x1x1x32x8xf32> to vector<32x8xf32>
    %cst_170 = arith.constant dense<0.000000e+00> : vector<8x8xf32>
    %275 = tpu.matmul %254, %274, %cst_170 {dimension_numbers = #tpu.dot_dimension_numbers<[1], [0], [0], [1], [0, 0, 1, 1], [], []>} : vector<8x32xf32>, vector<32x8xf32>, vector<8x8xf32> -> vector<8x8xf32>
    %276 = vector.extract_strided_slice %227 {offsets = [0, 8], sizes = [1, 8], strides = [1, 1]} : vector<1x32xf32> to vector<1x8xf32>
    %277 = vector.broadcast %276 : vector<1x8xf32> to vector<8x8xf32>
    %278 = arith.addf %275, %277 : vector<8x8xf32>
    %c1_171 = arith.constant 1 : index
    %c1_172 = arith.constant 1 : index
    %c1_173 = arith.constant 1 : index
    %c0_174 = arith.constant 0 : index
    %c0_175 = arith.constant 0 : index
    %279 = vector.load %arg3[%c1_171, %c1_172, %c1_173, %c0_174, %c0_175] : memref<2x3x4x32x8xf32, #tpu.memory_space<vmem>>, vector<1x1x1x32x8xf32>
    %280 = vector.shape_cast %279 : vector<1x1x1x32x8xf32> to vector<32x8xf32>
    %cst_176 = arith.constant dense<0.000000e+00> : vector<8x8xf32>
    %281 = tpu.matmul %254, %280, %cst_176 {dimension_numbers = #tpu.dot_dimension_numbers<[1], [0], [0], [1], [0, 0, 1, 1], [], []>} : vector<8x32xf32>, vector<32x8xf32>, vector<8x8xf32> -> vector<8x8xf32>
    %282 = vector.extract_strided_slice %228 {offsets = [0, 8], sizes = [1, 8], strides = [1, 1]} : vector<1x32xf32> to vector<1x8xf32>
    %283 = vector.broadcast %282 : vector<1x8xf32> to vector<8x8xf32>
    %284 = arith.addf %281, %283 : vector<8x8xf32>
    %c1_177 = arith.constant 1 : index
    %c2_178 = arith.constant 2 : index
    %c1_179 = arith.constant 1 : index
    %c0_180 = arith.constant 0 : index
    %c0_181 = arith.constant 0 : index
    %285 = vector.load %arg3[%c1_177, %c2_178, %c1_179, %c0_180, %c0_181] : memref<2x3x4x32x8xf32, #tpu.memory_space<vmem>>, vector<1x1x1x32x8xf32>
    %286 = vector.shape_cast %285 : vector<1x1x1x32x8xf32> to vector<32x8xf32>
    %cst_182 = arith.constant dense<0.000000e+00> : vector<8x8xf32>
    %287 = tpu.matmul %254, %286, %cst_182 {dimension_numbers = #tpu.dot_dimension_numbers<[1], [0], [0], [1], [0, 0, 1, 1], [], []>} : vector<8x32xf32>, vector<32x8xf32>, vector<8x8xf32> -> vector<8x8xf32>
    %288 = vector.extract_strided_slice %229 {offsets = [0, 8], sizes = [1, 8], strides = [1, 1]} : vector<1x32xf32> to vector<1x8xf32>
    %289 = vector.broadcast %288 : vector<1x8xf32> to vector<8x8xf32>
    %290 = arith.addf %287, %289 : vector<8x8xf32>
    %c1_183 = arith.constant 1 : index
    %c0_184 = arith.constant 0 : index
    %c2_185 = arith.constant 2 : index
    %c0_186 = arith.constant 0 : index
    %c0_187 = arith.constant 0 : index
    %291 = vector.load %arg3[%c1_183, %c0_184, %c2_185, %c0_186, %c0_187] : memref<2x3x4x32x8xf32, #tpu.memory_space<vmem>>, vector<1x1x1x32x8xf32>
    %292 = vector.shape_cast %291 : vector<1x1x1x32x8xf32> to vector<32x8xf32>
    %cst_188 = arith.constant dense<0.000000e+00> : vector<8x8xf32>
    %293 = tpu.matmul %254, %292, %cst_188 {dimension_numbers = #tpu.dot_dimension_numbers<[1], [0], [0], [1], [0, 0, 1, 1], [], []>} : vector<8x32xf32>, vector<32x8xf32>, vector<8x8xf32> -> vector<8x8xf32>
    %294 = vector.extract_strided_slice %227 {offsets = [0, 16], sizes = [1, 8], strides = [1, 1]} : vector<1x32xf32> to vector<1x8xf32>
    %295 = vector.broadcast %294 : vector<1x8xf32> to vector<8x8xf32>
    %296 = arith.addf %293, %295 : vector<8x8xf32>
    %c1_189 = arith.constant 1 : index
    %c1_190 = arith.constant 1 : index
    %c2_191 = arith.constant 2 : index
    %c0_192 = arith.constant 0 : index
    %c0_193 = arith.constant 0 : index
    %297 = vector.load %arg3[%c1_189, %c1_190, %c2_191, %c0_192, %c0_193] : memref<2x3x4x32x8xf32, #tpu.memory_space<vmem>>, vector<1x1x1x32x8xf32>
    %298 = vector.shape_cast %297 : vector<1x1x1x32x8xf32> to vector<32x8xf32>
    %cst_194 = arith.constant dense<0.000000e+00> : vector<8x8xf32>
    %299 = tpu.matmul %254, %298, %cst_194 {dimension_numbers = #tpu.dot_dimension_numbers<[1], [0], [0], [1], [0, 0, 1, 1], [], []>} : vector<8x32xf32>, vector<32x8xf32>, vector<8x8xf32> -> vector<8x8xf32>
    %300 = vector.extract_strided_slice %228 {offsets = [0, 16], sizes = [1, 8], strides = [1, 1]} : vector<1x32xf32> to vector<1x8xf32>
    %301 = vector.broadcast %300 : vector<1x8xf32> to vector<8x8xf32>
    %302 = arith.addf %299, %301 : vector<8x8xf32>
    %c1_195 = arith.constant 1 : index
    %c2_196 = arith.constant 2 : index
    %c2_197 = arith.constant 2 : index
    %c0_198 = arith.constant 0 : index
    %c0_199 = arith.constant 0 : index
    %303 = vector.load %arg3[%c1_195, %c2_196, %c2_197, %c0_198, %c0_199] : memref<2x3x4x32x8xf32, #tpu.memory_space<vmem>>, vector<1x1x1x32x8xf32>
    %304 = vector.shape_cast %303 : vector<1x1x1x32x8xf32> to vector<32x8xf32>
    %cst_200 = arith.constant dense<0.000000e+00> : vector<8x8xf32>
    %305 = tpu.matmul %254, %304, %cst_200 {dimension_numbers = #tpu.dot_dimension_numbers<[1], [0], [0], [1], [0, 0, 1, 1], [], []>} : vector<8x32xf32>, vector<32x8xf32>, vector<8x8xf32> -> vector<8x8xf32>
    %306 = vector.extract_strided_slice %229 {offsets = [0, 16], sizes = [1, 8], strides = [1, 1]} : vector<1x32xf32> to vector<1x8xf32>
    %307 = vector.broadcast %306 : vector<1x8xf32> to vector<8x8xf32>
    %308 = arith.addf %305, %307 : vector<8x8xf32>
    %c1_201 = arith.constant 1 : index
    %c0_202 = arith.constant 0 : index
    %c3_203 = arith.constant 3 : index
    %c0_204 = arith.constant 0 : index
    %c0_205 = arith.constant 0 : index
    %309 = vector.load %arg3[%c1_201, %c0_202, %c3_203, %c0_204, %c0_205] : memref<2x3x4x32x8xf32, #tpu.memory_space<vmem>>, vector<1x1x1x32x8xf32>
    %310 = vector.shape_cast %309 : vector<1x1x1x32x8xf32> to vector<32x8xf32>
    %cst_206 = arith.constant dense<0.000000e+00> : vector<8x8xf32>
    %311 = tpu.matmul %254, %310, %cst_206 {dimension_numbers = #tpu.dot_dimension_numbers<[1], [0], [0], [1], [0, 0, 1, 1], [], []>} : vector<8x32xf32>, vector<32x8xf32>, vector<8x8xf32> -> vector<8x8xf32>
    %312 = vector.extract_strided_slice %227 {offsets = [0, 24], sizes = [1, 8], strides = [1, 1]} : vector<1x32xf32> to vector<1x8xf32>
    %313 = vector.broadcast %312 : vector<1x8xf32> to vector<8x8xf32>
    %314 = arith.addf %311, %313 : vector<8x8xf32>
    %c1_207 = arith.constant 1 : index
    %c1_208 = arith.constant 1 : index
    %c3_209 = arith.constant 3 : index
    %c0_210 = arith.constant 0 : index
    %c0_211 = arith.constant 0 : index
    %315 = vector.load %arg3[%c1_207, %c1_208, %c3_209, %c0_210, %c0_211] : memref<2x3x4x32x8xf32, #tpu.memory_space<vmem>>, vector<1x1x1x32x8xf32>
    %316 = vector.shape_cast %315 : vector<1x1x1x32x8xf32> to vector<32x8xf32>
    %cst_212 = arith.constant dense<0.000000e+00> : vector<8x8xf32>
    %317 = tpu.matmul %254, %316, %cst_212 {dimension_numbers = #tpu.dot_dimension_numbers<[1], [0], [0], [1], [0, 0, 1, 1], [], []>} : vector<8x32xf32>, vector<32x8xf32>, vector<8x8xf32> -> vector<8x8xf32>
    %318 = vector.extract_strided_slice %228 {offsets = [0, 24], sizes = [1, 8], strides = [1, 1]} : vector<1x32xf32> to vector<1x8xf32>
    %319 = vector.broadcast %318 : vector<1x8xf32> to vector<8x8xf32>
    %320 = arith.addf %317, %319 : vector<8x8xf32>
    %c1_213 = arith.constant 1 : index
    %c2_214 = arith.constant 2 : index
    %c3_215 = arith.constant 3 : index
    %c0_216 = arith.constant 0 : index
    %c0_217 = arith.constant 0 : index
    %321 = vector.load %arg3[%c1_213, %c2_214, %c3_215, %c0_216, %c0_217] : memref<2x3x4x32x8xf32, #tpu.memory_space<vmem>>, vector<1x1x1x32x8xf32>
    %322 = vector.shape_cast %321 : vector<1x1x1x32x8xf32> to vector<32x8xf32>
    %cst_218 = arith.constant dense<0.000000e+00> : vector<8x8xf32>
    %323 = tpu.matmul %254, %322, %cst_218 {dimension_numbers = #tpu.dot_dimension_numbers<[1], [0], [0], [1], [0, 0, 1, 1], [], []>} : vector<8x32xf32>, vector<32x8xf32>, vector<8x8xf32> -> vector<8x8xf32>
    %324 = vector.extract_strided_slice %229 {offsets = [0, 24], sizes = [1, 8], strides = [1, 1]} : vector<1x32xf32> to vector<1x8xf32>
    %325 = vector.broadcast %324 : vector<1x8xf32> to vector<8x8xf32>
    %326 = arith.addf %323, %325 : vector<8x8xf32>
    %cst_219 = arith.constant 0.000000e+00 : f32
    %327 = vector.broadcast %cst_219 : f32 to vector<8x32xf32>
    "tpu.trace_start"() <{level = 10 : i32, message = "td,sd->ts"}> : () -> ()
    %cst_220 = arith.constant dense<0.000000e+00> : vector<8x8xf32>
    %328 = tpu.matmul %260, %266, %cst_220 {dimension_numbers = #tpu.dot_dimension_numbers<[1], [1], [0], [0], [0, 0, 1, 0], [], []>} : vector<8x8xf32>, vector<8x8xf32>, vector<8x8xf32> -> vector<8x8xf32>
    "tpu.trace_stop"() : () -> ()
    %cst_221 = arith.constant 0.353553385 : f32
    %329 = vector.broadcast %cst_221 : f32 to vector<8x8xf32>
    %330 = arith.mulf %328, %329 : vector<8x8xf32>
    %cst_222 = arith.constant dense<0xFF800000> : vector<8xf32>
    %331 = vector.multi_reduction <maximumf>, %330, %cst_222 [1] : vector<8x8xf32> to vector<8xf32>
    %332 = vector.shape_cast %331 : vector<8xf32> to vector<8x1xf32>
    %333 = vector.broadcast %332 : vector<8x1xf32> to vector<8x8xf32>
    %334 = arith.subf %330, %333 : vector<8x8xf32>
    %335 = math.exp %334 : vector<8x8xf32>
    %cst_223 = arith.constant dense<0.000000e+00> : vector<8xf32>
    %336 = vector.multi_reduction <add>, %335, %cst_223 [1] : vector<8x8xf32> to vector<8xf32>
    %337 = vector.shape_cast %336 : vector<8xf32> to vector<8x1xf32>
    %338 = tpu.reciprocal %337 {approx = true} : vector<8x1xf32> -> vector<8x1xf32>
    %339 = vector.broadcast %338 : vector<8x1xf32> to vector<8x8xf32>
    %340 = arith.mulf %335, %339 : vector<8x8xf32>
    %cst_224 = arith.constant dense<0.000000e+00> : vector<8x8xf32>
    %341 = tpu.matmul %340, %272, %cst_224 {dimension_numbers = #tpu.dot_dimension_numbers<[1], [0], [0], [1], [0, 0, 1, 1], [], []>} : vector<8x8xf32>, vector<8x8xf32>, vector<8x8xf32> -> vector<8x8xf32>
    %c1_225 = arith.constant 1 : index
    %c0_226 = arith.constant 0 : index
    %c0_227 = arith.constant 0 : index
    %c0_228 = arith.constant 0 : index
    %342 = vector.load %arg4[%c1_225, %c0_226, %c0_227, %c0_228] : memref<2x4x8x32xf32, #tpu.memory_space<vmem>>, vector<1x1x8x32xf32>
    %343 = vector.shape_cast %342 : vector<1x1x8x32xf32> to vector<8x32xf32>
    %cst_229 = arith.constant dense<0.000000e+00> : vector<8x32xf32>
    %344 = tpu.matmul %341, %343, %cst_229 {dimension_numbers = #tpu.dot_dimension_numbers<[1], [0], [0], [1], [0, 0, 1, 1], [], []>} : vector<8x8xf32>, vector<8x32xf32>, vector<8x32xf32> -> vector<8x32xf32>
    %345 = arith.addf %327, %344 : vector<8x32xf32>
    "tpu.trace_start"() <{level = 10 : i32, message = "td,sd->ts"}> : () -> ()
    %cst_230 = arith.constant dense<0.000000e+00> : vector<8x8xf32>
    %346 = tpu.matmul %278, %284, %cst_230 {dimension_numbers = #tpu.dot_dimension_numbers<[1], [1], [0], [0], [0, 0, 1, 0], [], []>} : vector<8x8xf32>, vector<8x8xf32>, vector<8x8xf32> -> vector<8x8xf32>
    "tpu.trace_stop"() : () -> ()
    %cst_231 = arith.constant 0.353553385 : f32
    %347 = vector.broadcast %cst_231 : f32 to vector<8x8xf32>
    %348 = arith.mulf %346, %347 : vector<8x8xf32>
    %cst_232 = arith.constant dense<0xFF800000> : vector<8xf32>
    %349 = vector.multi_reduction <maximumf>, %348, %cst_232 [1] : vector<8x8xf32> to vector<8xf32>
    %350 = vector.shape_cast %349 : vector<8xf32> to vector<8x1xf32>
    %351 = vector.broadcast %350 : vector<8x1xf32> to vector<8x8xf32>
    %352 = arith.subf %348, %351 : vector<8x8xf32>
    %353 = math.exp %352 : vector<8x8xf32>
    %cst_233 = arith.constant dense<0.000000e+00> : vector<8xf32>
    %354 = vector.multi_reduction <add>, %353, %cst_233 [1] : vector<8x8xf32> to vector<8xf32>
    %355 = vector.shape_cast %354 : vector<8xf32> to vector<8x1xf32>
    %356 = tpu.reciprocal %355 {approx = true} : vector<8x1xf32> -> vector<8x1xf32>
    %357 = vector.broadcast %356 : vector<8x1xf32> to vector<8x8xf32>
    %358 = arith.mulf %353, %357 : vector<8x8xf32>
    %cst_234 = arith.constant dense<0.000000e+00> : vector<8x8xf32>
    %359 = tpu.matmul %358, %290, %cst_234 {dimension_numbers = #tpu.dot_dimension_numbers<[1], [0], [0], [1], [0, 0, 1, 1], [], []>} : vector<8x8xf32>, vector<8x8xf32>, vector<8x8xf32> -> vector<8x8xf32>
    %c1_235 = arith.constant 1 : index
    %c1_236 = arith.constant 1 : index
    %c0_237 = arith.constant 0 : index
    %c0_238 = arith.constant 0 : index
    %360 = vector.load %arg4[%c1_235, %c1_236, %c0_237, %c0_238] : memref<2x4x8x32xf32, #tpu.memory_space<vmem>>, vector<1x1x8x32xf32>
    %361 = vector.shape_cast %360 : vector<1x1x8x32xf32> to vector<8x32xf32>
    %cst_239 = arith.constant dense<0.000000e+00> : vector<8x32xf32>
    %362 = tpu.matmul %359, %361, %cst_239 {dimension_numbers = #tpu.dot_dimension_numbers<[1], [0], [0], [1], [0, 0, 1, 1], [], []>} : vector<8x8xf32>, vector<8x32xf32>, vector<8x32xf32> -> vector<8x32xf32>
    %363 = arith.addf %345, %362 : vector<8x32xf32>
    "tpu.trace_start"() <{level = 10 : i32, message = "td,sd->ts"}> : () -> ()
    %cst_240 = arith.constant dense<0.000000e+00> : vector<8x8xf32>
    %364 = tpu.matmul %296, %302, %cst_240 {dimension_numbers = #tpu.dot_dimension_numbers<[1], [1], [0], [0], [0, 0, 1, 0], [], []>} : vector<8x8xf32>, vector<8x8xf32>, vector<8x8xf32> -> vector<8x8xf32>
    "tpu.trace_stop"() : () -> ()
    %cst_241 = arith.constant 0.353553385 : f32
    %365 = vector.broadcast %cst_241 : f32 to vector<8x8xf32>
    %366 = arith.mulf %364, %365 : vector<8x8xf32>
    %cst_242 = arith.constant dense<0xFF800000> : vector<8xf32>
    %367 = vector.multi_reduction <maximumf>, %366, %cst_242 [1] : vector<8x8xf32> to vector<8xf32>
    %368 = vector.shape_cast %367 : vector<8xf32> to vector<8x1xf32>
    %369 = vector.broadcast %368 : vector<8x1xf32> to vector<8x8xf32>
    %370 = arith.subf %366, %369 : vector<8x8xf32>
    %371 = math.exp %370 : vector<8x8xf32>
    %cst_243 = arith.constant dense<0.000000e+00> : vector<8xf32>
    %372 = vector.multi_reduction <add>, %371, %cst_243 [1] : vector<8x8xf32> to vector<8xf32>
    %373 = vector.shape_cast %372 : vector<8xf32> to vector<8x1xf32>
    %374 = tpu.reciprocal %373 {approx = true} : vector<8x1xf32> -> vector<8x1xf32>
    %375 = vector.broadcast %374 : vector<8x1xf32> to vector<8x8xf32>
    %376 = arith.mulf %371, %375 : vector<8x8xf32>
    %cst_244 = arith.constant dense<0.000000e+00> : vector<8x8xf32>
    %377 = tpu.matmul %376, %308, %cst_244 {dimension_numbers = #tpu.dot_dimension_numbers<[1], [0], [0], [1], [0, 0, 1, 1], [], []>} : vector<8x8xf32>, vector<8x8xf32>, vector<8x8xf32> -> vector<8x8xf32>
    %c1_245 = arith.constant 1 : index
    %c2_246 = arith.constant 2 : index
    %c0_247 = arith.constant 0 : index
    %c0_248 = arith.constant 0 : index
    %378 = vector.load %arg4[%c1_245, %c2_246, %c0_247, %c0_248] : memref<2x4x8x32xf32, #tpu.memory_space<vmem>>, vector<1x1x8x32xf32>
    %379 = vector.shape_cast %378 : vector<1x1x8x32xf32> to vector<8x32xf32>
    %cst_249 = arith.constant dense<0.000000e+00> : vector<8x32xf32>
    %380 = tpu.matmul %377, %379, %cst_249 {dimension_numbers = #tpu.dot_dimension_numbers<[1], [0], [0], [1], [0, 0, 1, 1], [], []>} : vector<8x8xf32>, vector<8x32xf32>, vector<8x32xf32> -> vector<8x32xf32>
    %381 = arith.addf %363, %380 : vector<8x32xf32>
    "tpu.trace_start"() <{level = 10 : i32, message = "td,sd->ts"}> : () -> ()
    %cst_250 = arith.constant dense<0.000000e+00> : vector<8x8xf32>
    %382 = tpu.matmul %314, %320, %cst_250 {dimension_numbers = #tpu.dot_dimension_numbers<[1], [1], [0], [0], [0, 0, 1, 0], [], []>} : vector<8x8xf32>, vector<8x8xf32>, vector<8x8xf32> -> vector<8x8xf32>
    "tpu.trace_stop"() : () -> ()
    %cst_251 = arith.constant 0.353553385 : f32
    %383 = vector.broadcast %cst_251 : f32 to vector<8x8xf32>
    %384 = arith.mulf %382, %383 : vector<8x8xf32>
    %cst_252 = arith.constant dense<0xFF800000> : vector<8xf32>
    %385 = vector.multi_reduction <maximumf>, %384, %cst_252 [1] : vector<8x8xf32> to vector<8xf32>
    %386 = vector.shape_cast %385 : vector<8xf32> to vector<8x1xf32>
    %387 = vector.broadcast %386 : vector<8x1xf32> to vector<8x8xf32>
    %388 = arith.subf %384, %387 : vector<8x8xf32>
    %389 = math.exp %388 : vector<8x8xf32>
    %cst_253 = arith.constant dense<0.000000e+00> : vector<8xf32>
    %390 = vector.multi_reduction <add>, %389, %cst_253 [1] : vector<8x8xf32> to vector<8xf32>
    %391 = vector.shape_cast %390 : vector<8xf32> to vector<8x1xf32>
    %392 = tpu.reciprocal %391 {approx = true} : vector<8x1xf32> -> vector<8x1xf32>
    %393 = vector.broadcast %392 : vector<8x1xf32> to vector<8x8xf32>
    %394 = arith.mulf %389, %393 : vector<8x8xf32>
    %cst_254 = arith.constant dense<0.000000e+00> : vector<8x8xf32>
    %395 = tpu.matmul %394, %326, %cst_254 {dimension_numbers = #tpu.dot_dimension_numbers<[1], [0], [0], [1], [0, 0, 1, 1], [], []>} : vector<8x8xf32>, vector<8x8xf32>, vector<8x8xf32> -> vector<8x8xf32>
    %c1_255 = arith.constant 1 : index
    %c3_256 = arith.constant 3 : index
    %c0_257 = arith.constant 0 : index
    %c0_258 = arith.constant 0 : index
    %396 = vector.load %arg4[%c1_255, %c3_256, %c0_257, %c0_258] : memref<2x4x8x32xf32, #tpu.memory_space<vmem>>, vector<1x1x8x32xf32>
    %397 = vector.shape_cast %396 : vector<1x1x8x32xf32> to vector<8x32xf32>
    %cst_259 = arith.constant dense<0.000000e+00> : vector<8x32xf32>
    %398 = tpu.matmul %395, %397, %cst_259 {dimension_numbers = #tpu.dot_dimension_numbers<[1], [0], [0], [1], [0, 0, 1, 1], [], []>} : vector<8x8xf32>, vector<8x32xf32>, vector<8x32xf32> -> vector<8x32xf32>
    %399 = arith.addf %381, %398 : vector<8x32xf32>
    %400 = arith.addf %222, %399 : vector<8x32xf32>
    %401 = vector.broadcast %230 : vector<1x32xf32> to vector<8x32xf32>
    %402 = arith.addf %400, %401 : vector<8x32xf32>
    %cst_260 = arith.constant dense<0.000000e+00> : vector<8xf32>
    %403 = vector.multi_reduction <add>, %402, %cst_260 [1] : vector<8x32xf32> to vector<8xf32>
    %404 = vector.shape_cast %403 : vector<8xf32> to vector<8x1xf32>
    %cst_261 = arith.constant 3.200000e+01 : f32
    %405 = vector.broadcast %cst_261 : f32 to vector<8x1xf32>
    %406 = arith.divf %404, %405 : vector<8x1xf32>
    %407 = vector.broadcast %406 : vector<8x1xf32> to vector<8x32xf32>
    %408 = arith.subf %402, %407 : vector<8x32xf32>
    %409 = arith.mulf %408, %408 : vector<8x32xf32>
    %cst_262 = arith.constant dense<0.000000e+00> : vector<8xf32>
    %410 = vector.multi_reduction <add>, %409, %cst_262 [1] : vector<8x32xf32> to vector<8xf32>
    %411 = vector.shape_cast %410 : vector<8xf32> to vector<8x1xf32>
    %cst_263 = arith.constant 0.0322580636 : f32
    %412 = vector.broadcast %cst_263 : f32 to vector<8x1xf32>
    %413 = arith.mulf %411, %412 : vector<8x1xf32>
    %414 = math.sqrt %413 : vector<8x1xf32>
    %cst_264 = arith.constant 9.99999997E-7 : f32
    %415 = vector.broadcast %cst_264 : f32 to vector<8x1xf32>
    %416 = arith.addf %414, %415 : vector<8x1xf32>
    %417 = tpu.reciprocal %416 : vector<8x1xf32> -> vector<8x1xf32>
    %418 = vector.broadcast %231 : vector<1x32xf32> to vector<8x32xf32>
    %419 = vector.broadcast %417 : vector<8x1xf32> to vector<8x32xf32>
    %420 = arith.mulf %418, %419 : vector<8x32xf32>
    %421 = arith.mulf %408, %420 : vector<8x32xf32>
    %422 = vector.broadcast %232 : vector<1x32xf32> to vector<8x32xf32>
    %423 = arith.addf %421, %422 : vector<8x32xf32>
    %c1_265 = arith.constant 1 : index
    %c0_266 = arith.constant 0 : index
    %c0_267 = arith.constant 0 : index
    %424 = vector.load %arg5[%c1_265, %c0_266, %c0_267] : memref<2x32x512xf32, #tpu.memory_space<vmem>>, vector<1x32x512xf32>
    %425 = vector.shape_cast %424 : vector<1x32x512xf32> to vector<32x512xf32>
    %cst_268 = arith.constant dense<0.000000e+00> : vector<8x512xf32>
    %426 = tpu.matmul %423, %425, %cst_268 {dimension_numbers = #tpu.dot_dimension_numbers<[1], [0], [0], [1], [0, 0, 1, 1], [], []>} : vector<8x32xf32>, vector<32x512xf32>, vector<8x512xf32> -> vector<8x512xf32>
    %c1_269 = arith.constant 1 : index
    %c0_270 = arith.constant 0 : index
    %c0_271 = arith.constant 0 : index
    %427 = vector.load %arg8[%c1_269, %c0_270, %c0_271] : memref<2x1x512xf32, #tpu.memory_space<vmem>>, vector<1x1x512xf32>
    %428 = vector.shape_cast %427 : vector<1x1x512xf32> to vector<1x512xf32>
    %429 = vector.broadcast %428 : vector<1x512xf32> to vector<8x512xf32>
    %430 = arith.addf %426, %429 : vector<8x512xf32>
    %cst_272 = arith.constant 0.000000e+00 : f32
    %431 = vector.broadcast %cst_272 : f32 to vector<8x512xf32>
    %432 = arith.maximumf %430, %431 : vector<8x512xf32>
    %c1_273 = arith.constant 1 : index
    %c0_274 = arith.constant 0 : index
    %c0_275 = arith.constant 0 : index
    %433 = vector.load %arg6[%c1_273, %c0_274, %c0_275] : memref<2x512x32xf32, #tpu.memory_space<vmem>>, vector<1x512x32xf32>
    %434 = vector.shape_cast %433 : vector<1x512x32xf32> to vector<512x32xf32>
    %cst_276 = arith.constant dense<0.000000e+00> : vector<8x32xf32>
    %435 = tpu.matmul %432, %434, %cst_276 {dimension_numbers = #tpu.dot_dimension_numbers<[1], [0], [0], [1], [0, 0, 1, 1], [], []>} : vector<8x512xf32>, vector<512x32xf32>, vector<8x32xf32> -> vector<8x32xf32>
    %436 = arith.addf %402, %435 : vector<8x32xf32>
    %437 = vector.broadcast %233 : vector<1x32xf32> to vector<8x32xf32>
    %438 = arith.addf %436, %437 : vector<8x32xf32>
    %c0_277 = arith.constant 0 : index
    %c0_278 = arith.constant 0 : index
    %439 = vector.load %arg9[%c0_277, %c0_278] : memref<5x32xf32, #tpu.memory_space<vmem>>, vector<5x32xf32>
    %440 = vector.extract_strided_slice %439 {offsets = [0, 0], sizes = [1, 32], strides = [1, 1]} : vector<5x32xf32> to vector<1x32xf32>
    %441 = vector.extract_strided_slice %439 {offsets = [1, 0], sizes = [1, 32], strides = [1, 1]} : vector<5x32xf32> to vector<1x32xf32>
    %442 = vector.extract_strided_slice %439 {offsets = [2, 0], sizes = [1, 32], strides = [1, 1]} : vector<5x32xf32> to vector<1x32xf32>
    %443 = vector.extract_strided_slice %439 {offsets = [3, 0], sizes = [1, 32], strides = [1, 1]} : vector<5x32xf32> to vector<1x32xf32>
    %444 = vector.extract_strided_slice %439 {offsets = [4, 0], sizes = [1, 32], strides = [1, 1]} : vector<5x32xf32> to vector<1x32xf32>
    %cst_279 = arith.constant dense<0.000000e+00> : vector<8xf32>
    %445 = vector.multi_reduction <add>, %438, %cst_279 [1] : vector<8x32xf32> to vector<8xf32>
    %446 = vector.shape_cast %445 : vector<8xf32> to vector<8x1xf32>
    %cst_280 = arith.constant 3.200000e+01 : f32
    %447 = vector.broadcast %cst_280 : f32 to vector<8x1xf32>
    %448 = arith.divf %446, %447 : vector<8x1xf32>
    %449 = vector.broadcast %448 : vector<8x1xf32> to vector<8x32xf32>
    %450 = arith.subf %438, %449 : vector<8x32xf32>
    %451 = arith.mulf %450, %450 : vector<8x32xf32>
    %cst_281 = arith.constant dense<0.000000e+00> : vector<8xf32>
    %452 = vector.multi_reduction <add>, %451, %cst_281 [1] : vector<8x32xf32> to vector<8xf32>
    %453 = vector.shape_cast %452 : vector<8xf32> to vector<8x1xf32>
    %cst_282 = arith.constant 0.0322580636 : f32
    %454 = vector.broadcast %cst_282 : f32 to vector<8x1xf32>
    %455 = arith.mulf %453, %454 : vector<8x1xf32>
    %456 = math.sqrt %455 : vector<8x1xf32>
    %cst_283 = arith.constant 9.99999997E-7 : f32
    %457 = vector.broadcast %cst_283 : f32 to vector<8x1xf32>
    %458 = arith.addf %456, %457 : vector<8x1xf32>
    %459 = tpu.reciprocal %458 : vector<8x1xf32> -> vector<8x1xf32>
    %460 = vector.broadcast %440 : vector<1x32xf32> to vector<8x32xf32>
    %461 = vector.broadcast %459 : vector<8x1xf32> to vector<8x32xf32>
    %462 = arith.mulf %460, %461 : vector<8x32xf32>
    %463 = arith.mulf %450, %462 : vector<8x32xf32>
    %464 = vector.broadcast %441 : vector<1x32xf32> to vector<8x32xf32>
    %465 = arith.addf %463, %464 : vector<8x32xf32>
    %466 = vector.shape_cast %465 : vector<8x32xf32> to vector<1x8x32xf32>
    %cst_284 = arith.constant dense<0xFF800000> : vector<1x32xf32>
    %467 = vector.multi_reduction <maximumf>, %466, %cst_284 [1] : vector<1x8x32xf32> to vector<1x32xf32>
    %c0_285 = arith.constant 0 : index
    %c0_286 = arith.constant 0 : index
    %468 = vector.load %arg10[%c0_285, %c0_286] : memref<32x32xf32, #tpu.memory_space<vmem>>, vector<32x32xf32>
    %cst_287 = arith.constant dense<0.000000e+00> : vector<1x32xf32>
    %469 = tpu.matmul %467, %468, %cst_287 {dimension_numbers = #tpu.dot_dimension_numbers<[1], [0], [0], [1], [0, 0, 1, 1], [], []>} : vector<1x32xf32>, vector<32x32xf32>, vector<1x32xf32> -> vector<1x32xf32>
    %470 = arith.addf %469, %442 : vector<1x32xf32>
    %cst_288 = arith.constant dense<0.000000e+00> : vector<1xf32>
    %471 = vector.multi_reduction <add>, %470, %cst_288 [1] : vector<1x32xf32> to vector<1xf32>
    %472 = vector.shape_cast %471 : vector<1xf32> to vector<1x1xf32>
    %cst_289 = arith.constant 3.200000e+01 : f32
    %473 = vector.broadcast %cst_289 : f32 to vector<1x1xf32>
    %474 = arith.divf %472, %473 : vector<1x1xf32>
    %475 = vector.broadcast %474 : vector<1x1xf32> to vector<1x32xf32>
    %476 = arith.subf %470, %475 : vector<1x32xf32>
    %477 = arith.mulf %476, %476 : vector<1x32xf32>
    %cst_290 = arith.constant dense<0.000000e+00> : vector<1xf32>
    %478 = vector.multi_reduction <add>, %477, %cst_290 [1] : vector<1x32xf32> to vector<1xf32>
    %479 = vector.shape_cast %478 : vector<1xf32> to vector<1x1xf32>
    %cst_291 = arith.constant 3.200000e+01 : f32
    %480 = vector.broadcast %cst_291 : f32 to vector<1x1xf32>
    %481 = arith.divf %479, %480 : vector<1x1xf32>
    %482 = vector.broadcast %474 : vector<1x1xf32> to vector<1x32xf32>
    %483 = arith.subf %470, %482 : vector<1x32xf32>
    %cst_292 = arith.constant 9.99999974E-6 : f32
    %484 = vector.broadcast %cst_292 : f32 to vector<1x1xf32>
    %485 = arith.addf %481, %484 : vector<1x1xf32>
    %486 = math.sqrt %485 : vector<1x1xf32>
    %487 = tpu.reciprocal %486 : vector<1x1xf32> -> vector<1x1xf32>
    %488 = vector.broadcast %487 : vector<1x1xf32> to vector<1x32xf32>
    %489 = arith.mulf %483, %488 : vector<1x32xf32>
    %490 = arith.mulf %489, %443 : vector<1x32xf32>
    %491 = arith.addf %490, %444 : vector<1x32xf32>
    %cst_293 = arith.constant 0.000000e+00 : f32
    %492 = vector.broadcast %cst_293 : f32 to vector<1x32xf32>
    %493 = arith.subf %492, %491 : vector<1x32xf32>
    %494 = math.exp %493 : vector<1x32xf32>
    %cst_294 = arith.constant 1.000000e+00 : f32
    %495 = vector.broadcast %cst_294 : f32 to vector<1x32xf32>
    %496 = arith.addf %495, %494 : vector<1x32xf32>
    %cst_295 = arith.constant 1.000000e+00 : f32
    %497 = vector.broadcast %cst_295 : f32 to vector<1x32xf32>
    %498 = arith.divf %497, %496 : vector<1x32xf32>
    %499 = arith.mulf %491, %498 : vector<1x32xf32>
    %c0_296 = arith.constant 0 : index
    %c0_297 = arith.constant 0 : index
    %500 = vector.load %arg11[%c0_296, %c0_297] : memref<32x32xf32, #tpu.memory_space<vmem>>, vector<32x32xf32>
    %cst_298 = arith.constant dense<0.000000e+00> : vector<1x32xf32>
    %501 = tpu.matmul %499, %500, %cst_298 {dimension_numbers = #tpu.dot_dimension_numbers<[1], [0], [0], [1], [0, 0, 1, 1], [], []>} : vector<1x32xf32>, vector<32x32xf32>, vector<1x32xf32> -> vector<1x32xf32>
    %c0_299 = arith.constant 0 : index
    %c0_300 = arith.constant 0 : index
    %502 = vector.load %arg12[%c0_299, %c0_300] : memref<1x32xf32, #tpu.memory_space<vmem>>, vector<1x32xf32>
    %503 = arith.addf %501, %502 : vector<1x32xf32>
    %cst_301 = arith.constant dense<0xFF800000> : vector<1xf32>
    %504 = vector.multi_reduction <maximumf>, %503, %cst_301 [1] : vector<1x32xf32> to vector<1xf32>
    %505 = vector.shape_cast %504 : vector<1xf32> to vector<1x1xf32>
    %506 = vector.broadcast %505 : vector<1x1xf32> to vector<1x32xf32>
    %507 = arith.subf %503, %506 : vector<1x32xf32>
    %508 = math.exp %507 : vector<1x32xf32>
    %cst_302 = arith.constant dense<0.000000e+00> : vector<1xf32>
    %509 = vector.multi_reduction <add>, %508, %cst_302 [1] : vector<1x32xf32> to vector<1xf32>
    %510 = vector.shape_cast %509 : vector<1xf32> to vector<1x1xf32>
    %511 = vector.broadcast %510 : vector<1x1xf32> to vector<1x32xf32>
    %512 = arith.divf %508, %511 : vector<1x32xf32>
    %cst_303 = arith.constant 0.000000e+00 : f32
    %cst_304 = arith.constant 1.000000e-01 : f32
    %513 = vector.broadcast %cst_303 : f32 to vector<1x32xf32>
    %514 = arith.maximumf %513, %512 : vector<1x32xf32>
    %515 = vector.broadcast %cst_304 : f32 to vector<1x32xf32>
    %516 = arith.minimumf %515, %514 : vector<1x32xf32>
    %cst_305 = arith.constant dense<0.000000e+00> : vector<1xf32>
    %517 = vector.multi_reduction <add>, %516, %cst_305 [1] : vector<1x32xf32> to vector<1xf32>
    %518 = vector.shape_cast %517 : vector<1xf32> to vector<1x1xf32>
    %cst_306 = arith.constant 9.99999993E-9 : f32
    %519 = vector.broadcast %cst_306 : f32 to vector<1x1xf32>
    %520 = arith.addf %518, %519 : vector<1x1xf32>
    %521 = vector.broadcast %520 : vector<1x1xf32> to vector<1x32xf32>
    %522 = arith.divf %516, %521 : vector<1x32xf32>
    %cst_307 = arith.constant 0.000000e+00 : f32
    %523 = vector.broadcast %cst_307 : f32 to vector<1x96xf32>
    %524 = tpu.concatenate %522, %523 in 1 : vector<1x32xf32>, vector<1x96xf32> -> vector<1x128xf32>
    %525 = vector.shape_cast %524 : vector<1x128xf32> to vector<1x1x128xf32>
    %c0_308 = arith.constant 0 : index
    %c0_309 = arith.constant 0 : index
    %c0_310 = arith.constant 0 : index
    %526 = vector.load %arg13[%c0_308, %c0_309, %c0_310] : memref<1x1x128xf32, #tpu.memory_space<vmem>>, vector<1x1x128xf32>
    tpu.vector_store %arg13[%c0_308, %c0_309, %c0_310], %525 {strides = array<i32>} : memref<1x1x128xf32, #tpu.memory_space<vmem>>, vector<1x1x128xf32>,
    return
  }
  func.func @transform_0(%arg0: i32) -> (i32, i32, i32) {
    %c0_i32 = arith.constant 0 : i32
    %c0_i32_0 = arith.constant 0 : i32
    %c0_i32_1 = arith.constant 0 : i32
    return %arg0, %c0_i32, %c0_i32_0 : i32, i32, i32
  }
  func.func @transform_1(%arg0: i32) -> (i32, i32) {
    %c0_i32 = arith.constant 0 : i32
    %c0_i32_0 = arith.constant 0 : i32
    %c0_i32_1 = arith.constant 0 : i32
    return %c0_i32, %c0_i32_0 : i32, i32
  }
  func.func @transform_2(%arg0: i32) -> (i32, i32, i32, i32, i32) {
    %c0_i32 = arith.constant 0 : i32
    %c0_i32_0 = arith.constant 0 : i32
    %c0_i32_1 = arith.constant 0 : i32
    %c0_i32_2 = arith.constant 0 : i32
    %c0_i32_3 = arith.constant 0 : i32
    %c0_i32_4 = arith.constant 0 : i32
    return %c0_i32, %c0_i32_0, %c0_i32_1, %c0_i32_2, %c0_i32_3 : i32, i32, i32, i32, i32
  }
  func.func @transform_3(%arg0: i32) -> (i32, i32, i32, i32) {
    %c0_i32 = arith.constant 0 : i32
    %c0_i32_0 = arith.constant 0 : i32
    %c0_i32_1 = arith.constant 0 : i32
    %c0_i32_2 = arith.constant 0 : i32
    %c0_i32_3 = arith.constant 0 : i32
    return %c0_i32, %c0_i32_0, %c0_i32_1, %c0_i32_2 : i32, i32, i32, i32
  }
  func.func @transform_4(%arg0: i32) -> (i32, i32, i32) {
    %c0_i32 = arith.constant 0 : i32
    %c0_i32_0 = arith.constant 0 : i32
    %c0_i32_1 = arith.constant 0 : i32
    %c0_i32_2 = arith.constant 0 : i32
    return %c0_i32, %c0_i32_0, %c0_i32_1 : i32, i32, i32
  }
  func.func @transform_5(%arg0: i32) -> (i32, i32, i32) {
    %c0_i32 = arith.constant 0 : i32
    %c0_i32_0 = arith.constant 0 : i32
    %c0_i32_1 = arith.constant 0 : i32
    %c0_i32_2 = arith.constant 0 : i32
    return %c0_i32, %c0_i32_0, %c0_i32_1 : i32, i32, i32
  }
  func.func @transform_6(%arg0: i32) -> (i32, i32, i32) {
    %c0_i32 = arith.constant 0 : i32
    %c0_i32_0 = arith.constant 0 : i32
    %c0_i32_1 = arith.constant 0 : i32
    %c0_i32_2 = arith.constant 0 : i32
    return %c0_i32, %c0_i32_0, %c0_i32_1 : i32, i32, i32
  }
  func.func @transform_7(%arg0: i32) -> (i32, i32, i32) {
    %c0_i32 = arith.constant 0 : i32
    %c0_i32_0 = arith.constant 0 : i32
    %c0_i32_1 = arith.constant 0 : i32
    %c0_i32_2 = arith.constant 0 : i32
    return %c0_i32, %c0_i32_0, %c0_i32_1 : i32, i32, i32
  }
  func.func @transform_8(%arg0: i32) -> (i32, i32) {
    %c0_i32 = arith.constant 0 : i32
    %c0_i32_0 = arith.constant 0 : i32
    %c0_i32_1 = arith.constant 0 : i32
    return %c0_i32, %c0_i32_0 : i32, i32
  }
  func.func @transform_9(%arg0: i32) -> (i32, i32) {
    %c0_i32 = arith.constant 0 : i32
    %c0_i32_0 = arith.constant 0 : i32
    %c0_i32_1 = arith.constant 0 : i32
    return %c0_i32, %c0_i32_0 : i32, i32
  }
  func.func @transform_10(%arg0: i32) -> (i32, i32) {
    %c0_i32 = arith.constant 0 : i32
    %c0_i32_0 = arith.constant 0 : i32
    %c0_i32_1 = arith.constant 0 : i32
    return %c0_i32, %c0_i32_0 : i32, i32
  }
  func.func @transform_11(%arg0: i32) -> (i32, i32) {
    %c0_i32 = arith.constant 0 : i32
    %c0_i32_0 = arith.constant 0 : i32
    %c0_i32_1 = arith.constant 0 : i32
    return %c0_i32, %c0_i32_0 : i32, i32
  }
  func.func @transform_12(%arg0: i32) -> (i32, i32, i32) {
    %c0_i32 = arith.constant 0 : i32
    %c0_i32_0 = arith.constant 0 : i32
    %c0_i32_1 = arith.constant 0 : i32
    return %arg0, %c0_i32, %c0_i32_0 : i32, i32, i32
  }
}

</mosaic_0001>

<bundles_post_ra>
// kernel: portfolio_transformer_forward.1
= control target key start
LH: loop header
LB: loop body
LE: loop exit
PB: predicated region body
PF: predicated region fallthrough
CT: control target
= control target key end

     0   :  { %s8432_s0 = inlined_call_operand.vmem [shape: f32[2,8,32], index: 0, kind: input, shape index: {}]   ;;  %s8433_s1 = inlined_call_operand.vmem [shape: f32[8,32], index: 1, kind: input, shape index: {}]   ;;  %s8434_s2 = inlined_call_operand.vmem [shape: f32[2,3,4,32,8], index: 2, kind: input, shape index: {}]   ;;  %s8435_s3 = inlined_call_operand.vmem [shape: f32[2,4,8,32], index: 3, kind: input, shape index: {}]   ;;  %s8436_s4 = inlined_call_operand.vmem [shape: f32[2,32,512], index: 4, kind: input, shape index: {}]   ;;  %s8437_s5 = inlined_call_operand.vmem [shape: f32[2,512,32], index: 5, kind: input, shape index: {}]   ;;  %s8438_s6 = inlined_call_operand.vmem [shape: f32[2,9,32], index: 6, kind: input, shape index: {}]   ;;  %s8439_s7 = inlined_call_operand.vmem [shape: f32[2,1,512], index: 7, kind: input, shape index: {}]   ;;  %s8440_s8 = inlined_call_operand.vmem [shape: f32[5,32], index: 8, kind: input, shape index: {}]   ;;  %s8441_s9 = inlined_call_operand.vmem [shape: f32[32,32], index: 9, kind: input, shape index: {}]   ;;  %s8442_s10 = inlined_call_operand.vmem [shape: f32[32,32], index: 10, kind: input, shape index: {}]   ;;  %s8443_s11 = inlined_call_operand.vmem [shape: f32[1,32], index: 11, kind: input, shape index: {}]   ;;  %s8444_s12 = inlined_call_operand.hbm [shape: f32[2,1,128], index: 12, kind: output, shape index: {}]  }
   0x1   :  { %8451 = sst [smem:[#allocation6_spill]] %s8432_s0 }
   0x2   :  { %8452 = sst [smem:[#allocation7_spill]] %s8433_s1 }
   0x3   :  { %17 = vsyncpa [#allocation3], 0 }
   0x4   :  { %19 = vsyncpa [#allocation3 + $0x1], 0  ;;  %s6989_s21 = smov 0   ;;  %s6991_s22 = smov 0  }
   0x5   :  { %s6993_s23 = smov 0   ;;  %s6995_s24 = smov 0  }
   0x6 LB: > { %s7010_s25 = sadd.s32 4294967295, %s6915_s24   ;;  %s5448_s26 = sadd.s32 4294967294, %s6915_s24   ;;  %s6915_s24 = sphi %s6995_s24, %s8465_s24   ;;  %s6911_s23 = sphi %s6993_s23, %s8464_s23   ;;  %s6907_s22 = sphi %s6991_s22, %s8463_s22   ;;  %s6903_s21 = sphi %s6989_s21, %s8462_s21  }
   0x7   : > { %s7014_s27 = sadd.s32 1, %s6915_s24   ;;  %s289_s28 = sadd.s32 1, %s6911_s23 }
   0x8   : > { %s286_s29 = ssub.s32 %s6915_s24, %s7014_s27  ;;  %p299_p0 = scmp.ne.s32.totalorder %s6911_s23, %s6907_s22 }
   0x9   : > { %p287_p1 = scmp.eq.s32.totalorder %s286_s29, 0  ;;  %p300_p2 = scmp.eq.s32.totalorder %s7010_s25, 1 }
   0xa   : > { %p305_p3 = scmp.ne.s32.totalorder %s6907_s22, %s6903_s21  ;;  %p306_p4 = scmp.eq.s32.totalorder %s5448_s26, 1 }
   0xb   : > { %s7025_s30 = scalar_select %p287_p1, %s6911_s23, %s289_s28  }
   0xc   : > { %p7027_p5 = por %p300_p2, %p299_p0  ;;  %p7031_p6 = por %p306_p4, %p305_p3 }
   0xd   : > { %8453 = sst [smem:[#allocation5_spill]] %s7025_s30  ;;  %p5451_p7 = scmp.ge.s32.totalorder %s6915_s24, 1 }
   0xe   : > { %p364_p8 = scmp.lt.s32.totalorder %s6915_s24, 3 }
  0x10   : > { %p365_p9 = pnand %p5451_p7, %p364_p8 }
  0x11   : > { %p404_p10 = scmp.lt.s32.totalorder (!%p365_p9), %s7010_s25, 1  ;;  %s8456_s0 = sld [smem:[#allocation6_spill]] (!%p365_p9)  ;;  %vm414_vm0 = vcmask (!%p365_p9), 261120   ;;  %v446_v10 = vld [vmem:[%s8434_s2] sm:$0xff] (!%p365_p9)  ;;  %v447_v11 = vld [vmem:[%s8434_s2 + $0x8] sm:$0xff] (!%p365_p9)  ;;  %v6917_v15 = vmov (!%p365_p9), 0.0|0.0   ;;  %v435_v24 = vlaneseq (!%p365_p9) }
  0x12   : > { %368 = sbr.rel (%p365_p9) target bundleno = 8776 (0x2248), region = 68  ;;  %s8457_s1 = sld [smem:[#allocation7_spill]] (!%p365_p9)  ;;  %v5454_v12 = vld [vmem:[%s8434_s2 + $0x80] sm:$0xff] (!%p365_p9)  ;;  %v6427_v13 = vpack.c.bf16 (!%p365_p9), %v447_v11, %v446_v10  ;;  %v5455_v14 = vld [vmem:[%s8434_s2 + $0x88] sm:$0xff] (!%p365_p9)  ;;  %6426 = vmatprep.subr.bf16.mxu0 (!%p365_p9), %v6917_v15  ;;  %6432 = vmatprep.subr.bf16.mxu1 (!%p365_p9), %v6917_v15  ;;  %v448_v17 = vld [vmem:[%s8434_s2 + $0x10] sm:$0xff] (!%p365_p9)  ;;  %vm6918_vm1 = vmmov (!%p365_p9), 0  }
  0x13   : > { %v6433_v16 = vpack.c.bf16 (!%p365_p9), %v5455_v14, %v5454_v12  ;;  %v449_v18 = vld [vmem:[%s8434_s2 + $0x18] sm:$0xff] (!%p365_p9)  ;;  %v5456_v19 = vld [vmem:[%s8434_s2 + $0x90] sm:$0xff] (!%p365_p9)  ;;  %v6919_v23 = vmov (!%p365_p9), 0.0   ;;  %v7089_v25 = vshrl.u32 (!%p365_p9), %v435_v24, 7  ;;  %v7100_v28 = vld [vmem:[%s8438_s6] sm:$0xff] (!%p365_p9)  ;;  %s8449_s28 = smov (!%p365_p9), 120  }
  0x14   : > { %6428 = vmatpush3.bf16.msra.mxu0 (!%p365_p9), %v6427_v13  ;;  %v6430_v20 = vpack.c.bf16 (!%p365_p9), %v449_v18, %v448_v17  ;;  %v5457_v21 = vld [vmem:[%s8434_s2 + $0x98] sm:$0xff] (!%p365_p9)  ;;  %6028 = vmatprep.mubr.msk.f32.mxu0 (!%p365_p9), %vm6918_vm1, %v6919_v23  ;;  %v5459_v43 = vld [vmem:[%s8434_s2 + $0x100] sm:$0xff] (!%p365_p9)  ;;  %v5460_v46 = vld [vmem:[%s8434_s2 + $0x108] sm:$0xff] (!%p365_p9)  ;;  %vm1390_vm4 = vcmask (!%p365_p9), 64512   ;;  %s8447_s29 = smov (!%p365_p9), 112   ;;  %s8458_s30 = smov (!%p365_p9), 120  }
  0x15   : > { %6434 = vmatpush3.bf16.msra.mxu1 (!%p365_p9), %v6433_v16  ;;  %6429 = vmatprep.subr.bf16.mxu0 (!%p365_p9), %v6917_v15  ;;  %v6436_v22 = vpack.c.bf16 (!%p365_p9), %v5457_v21, %v5456_v19  ;;  %v7092_v26 = vsub.s32 (!%p365_p9), 3, %v7089_v25  ;;  %v7095_v27 = vsub.s32 (!%p365_p9), 2, %v7089_v25  ;;  %v7115_v39 = vsub.s32 (!%p365_p9), 0, %v7089_v25  ;;  %v5464_v47 = vld [vmem:[%s8434_s2 + $0x20] sm:$0xff] (!%p365_p9)  ;;  %v5465_v48 = vld [vmem:[%s8434_s2 + $0x28] sm:$0xff] (!%p365_p9)  ;;  %v5461_v52 = vld [vmem:[%s8434_s2 + $0x110] sm:$0xff] (!%p365_p9) }
  0x16   : > { %6435 = vmatprep.subr.bf16.mxu1 (!%p365_p9), %v6917_v15  ;;  %6039 = vmatprep.mubr.msk.f32.mxu1 (!%p365_p9), %vm6918_vm1, %v6919_v23  ;;  %v7120_v41 = vsub.s32 (!%p365_p9), 1, %v7089_v25  ;;  %v6439_v50 = vpack.c.bf16 (!%p365_p9), %v5460_v46, %v5459_v43  ;;  %v6445_v51 = vpack.c.bf16 (!%p365_p9), %v5465_v48, %v5464_v47  ;;  %v5462_v54 = vld [vmem:[%s8434_s2 + $0x118] sm:$0xff] (!%p365_p9)  ;;  %v5466_v55 = vld [vmem:[%s8434_s2 + $0x30] sm:$0xff] (!%p365_p9)  ;;  %v5469_v59 = vld [vmem:[%s8434_s2 + $0xa0] sm:$0xff] (!%p365_p9)  ;;  %s8460_s20 = smov (!%p365_p9), 104   ;;  %vm5247_vm13 = vcmask (!%p365_p9), 253952  }
  0x17   : > { %v7104_v29 = vrot.slane (!%p365_p9), %v7100_v28, %v7092_v26  ;;  %v7110_v30 = vrot.slane (!%p365_p9), %v7100_v28, %v7095_v27  ;;  %v438_v40 = vrot.slane (!%p365_p9), %v7100_v28, %v7115_v39  ;;  %v5467_v56 = vld [vmem:[%s8434_s2 + $0x38] sm:$0xff] (!%p365_p9)  ;;  %v6442_v57 = vpack.c.bf16 (!%p365_p9), %v5462_v54, %v5461_v52  ;;  %v5470_v60 = vld [vmem:[%s8434_s2 + $0xa8] sm:$0xff] (!%p365_p9)  ;;  %v5474_v61 = vld [vmem:[%s8434_s2 + $0x120] sm:$0xff] (!%p365_p9)  ;;  %s5699_s17 = sshll.u32 (!%p365_p9), %s7010_s25, 4 }
  0x18   : > { %v410_v1 = vld [vmem:[%s8457_s1] sm:$0xff] (!%p365_p9)  ;;  %6431 = vmatpush3.bf16.msra.mxu0 (!%p365_p9), %v6430_v20  ;;  %v444_v44 = vrot.slane (!%p365_p9), %v7100_v28, %v7120_v41  ;;  %v6448_v58 = vpack.c.bf16 (!%p365_p9), %v5467_v56, %v5466_v55  ;;  %v5475_v62 = vld [vmem:[%s8434_s2 + $0x128] sm:$0xff] (!%p365_p9)  ;;  %v6451_v63 = vpack.c.bf16 (!%p365_p9), %v5470_v60, %v5469_v59  ;;  %v5481_v14 = vld [vmem:[%s8434_s2 + $0x50] sm:$0xff] (!%p365_p9)  ;;  %v613_v60 = vsub.s32 (!%p365_p9), 4, %v7089_v25  ;;  %s8459_s1 = smov (!%p365_p9), 112  }
  0x19   : > { %s405_s15 = scalar_select %p404_p10, %s7010_s25, 1  ;;  %6437 = vmatpush3.bf16.msra.mxu1 %v6436_v22  ;;  %6438 = vmatprep.subr.bf16.mxu0 %v6917_v15  ;;  %v5484_v10 = vld [vmem:[%s8434_s2 + $0xc0] sm:$0xff]  ;;  %v5485_v11 = vld [vmem:[%s8434_s2 + $0xc8] sm:$0xff]  ;;  %v5482_v16 = vld [vmem:[%s8434_s2 + $0x58] sm:$0xff] }
  0x1a   : > { %6444 = vmatprep.subr.bf16.mxu1 %v6917_v15  ;;  %770 = vrot.lane.b32.xlu1 %v7104_v29, %s8449_s28  ;;  %v6469_v13 = vpack.c.bf16 %v5485_v11, %v5484_v10  ;;  %v5486_v17 = vld [vmem:[%s8434_s2 + $0xd0] sm:$0xff]  ;;  %v5487_v18 = vld [vmem:[%s8434_s2 + $0xd8] sm:$0xff]  ;;  %v6466_v19 = vpack.c.bf16 %v5482_v16, %v5481_v14  ;;  %v5489_v21 = vld [vmem:[%s8434_s2 + $0x140] sm:$0xff]  ;;  %s6923_s25 = smov [#allocation2]  }
  0x1b   : > { %s5452_s16 = sshll.u32 %s405_s15, 3  ;;  %v6472_v20 = vpack.c.bf16 %v5487_v18, %v5486_v17  ;;  %v5490_v22 = vld [vmem:[%s8434_s2 + $0x148] sm:$0xff]  ;;  %v5494_v24 = vld [vmem:[%s8434_s2 + $0x60] sm:$0xff]  ;;  %v5501_v48 = vld [vmem:[%s8434_s2 + $0xf0] sm:$0xff] }
  0x1c   : > { %s407_s19 = scalar_lea.vmem %s8456_s0, %s5452_s16  ;;  %v5500_v43 = vld [vmem:[%s8434_s2 + $0xe8] sm:$0xff]  ;;  %s402_s16 = sand.u32 1, %s6907_s22  }
  0x1d   : > { %v408_v0 = vld [vmem:[%s407_s19] sm:$0xff]  ;;  %s8445_s19 = smov 104   ;;  %s403_s18 = scalar_lea.vmem [#allocation2], %s402_s16 }
  0x1e   : > { %v409_v2 = vmul.f32 5.656854, %v408_v0  ;;  %691 = vrot.lane.b32.xlu1 %v7110_v30, %s8449_s28  ;;  %v6457_v0 = vpack.c.bf16 %v5475_v62, %v5474_v61 }
  0x20   : > { %v7045_v3 = vadd.f32 %v410_v1, %v409_v2  ;;  %v5471_v1 = vld [vmem:[%s8434_s2 + $0xb0] sm:$0xff]  ;;  %v5472_v2 = vld [vmem:[%s8434_s2 + $0xb8] sm:$0xff] }
  0x22   : > { %v415_v4 = vsel %vm414_vm0, %v7045_v3, 0.0 }
  0x23   : > { %416 = vadd.xlane.f32.xlu0 %v415_v4  ;;  %v5476_v4 = vld [vmem:[%s8434_s2 + $0x130] sm:$0xff] }
  0x8c   : > { %v771_v62 = vpop.permute.xlu1 %770 }
  0xb0   : > { %v417_v5 = vpop.xlane.xlu0 %416 }
  0xb1   : > { %v419_v6 = vmul.f32 0.03125, %v417_v5  ;;  %v5477_v5 = vld [vmem:[%s8434_s2 + $0x138] sm:$0xff] }
  0xb3   : > { %v7050_v7 = vsub.f32 %v7045_v3, %v419_v6  ;;  %v6454_v6 = vpack.c.bf16 %v5472_v2, %v5471_v1 }
  0xb5   : > { %v421_v8 = vmul.f32 %v7050_v7, %v7050_v7 }
  0xb7   : > { %v422_v9 = vsel %vm414_vm0, %v421_v8, 0.0  ;;  %v5479_v8 = vld [vmem:[%s8434_s2 + $0x40] sm:$0xff] }
  0xb8   : > { %423 = vadd.xlane.f32.xlu0 %v422_v9  ;;  %v5480_v9 = vld [vmem:[%s8434_s2 + $0x48] sm:$0xff] }
  0xb9   : > { %v6463_v12 = vpack.c.bf16 %v5480_v9, %v5479_v8 }
 0x145   : > { %v424_v31 = vpop.xlane.xlu0 %423 }
 0x146   : > { %v425_v32 = vmul.f32 0.032258064, %v424_v31  ;;  %v5495_v31 = vld [vmem:[%s8434_s2 + $0x68] sm:$0xff] }
 0x148   : > { %6787 = vrsqrt.f32 %v425_v32  ;;  %vm428_vm2 = vcmp.eq.f32.partialorder %v425_v32, inf  ;;  %v431_v35 = vand.u32 2147483648, %v425_v32  ;;  %vm430_vm3 = vcmp.eq.f32.partialorder %v425_v32, 0.0 }
 0x152   : > { %v6788_v33 = vpop.eup %6787 }
 0x153   : > { %v427_v34 = vmul.f32 %v6788_v33, %v425_v32  ;;  %v6481_v33 = vpack.c.bf16 %v5495_v31, %v5494_v24 }
 0x155   : > { %v429_v36 = vsel %vm428_vm2, %v425_v32, %v427_v34  ;;  %v6475_v32 = vpack.c.bf16 %v5490_v22, %v5489_v21  ;;  %v5491_v34 = vld [vmem:[%s8434_s2 + $0x150] sm:$0xff] }
 0x156   : > { %v432_v37 = vsel %vm430_vm3, %v431_v35, %v429_v36  ;;  %v5492_v35 = vld [vmem:[%s8434_s2 + $0x158] sm:$0xff]  ;;  %v5496_v36 = vld [vmem:[%s8434_s2 + $0x70] sm:$0xff] }
 0x157   : > { %v433_v38 = vadd.f32 1e-06, %v432_v37  ;;  %v5497_v37 = vld [vmem:[%s8434_s2 + $0x78] sm:$0xff] }
 0x159   : > { %6789 = vrcp.f32 %v433_v38  ;;  %v6478_v38 = vpack.c.bf16 %v5492_v35, %v5491_v34 }
 0x163   : > { %v6790_v42 = vpop.eup %6789 }
 0x164   : > { %v439_v45 = vmul.f32 %v6790_v42, %v438_v40  ;;  %v6484_v40 = vpack.c.bf16 %v5497_v37, %v5496_v36  ;;  %v5499_v42 = vld [vmem:[%s8434_s2 + $0xe0] sm:$0xff] }
 0x165   : > { %v6487_v46 = vpack.c.bf16 %v5500_v43, %v5499_v42 }
 0x166   : > { %v440_v49 = vmul.f32 %v439_v45, %v7050_v7  ;;  %v6460_v7 = vpack.c.bf16 %v5477_v5, %v5476_v4  ;;  %v5505_v45 = vld [vmem:[%s8434_s2 + $0x168] sm:$0xff]  ;;  %v692_v5 = vpop.permute.xlu1 %691 }
 0x168   : > { %v7140_v53 = vadd.f32 %v444_v44, %v440_v49  ;;  %v5504_v44 = vld [vmem:[%s8434_s2 + $0x160] sm:$0xff]  ;;  %v5502_v49 = vld [vmem:[%s8434_s2 + $0xf8] sm:$0xff] }
 0x169   : > { %v6493_v47 = vpack.c.bf16 %v5505_v45, %v5504_v44  ;;  %v6490_v52 = vpack.c.bf16 %v5502_v49, %v5501_v48 }
 0x16a   : > { %6029 = vmatmul.mubr.msk.f32.vlgmr.msra.gmra.mrb[0].mxu0 %vm414_vm0, %v7140_v53  ;;  %6040 = vmatmul.mubr.msk.f32.vlgmr.msra.gmra.mrb[0].mxu1 %vm414_vm0, %v7140_v53 }
 0x16b   : > { %6440 = vmatpush3.bf16.msra.mxu0 %v6439_v50  ;;  %6446 = vmatpush3.bf16.msra.mxu1 %v6445_v51  ;;  %v5506_v50 = vld [vmem:[%s8434_s2 + $0x170] sm:$0xff]  ;;  %v5507_v51 = vld [vmem:[%s8434_s2 + $0x178] sm:$0xff] }
 0x16c   : > { %6441 = vmatprep.subr.bf16.mxu0 %v6917_v15  ;;  %6447 = vmatprep.subr.bf16.mxu1 %v6917_v15  ;;  %v6496_v54 = vpack.c.bf16 %v5507_v51, %v5506_v50 }
 0x16d   : > { %6050 = vmatprep.mubr.msk.f32.mxu0 %vm6918_vm1, %v6919_v23  ;;  %6061 = vmatprep.mubr.msk.f32.mxu1 %vm6918_vm1, %v6919_v23 }
 0x16f   : > { %6443 = vmatpush3.bf16.msra.mxu0 %v6442_v57  ;;  %6449 = vmatpush3.bf16.msra.mxu1 %v6448_v58 }
 0x170   : > { %6450 = vmatprep.subr.bf16.mxu0 %v6917_v15  ;;  %6456 = vmatprep.subr.bf16.mxu1 %v6917_v15 }
 0x172   : > { %6051 = vmatmul.mubr.msk.f32.vlgmr.msra.gmra.mrb[2].mxu0 %vm414_vm0, %v7140_v53  ;;  %6062 = vmatmul.mubr.msk.f32.vlgmr.msra.gmra.mrb[2].mxu1 %vm414_vm0, %v7140_v53 }
 0x173   : > { %6452 = vmatpush3.bf16.msra.mxu0 %v6451_v63  ;;  %6458 = vmatpush3.bf16.msra.mxu1 %v6457_v0 }
 0x174   : > { %6453 = vmatprep.subr.bf16.mxu0 %v6917_v15  ;;  %6459 = vmatprep.subr.bf16.mxu1 %v6917_v15 }
 0x175   : > { %6072 = vmatprep.mubr.msk.f32.mxu0 %vm6918_vm1, %v6919_v23  ;;  %6083 = vmatprep.mubr.msk.f32.mxu1 %vm6918_vm1, %v6919_v23 }
 0x177   : > { %6455 = vmatpush3.bf16.msra.mxu0 %v6454_v6  ;;  %6461 = vmatpush3.bf16.msra.mxu1 %v6460_v7 }
 0x178   : > { %6462 = vmatprep.subr.bf16.mxu0 %v6917_v15  ;;  %6468 = vmatprep.subr.bf16.mxu1 %v6917_v15 }
 0x17a   : > { %6073 = vmatmul.mubr.msk.f32.vlgmr.msra.gmra.mrb[4].mxu0 %vm414_vm0, %v7140_v53  ;;  %6084 = vmatmul.mubr.msk.f32.vlgmr.msra.gmra.mrb[4].mxu1 %vm414_vm0, %v7140_v53 }
 0x17b   : > { %6464 = vmatpush3.bf16.msra.mxu0 %v6463_v12  ;;  %6470 = vmatpush3.bf16.msra.mxu1 %v6469_v13 }
 0x17c   : > { %6465 = vmatprep.subr.bf16.mxu0 %v6917_v15  ;;  %6471 = vmatprep.subr.bf16.mxu1 %v6917_v15 }
 0x17d   : > { %6094 = vmatprep.mubr.msk.f32.mxu0 %vm6918_vm1, %v6919_v23  ;;  %6105 = vmatprep.mubr.msk.f32.mxu1 %vm6918_vm1, %v6919_v23 }
 0x17f   : > { %6467 = vmatpush3.bf16.msra.mxu0 %v6466_v19  ;;  %6473 = vmatpush3.bf16.msra.mxu1 %v6472_v20 }
 0x180   : > { %6474 = vmatprep.subr.bf16.mxu0 %v6917_v15  ;;  %6480 = vmatprep.subr.bf16.mxu1 %v6917_v15 }
 0x182   : > { %6095 = vmatmul.mubr.msk.f32.vlgmr.msra.gmra.mrb[6].mxu0 %vm414_vm0, %v7140_v53  ;;  %6106 = vmatmul.mubr.msk.f32.vlgmr.msra.gmra.mrb[6].mxu1 %vm414_vm0, %v7140_v53 }
 0x183   : > { %6476 = vmatpush3.bf16.msra.mxu0 %v6475_v32  ;;  %6482 = vmatpush3.bf16.msra.mxu1 %v6481_v33 }
 0x184   : > { %6477 = vmatprep.subr.bf16.mxu0 %v6917_v15  ;;  %6483 = vmatprep.subr.bf16.mxu1 %v6917_v15 }
 0x185   : > { %6116 = vmatprep.mubr.msk.f32.mxu0 %vm6918_vm1, %v6919_v23  ;;  %6127 = vmatprep.mubr.msk.f32.mxu1 %vm6918_vm1, %v6919_v23 }
 0x187   : > { %6479 = vmatpush3.bf16.msra.mxu0 %v6478_v38  ;;  %6485 = vmatpush3.bf16.msra.mxu1 %v6484_v40 }
 0x188   : > { %6486 = vmatprep.subr.bf16.mxu0 %v6917_v15  ;;  %6492 = vmatprep.subr.bf16.mxu1 %v6917_v15 }
 0x18a   : > { %6117 = vmatmul.mubr.msk.f32.vlgmr.msra.gmra.mrb[8].mxu0 %vm414_vm0, %v7140_v53  ;;  %6128 = vmatmul.mubr.msk.f32.vlgmr.msra.gmra.mrb[8].mxu1 %vm414_vm0, %v7140_v53 }
 0x18b   : > { %6488 = vmatpush3.bf16.msra.mxu0 %v6487_v46  ;;  %6494 = vmatpush3.bf16.msra.mxu1 %v6493_v47 }
 0x18c   : > { %6489 = vmatprep.subr.bf16.mxu0 %v6917_v15  ;;  %6495 = vmatprep.subr.bf16.mxu1 %v6917_v15 }
 0x18d   : > { %6138 = vmatprep.mubr.msk.f32.mxu0 %vm6918_vm1, %v6919_v23  ;;  %6149 = vmatprep.mubr.msk.f32.mxu1 %vm6918_vm1, %v6919_v23 }
 0x18f   : > { %6491 = vmatpush3.bf16.msra.mxu0 %v6490_v52  ;;  %6497 = vmatpush3.bf16.msra.mxu1 %v6496_v54 }
 0x190   : > { %6152 = vmatprep.subr.mxu0 %v6919_v23  ;;  %6157 = vmatprep.subr.mxu1 %v6919_v23 }
 0x192   : > { %6139 = vmatmul.mubr.msk.f32.vlgmr.msra.gmra.mrb[10].mxu0 %vm414_vm0, %v7140_v53  ;;  %6150 = vmatmul.mubr.msk.f32.vlgmr.msra.gmra.mrb[10].mxu1 %vm414_vm0, %v7140_v53  ;;  %v7323_v53 = vrot.slane %v7100_v28, %v613_v60 }
 0x193   : > { %6154 = vmatprep.mubr.msk.f32.mxu0 %vm6918_vm1, %v6919_v23  ;;  %6159 = vmatprep.mubr.msk.f32.mxu1 %vm6918_vm1, %v6919_v23 }
 0x23d   : > { %v523_v55 = vpop.f32.mrb[0].mxu0  ;;  %v602_v56 = vpop.f32.mrb[0].mxu1 }
 0x23e   : > { %v603_v57 = vadd.f32 %v602_v56, %v7104_v29  ;;  %v6030_v58 = vpop.f32.mrb[1].mxu0  ;;  %v6041_v59 = vpop.f32.mrb[1].mxu1  ;;  %v524_v61 = vadd.f32 %v523_v55, %v7110_v30 }
 0x240   : > { %6153 = vmatpush3.xpose.msk.msra.mxu0 %vm1390_vm4, %v603_v57 }
 0x241   : > { %6162 = vmatprep.subr.mxu0 %v6919_v23 }
 0x243   : > { %6155 = vmatmul.mubr.msk.f32.vlgmr.msra.gmra.mrb[12].mxu0 %vm1390_vm4, %v524_v61 }
 0x244   : > { %6164 = vmatprep.mubr.msk.f32.mxu0 %vm6918_vm1, %v6919_v23 }
 0x245   : > { %v681_v63 = vpop.f32.mrb[2].mxu0  ;;  %v760_v0 = vpop.f32.mrb[2].mxu1 }
 0x246   : > { %v682_v1 = vadd.f32 %v681_v63, %v7323_v53  ;;  %v6052_v2 = vpop.f32.mrb[3].mxu0  ;;  %v6063_v4 = vpop.f32.mrb[3].mxu1  ;;  %v761_v11 = vadd.f32 %v760_v0, %v692_v5  ;;  %v5515_v63 = vld [vmem:[%s8435_s3 + $0x8] sm:$0xff] }
 0x248   : > { %6158 = vmatpush3.msra.mxu1 %v682_v1 }
 0x249   : > { %6167 = vmatprep.subr.mxu1 %v6919_v23 }
 0x24d   : > { %v839_v6 = vpop.f32.mrb[4].mxu0  ;;  %v918_v7 = vpop.f32.mrb[4].mxu1 }
 0x24e   : > { %v840_v8 = vadd.f32 %v839_v6, %v771_v62  ;;  %v6074_v9 = vpop.f32.mrb[5].mxu0  ;;  %v6085_v10 = vpop.f32.mrb[5].mxu1  ;;  %v1552_v62 = vld [vmem:[%s8435_s3] sm:$0xff] }
 0x250   : > { %6163 = vmatpush3.xpose.msk.msra.mxu0 %vm1390_vm4, %v840_v8 }
 0x251   : > { %6172 = vmatprep.subr.mxu0 %v6919_v23 }
 0x253   : > { %6165 = vmatmul.mubr.msk.f32.vlgmr.msra.gmra.mrb[14].mxu0 %vm1390_vm4, %v761_v11 }
 0x254   : > { %6174 = vmatprep.mubr.msk.f32.mxu0 %vm6918_vm1, %v6919_v23  ;;  %6173 = vmatpush3.msra.mxu0 %v5515_v63 }
 0x255   : > { %v7335_v12 = vpop.f32.mrb[6].mxu0  ;;  %v7337_v13 = vpop.f32.mrb[6].mxu1  ;;  %6182 = vmatprep.subr.mxu0 %v6919_v23 }
 0x256   : > { %v6096_v14 = vpop.f32.mrb[7].mxu0  ;;  %v6107_v16 = vpop.f32.mrb[7].mxu1 }
 0x25d   : > { %v7339_v17 = vpop.f32.mrb[8].mxu0  ;;  %v7341_v18 = vpop.f32.mrb[8].mxu1 }
 0x25e   : > { %v6118_v19 = vpop.f32.mrb[9].mxu0  ;;  %v6129_v20 = vpop.f32.mrb[9].mxu1 }
 0x265   : > { %v7343_v21 = vpop.f32.mrb[10].mxu0  ;;  %v7345_v22 = vpop.f32.mrb[10].mxu1 }
 0x266   : > { %v6140_v24 = vpop.f32.mrb[11].mxu0  ;;  %v6151_v31 = vpop.f32.mrb[11].mxu1 }
 0x316   : > { %v1463_v32 = vpop.f32.mrb[12].mxu0 }
 0x317   : > { %v1467_v33 = vmul.f32 0.35355338, %v1463_v32  ;;  %v6156_v34 = vpop.f32.mrb[13].mxu0 }
 0x319   : > { %v1468_v35 = vsel %vm1390_vm4, %v1467_v33, -inf }
 0x31a   : > { %1469 = vmax.xlane.f32.xlu0 %v1468_v35 }
 0x326   : > { %v1625_v36 = vpop.f32.mrb[14].mxu0 }
 0x327   : > { %v1629_v37 = vmul.f32 0.35355338, %v1625_v36  ;;  %v6166_v38 = vpop.f32.mrb[15].mxu0 }
 0x329   : > { %v1630_v40 = vsel %vm1390_vm4, %v1629_v37, -inf }
 0x32a   : > { %1631 = vmax.xlane.f32.xlu1 %v1630_v40 }
 0x33b   : > { %927 = vrot.lane.b32.xlu1 %v7110_v30, %s8447_s29 }
 0x3a7   : > { %v1470_v42 = vpop.xlane.xlu0 %1469 }
 0x3a8   : > { %v1471_v43 = vsub.f32 %v1467_v33, %v1470_v42 }
 0x3aa   : > { %v1472_v44 = vmul.f32 1.442695, %v1471_v43 }
 0x3ac   : > { %6791 = vpow2.f32 %v1472_v44 }
 0x3b6   : > { %v6792_v45 = vpop.eup %6791 }
 0x3b7   : > { %v1632_v46 = vpop.xlane.xlu1 %1631  ;;  %v1474_v47 = vsel %vm1390_vm4, %v6792_v45, 0.0 }
 0x3b8   : > { %v1633_v48 = vsub.f32 %v1629_v37, %v1632_v46  ;;  %1475 = vadd.xlane.f32.xlu0 %v1474_v47 }
 0x3ba   : > { %v1634_v49 = vmul.f32 1.442695, %v1633_v48 }
 0x3bb   : > { %v928_v4 = vpop.permute.xlu1 %927 }
 0x3bc   : > { %6793 = vpow2.f32 %v1634_v49  ;;  %v997_v8 = vadd.f32 %v7335_v12, %v928_v4 }
 0x3c6   : > { %v6794_v50 = vpop.eup %6793 }
 0x3c7   : > { %v1636_v51 = vsel %vm1390_vm4, %v6794_v50, 0.0 }
 0x3c8   : > { %1637 = vadd.xlane.f32.xlu0 %v1636_v51 }
 0x3de   : > { %849 = vrot.lane.b32.xlu0 %v7323_v53, %s8449_s28  ;;  %s6857_s28 = sshll.u32 %s6923_s25, 4  ;;  %s6858_s28 = int_to_ptr.vmem [resolvable:$false] %s6857_s28 }
 0x3e2   : > { %1005 = vrot.lane.b32.xlu0 %v7104_v29, %s8447_s29 }
 0x445   : > { %v1476_v52 = vpop.xlane.xlu0 %1475 }
 0x446   : > { %6795 = vrcp.f32 %v1476_v52 }
 0x450   : > { %v6796_v54 = vpop.eup %6795 }
 0x451   : > { %v1478_v55 = vmul.f32 %v6796_v54, %v6792_v45 }
 0x453   : > { %6160 = vmatmul.mubr.msk.f32.vlgmr.msra.gmra.mrb[12].mxu1 %vm1390_vm4, %v1478_v55 }
 0x454   : > { %6169 = vmatprep.mubr.msk.f32.mxu1 %vm6918_vm1, %v6919_v23 }
 0x455   : > { %v1638_v56 = vpop.xlane.xlu0 %1637 }
 0x456   : > { %6797 = vrcp.f32 %v1638_v56  ;;  %v5526_v56 = vld [vmem:[%s8435_s3 + $0x18] sm:$0xff] }
 0x459   : > { %v850_v57 = vpop.permute.xlu0 %849 }
 0x45a   : > { %v919_v58 = vadd.f32 %v918_v7, %v850_v57 }
 0x45c   : > { %6168 = vmatpush3.msra.mxu1 %v919_v58 }
 0x45d   : > { %6177 = vmatprep.subr.mxu1 %v6919_v23  ;;  %v1006_v2 = vpop.permute.xlu0 %1005 }
 0x45e   : > { %v1075_v5 = vadd.f32 %v7337_v13, %v1006_v2 }
 0x460   : > { %v6798_v59 = vpop.eup %6797 }
 0x461   : > { %v1640_v61 = vmul.f32 %v6798_v59, %v6794_v50 }
 0x463   : > { %6170 = vmatmul.mubr.msk.f32.vlgmr.msra.gmra.mrb[14].mxu1 %vm1390_vm4, %v1640_v61 }
 0x464   : > { %6179 = vmatprep.mubr.msk.f32.mxu1 %vm6918_vm1, %v6919_v23  ;;  %6178 = vmatpush3.msra.mxu1 %v1552_v62 }
 0x465   : > { %6187 = vmatprep.subr.mxu1 %v6919_v23 }
 0x526   : > { %v1548_v0 = vpop.f32.mrb[12].mxu1 }
 0x527   : > { %v6161_v1 = vpop.f32.mrb[13].mxu1  ;;  %6180 = vmatmul.mubr.msk.f32.vlgmr.msra.gmra.mrb[16].mxu1 %vm1390_vm4, %v1548_v0  ;;  %v2339_v0 = vsub.s32 5, %v7089_v25 }
 0x528   : > { %6189 = vmatprep.mubr.msk.f32.mxu1 %vm6918_vm1, %v6919_v23 }
 0x529   : > { %v2340_v4 = vrot.slane %v7100_v28, %v2339_v0 }
 0x536   : > { %v1710_v6 = vpop.f32.mrb[14].mxu1 }
 0x537   : > { %v6171_v7 = vpop.f32.mrb[15].mxu1  ;;  %6175 = vmatmul.mubr.msk.f32.vlgmr.msra.gmra.mrb[16].mxu0 %vm1390_vm4, %v1710_v6 }
 0x538   : > { %6183 = vmatpush3.xpose.msk.msra.mxu0 %vm1390_vm4, %v1075_v5  ;;  %6184 = vmatprep.mubr.msk.f32.mxu0 %vm6918_vm1, %v6919_v23 }
 0x539   : > { %6192 = vmatprep.subr.mxu0 %v6919_v23 }
 0x53b   : > { %6185 = vmatmul.mubr.msk.f32.vlgmr.msra.gmra.mrb[18].mxu0 %vm1390_vm4, %v997_v8 }
 0x53c   : > { %6194 = vmatprep.mubr.msk.f32.mxu0 %vm6918_vm1, %v6919_v23 }
 0x5fa   : > { %v1858_v9 = vpop.f32.mrb[16].mxu1 }
 0x5fb   : > { %v6181_v10 = vpop.f32.mrb[17].mxu1 }
 0x60a   : > { %v1785_v11 = vpop.f32.mrb[16].mxu0 }
 0x60b   : > { %v1859_v13 = vadd.f32 %v1858_v9, %v1785_v11  ;;  %v6176_v14 = vpop.f32.mrb[17].mxu0 }
 0x60e   : > { %v1934_v16 = vpop.f32.mrb[18].mxu0 }
 0x60f   : > { %v1938_v19 = vmul.f32 0.35355338, %v1934_v16  ;;  %v6186_v20 = vpop.f32.mrb[19].mxu0  ;;  %v2377_v16 = vld [vmem:[%s8436_s4 + $0x28] sm:$0xff] }
 0x611   : > { %v1939_v24 = vsel %vm1390_vm4, %v1938_v19, -inf }
 0x612   : > { %1940 = vmax.xlane.f32.xlu0 %v1939_v24  ;;  %v2379_v24 = vld [vmem:[%s8436_s4 + $0x38] sm:$0xff] }
 0x628   : > { %1083 = vrot.lane.b32.xlu0 %v7323_v53, %s8447_s29  ;;  %s8389_s29 = scalar_lea.hbm %s8444_s12, %s5699_s17 }
 0x62c   : > { %1161 = vrot.lane.b32.xlu0 %v7110_v30, %s8445_s19 }
 0x69f   : > { %v1941_v12 = vpop.xlane.xlu0 %1940 }
 0x6a0   : > { %v1942_v31 = vsub.f32 %v1938_v19, %v1941_v12  ;;  %v2375_v19 = vld [vmem:[%s8436_s4 + $0x18] sm:$0xff]  ;;  %v2372_v12 = vld [vmem:[%s8436_s4] sm:$0xff] }
 0x6a2   : > { %v1943_v32 = vmul.f32 1.442695, %v1942_v31  ;;  %v2376_v31 = vld [vmem:[%s8436_s4 + $0x20] sm:$0xff] }
 0x6a3   : > { %v1084_v33 = vpop.permute.xlu0 %1083 }
 0x6a4   : > { %6799 = vpow2.f32 %v1943_v32  ;;  %v1153_v34 = vadd.f32 %v7339_v17, %v1084_v33  ;;  %v6506_v32 = vpack.c.bf16 %v2379_v24, %v2375_v19  ;;  %v6500_v33 = vpack.c.bf16 %v2376_v31, %v2372_v12  ;;  %v2561_v19 = vld [vmem:[%s8437_s5 + $0x10] sm:$0xff] }
 0x6a6   : > { %6188 = vmatpush3.msra.mxu1 %v1153_v34  ;;  %v2374_v34 = vld [vmem:[%s8436_s4 + $0x10] sm:$0xff] }
 0x6a7   : > { %6197 = vmatprep.subr.mxu1 %v6919_v23  ;;  %v1162_v42 = vpop.permute.xlu0 %1161 }
 0x6a8   : > { %v1231_v17 = vadd.f32 %v7341_v18, %v1162_v42 }
 0x6ae   : > { %v6800_v35 = vpop.eup %6799 }
 0x6af   : > { %v1945_v36 = vsel %vm1390_vm4, %v6800_v35, 0.0 }
 0x6b0   : > { %1946 = vadd.xlane.f32.xlu1 %v1945_v36  ;;  %v2381_v36 = vld [vmem:[%s8436_s4 + $0x48] sm:$0xff] }
 0x6c1   : > { %1239 = vrot.lane.b32.xlu1 %v7104_v29, %s8445_s19  ;;  %v5521_v29 = vld [vmem:[%s8435_s3 + $0x10] sm:$0xff] }
 0x6c2   : > { %6193 = vmatpush3.msra.mxu0 %v5521_v29  ;;  %v2384_v29 = vld [vmem:[%s8436_s4 + $0x60] sm:$0xff] }
 0x6c3   : > { %6202 = vmatprep.subr.mxu0 %v6919_v23 }
 0x73d   : > { %v1947_v37 = vpop.xlane.xlu1 %1946 }
 0x73e   : > { %6801 = vrcp.f32 %v1947_v37 }
 0x741   : > { %v1240_v30 = vpop.permute.xlu1 %1239 }
 0x742   : > { %v1309_v43 = vadd.f32 %v7343_v21, %v1240_v30  ;;  %v2385_v30 = vld [vmem:[%s8436_s4 + $0x68] sm:$0xff] }
 0x743   : > { %v6502_v42 = vpack.c.bf16 %v2385_v30, %v2381_v36  ;;  %v2612_v36 = vld [vmem:[%s8437_s5 + $0x1a8] sm:$0xff] }
 0x748   : > { %v6802_v38 = vpop.eup %6801 }
 0x749   : > { %v1949_v40 = vmul.f32 %v6802_v38, %v6800_v35  ;;  %v2378_v35 = vld [vmem:[%s8436_s4 + $0x30] sm:$0xff]  ;;  %v2383_v38 = vld [vmem:[%s8436_s4 + $0x58] sm:$0xff] }
 0x74a   : > { %v6508_v37 = vpack.c.bf16 %v2378_v35, %v2374_v34  ;;  %v2580_v34 = vld [vmem:[%s8437_s5 + $0xa8] sm:$0xff]  ;;  %v2611_v35 = vld [vmem:[%s8437_s5 + $0x1a0] sm:$0xff] }
 0x74b   : > { %6190 = vmatmul.mubr.msk.f32.vlgmr.msra.gmra.mrb[18].mxu1 %vm1390_vm4, %v1949_v40  ;;  %v2387_v40 = vld [vmem:[%s8436_s4 + $0x78] sm:$0xff] }
 0x74c   : > { %6198 = vmatpush3.xpose.msk.msra.mxu1 %vm1390_vm4, %v1309_v43  ;;  %6199 = vmatprep.mubr.msk.f32.mxu1 %vm6918_vm1, %v6919_v23  ;;  %v6510_v43 = vpack.c.bf16 %v2387_v40, %v2383_v38  ;;  %v2563_v38 = vld [vmem:[%s8437_s5 + $0x20] sm:$0xff]  ;;  %v2564_v40 = vld [vmem:[%s8437_s5 + $0x28] sm:$0xff] }
 0x74d   : > { %6207 = vmatprep.subr.mxu1 %v6919_v23 }
 0x74f   : > { %6200 = vmatmul.mubr.msk.f32.vlgmr.msra.gmra.mrb[20].mxu1 %vm1390_vm4, %v1231_v17  ;;  %v2380_v17 = vld [vmem:[%s8436_s4 + $0x40] sm:$0xff] }
 0x750   : > { %6209 = vmatprep.mubr.msk.f32.mxu1 %vm6918_vm1, %v6919_v23  ;;  %6208 = vmatpush3.msra.mxu1 %v5526_v56 }
 0x751   : > { %6507 = vmatprep.subr.bf16.mxu1 %v6506_v32  ;;  %v2593_v32 = vld [vmem:[%s8437_s5 + $0x110] sm:$0xff] }
 0x81e   : > { %v2019_v21 = vpop.f32.mrb[18].mxu1 }
 0x81f   : > { %v6191_v44 = vpop.f32.mrb[19].mxu1  ;;  %6195 = vmatmul.mubr.msk.f32.vlgmr.msra.gmra.mrb[20].mxu0 %vm1390_vm4, %v2019_v21  ;;  %v2382_v21 = vld [vmem:[%s8436_s4 + $0x50] sm:$0xff] }
 0x820   : > { %6204 = vmatprep.mubr.msk.f32.mxu0 %vm6918_vm1, %v6919_v23  ;;  %v6504_v44 = vpack.c.bf16 %v2384_v29, %v2380_v17  ;;  %v2595_v17 = vld [vmem:[%s8437_s5 + $0x120] sm:$0xff]  ;;  %v2596_v29 = vld [vmem:[%s8437_s5 + $0x128] sm:$0xff] }
 0x822   : > { %v2171_v18 = vpop.f32.mrb[20].mxu1 }
 0x823   : > { %v2175_v45 = vmul.f32 0.35355338, %v2171_v18  ;;  %v6201_v46 = vpop.f32.mrb[21].mxu1  ;;  %v2386_v18 = vld [vmem:[%s8436_s4 + $0x70] sm:$0xff] }
 0x824   : > { %v2575_v46 = vld [vmem:[%s8437_s5 + $0x80] sm:$0xff] }
 0x825   : > { %v2176_v47 = vsel %vm1390_vm4, %v2175_v45, -inf }
 0x826   : > { %2177 = vmax.xlane.f32.xlu0 %v2176_v47  ;;  %v2576_v47 = vld [vmem:[%s8437_s5 + $0x88] sm:$0xff] }
 0x83c   : > { %1317 = vrot.lane.b32.xlu0 %v7323_v53, %s8445_s19  ;;  %s5381_s19 = scalar_lea.sflag [#allocation3], %s402_s16 }
 0x8b3   : > { %v2178_v48 = vpop.xlane.xlu0 %2177 }
 0x8b4   : > { %v2179_v49 = vsub.f32 %v2175_v45, %v2178_v48  ;;  %v6512_v45 = vpack.c.bf16 %v2386_v18, %v2382_v21  ;;  %v2607_v48 = vld [vmem:[%s8437_s5 + $0x180] sm:$0xff]  ;;  %v2581_v21 = vld [vmem:[%s8437_s5 + $0xb0] sm:$0xff] }
 0x8b5   : > { %v2613_v18 = vld [vmem:[%s8437_s5 + $0x1b0] sm:$0xff] }
 0x8b6   : > { %v2180_v50 = vmul.f32 1.442695, %v2179_v49  ;;  %v6514_v49 = vpack.c.bf16 %v2576_v47, %v2575_v46  ;;  %v6524_v46 = vpack.c.bf16 %v2564_v40, %v2563_v38  ;;  %v6556_v47 = vpack.c.bf16 %v2596_v29, %v2595_v17  ;;  %v2603_v38 = vld [vmem:[%s8437_s5 + $0x160] sm:$0xff]  ;;  %v2589_v17 = vld [vmem:[%s8437_s5 + $0xf0] sm:$0xff]  ;;  %v2590_v29 = vld [vmem:[%s8437_s5 + $0xf8] sm:$0xff] }
 0x8b7   : > { %v1318_v51 = vpop.permute.xlu0 %1317 }
 0x8b8   : > { %6803 = vpow2.f32 %v2180_v50  ;;  %v1387_v52 = vadd.f32 %v7345_v22, %v1318_v51  ;;  %v2608_v50 = vld [vmem:[%s8437_s5 + $0x188] sm:$0xff] }
 0x8b9   : > { %v6546_v51 = vpack.c.bf16 %v2608_v50, %v2607_v48  ;;  %v2565_v48 = vld [vmem:[%s8437_s5 + $0x30] sm:$0xff] }
 0x8ba   : > { %6203 = vmatpush3.msra.mxu0 %v1387_v52 }
 0x8c2   : > { %v6804_v54 = vpop.eup %6803 }
 0x8c3   : > { %v2182_v55 = vsel %vm1390_vm4, %v6804_v54, 0.0 }
 0x8c4   : > { %2183 = vadd.xlane.f32.xlu1 %v2182_v55 }
 0x8f2   : > { %v2094_v57 = vpop.f32.mrb[20].mxu0 }
 0x8f3   : > { %v2098_v58 = vadd.f32 %v2094_v57, %v1859_v13  ;;  %v6196_v53 = vpop.f32.mrb[21].mxu0 }
 0x951   : > { %v2184_v59 = vpop.xlane.xlu1 %2183 }
 0x952   : > { %6805 = vrcp.f32 %v2184_v59 }
 0x95c   : > { %v6806_v61 = vpop.eup %6805 }
 0x95d   : > { %v2186_v62 = vmul.f32 %v6806_v61, %v6804_v54  ;;  %v2363_v61 = vsub.s32 6, %v7089_v25 }
 0x95f   : > { %6205 = vmatmul.mubr.msk.f32.vlgmr.msra.gmra.mrb[22].mxu0 %vm1390_vm4, %v2186_v62  ;;  %v2364_v62 = vrot.slane %v7100_v28, %v2363_v61 }
 0x960   : > { %2477 = vmatprep.mubr.f32.mxu0 %v6919_v23 }
 0xa32   : > { %v2256_v22 = vpop.f32.mrb[22].mxu0 }
 0xa33   : > { %v6206_v63 = vpop.f32.mrb[23].mxu0  ;;  %6210 = vmatmul.mubr.msk.f32.vlgmr.msra.gmra.mrb[22].mxu1 %vm1390_vm4, %v2256_v22  ;;  %v2369_v22 = vsub.s32 7, %v7089_v25  ;;  %v5682_v25 = vld [vmem:[%s8437_s5 + $0x390] sm:$0xff] }
 0xa34   : > { %2548 = vmatprep.mubr.f32.mxu1 %v6919_v23  ;;  %6509 = vmatpush1.bf16.msra.mxu1 %v6508_v37 }
 0xa35   : > { %6511 = vmatprep.subr.bf16.mxu1 %v6510_v43  ;;  %v6554_v43 = vpack.c.bf16 %v2612_v36, %v2611_v35 }
 0xa38   : > { %6513 = vmatpush1.bf16.msra.mxu1 %v6512_v45  ;;  %v2614_v45 = vld [vmem:[%s8437_s5 + $0x1b8] sm:$0xff] }
 0xa39   : > { %6547 = vmatprep.subr.bf16.mxu1 %v6546_v51  ;;  %v6558_v51 = vpack.c.bf16 %v2614_v45, %v2613_v18  ;;  %v2622_v18 = vld [vmem:[%s8437_s5 + $0x1f8] sm:$0xff]  ;;  %v2573_v45 = vld [vmem:[%s8437_s5 + $0x70] sm:$0xff] }
 0xb06   : > { %v2331_v1 = vpop.f32.mrb[22].mxu1 }
 0xb07   : > { %v2335_v2 = vadd.f32 %v2331_v1, %v2098_v58  ;;  %v6211_v5 = vpop.f32.mrb[23].mxu1  ;;  %v2559_v1 = vld [vmem:[%s8437_s5] sm:$0xff] }
 0xb08   : > { %v2370_v5 = vrot.slane %v7100_v28, %v2369_v22  ;;  %v2609_v28 = vld [vmem:[%s8437_s5 + $0x190] sm:$0xff] }
 0xb09   : > { %v2336_v6 = vadd.f32 %v2335_v2, %v7045_v3  ;;  %v2373_v3 = vld [vmem:[%s8436_s4 + $0x8] sm:$0xff] }
 0xb0a   : > { %v6498_v20 = vpack.c.bf16 %v2377_v16, %v2373_v3  ;;  %v2560_v2 = vld [vmem:[%s8437_s5 + $0x8] sm:$0xff] }
 0xb0b   : > { %v7429_v7 = vadd.f32 %v2340_v4, %v2336_v6  ;;  %v2591_v6 = vld [vmem:[%s8437_s5 + $0x100] sm:$0xff]  ;;  %v6516_v3 = vpack.c.bf16 %v2560_v2, %v2559_v1 }
 0xb0c   : > { %6499 = vmatprep.subr.bf16.mxu0 %v6498_v20  ;;  %v2562_v20 = vld [vmem:[%s8437_s5 + $0x18] sm:$0xff] }
 0xb0d   : > { %v2342_v8 = vsel %vm414_vm0, %v7429_v7, 0.0  ;;  %6501 = vmatpush1.bf16.msra.mxu0 %v6500_v33  ;;  %v2579_v33 = vld [vmem:[%s8437_s5 + $0xa0] sm:$0xff]  ;;  %v6520_v37 = vpack.c.bf16 %v2562_v20, %v2561_v19  ;;  %v2601_v20 = vld [vmem:[%s8437_s5 + $0x150] sm:$0xff] }
 0xb0e   : > { %2343 = vadd.xlane.f32.xlu1 %v2342_v8  ;;  %6503 = vmatprep.subr.bf16.mxu0 %v6502_v42  ;;  %v2592_v8 = vld [vmem:[%s8437_s5 + $0x108] sm:$0xff]  ;;  %v6522_v42 = vpack.c.bf16 %v2580_v34, %v2579_v33 }
 0xb0f   : > { %v6548_v16 = vpack.c.bf16 %v2592_v8, %v2591_v6  ;;  %v2585_v6 = vld [vmem:[%s8437_s5 + $0xd0] sm:$0xff]  ;;  %v2586_v8 = vld [vmem:[%s8437_s5 + $0xd8] sm:$0xff] }
 0xb11   : > { %6505 = vmatpush1.bf16.msra.mxu0 %v6504_v44  ;;  %v2582_v44 = vld [vmem:[%s8437_s5 + $0xb8] sm:$0xff] }
 0xb12   : > { %6515 = vmatprep.subr.bf16.mxu0 %v6514_v49  ;;  %v2566_v49 = vld [vmem:[%s8437_s5 + $0x38] sm:$0xff]  ;;  %v6526_v50 = vpack.c.bf16 %v2582_v44, %v2581_v21  ;;  %v2621_v21 = vld [vmem:[%s8437_s5 + $0x1f0] sm:$0xff]  ;;  %v6542_v44 = vpack.c.bf16 %v2590_v29, %v2589_v17 }
 0xb13   : > { %v5540_v17 = vld [vmem:[%s8434_s2 + $0x210] sm:$0xff] }
 0xb9b   : > { %v2344_v9 = vpop.xlane.xlu1 %2343 }
 0xb9c   : > { %v2345_v10 = vmul.f32 0.03125, %v2344_v9  ;;  %v2577_v9 = vld [vmem:[%s8437_s5 + $0x90] sm:$0xff] }
 0xb9e   : > { %v7434_v11 = vsub.f32 %v7429_v7, %v2345_v10  ;;  %v2578_v10 = vld [vmem:[%s8437_s5 + $0x98] sm:$0xff] }
 0xb9f   : > { %v6518_v12 = vpack.c.bf16 %v2578_v10, %v2577_v9  ;;  %v2617_v9 = vld [vmem:[%s8437_s5 + $0x1d0] sm:$0xff]  ;;  %v2618_v10 = vld [vmem:[%s8437_s5 + $0x1d8] sm:$0xff] }
 0xba0   : > { %v2347_v13 = vmul.f32 %v7434_v11, %v7434_v11  ;;  %v6566_v19 = vpack.c.bf16 %v2618_v10, %v2617_v9 }
 0xba2   : > { %v2348_v14 = vsel %vm414_vm0, %v2347_v13, 0.0  ;;  %v2610_v13 = vld [vmem:[%s8437_s5 + $0x198] sm:$0xff] }
 0xba3   : > { %2349 = vadd.xlane.f32.xlu1 %v2348_v14  ;;  %v6550_v31 = vpack.c.bf16 %v2610_v13, %v2609_v28 }
 0xc30   : > { %v2350_v52 = vpop.xlane.xlu1 %2349 }
 0xc31   : > { %v2351_v54 = vmul.f32 0.032258064, %v2350_v52  ;;  %v2597_v52 = vld [vmem:[%s8437_s5 + $0x130] sm:$0xff] }
 0xc33   : > { %6807 = vrsqrt.f32 %v2351_v54  ;;  %vm2354_vm5 = vcmp.eq.f32.partialorder %v2351_v54, inf  ;;  %v2357_v57 = vand.u32 2147483648, %v2351_v54  ;;  %vm2356_vm6 = vcmp.eq.f32.partialorder %v2351_v54, 0.0 }
 0xc3d   : > { %v6808_v55 = vpop.eup %6807 }
 0xc3e   : > { %v2353_v56 = vmul.f32 %v6808_v55, %v2351_v54  ;;  %v2583_v55 = vld [vmem:[%s8437_s5 + $0xc0] sm:$0xff] }
 0xc40   : > { %v2355_v58 = vsel %vm2354_vm5, %v2351_v54, %v2353_v56  ;;  %v2598_v54 = vld [vmem:[%s8437_s5 + $0x138] sm:$0xff]  ;;  %v2584_v56 = vld [vmem:[%s8437_s5 + $0xc8] sm:$0xff] }
 0xc41   : > { %v2358_v53 = vsel %vm2356_vm6, %v2357_v57, %v2355_v58  ;;  %v2615_v57 = vld [vmem:[%s8437_s5 + $0x1c0] sm:$0xff]  ;;  %v2616_v58 = vld [vmem:[%s8437_s5 + $0x1c8] sm:$0xff]  ;;  %v6530_v1 = vpack.c.bf16 %v2584_v56, %v2583_v55 }
 0xc42   : > { %v2359_v59 = vadd.f32 1e-06, %v2358_v53  ;;  %v6528_v53 = vpack.c.bf16 %v2566_v49, %v2565_v48  ;;  %v6562_v2 = vpack.c.bf16 %v2616_v58, %v2615_v57  ;;  %v2605_v49 = vld [vmem:[%s8437_s5 + $0x170] sm:$0xff] }
 0xc44   : > { %6809 = vrcp.f32 %v2359_v59  ;;  %v6560_v59 = vpack.c.bf16 %v2598_v54, %v2597_v52  ;;  %v2388_v52 = vld [vmem:[%s8439_s7] sm:$0xf] }
 0xc45   : > { %v2393_v54 = vrot.slane %v2388_v52, %v7115_v39  ;;  %v2401_v55 = vrot.slane %v2388_v52, %v7095_v27  ;;  %v2397_v56 = vrot.slane %v2388_v52, %v7120_v41  ;;  %v2405_v57 = vrot.slane %v2388_v52, %v7092_v26 }
 0xc4e   : > { %v6810_v63 = vpop.eup %6809 }
 0xc4f   : > { %v2365_v4 = vmul.f32 %v6810_v63, %v2364_v62  ;;  %v2567_v62 = vld [vmem:[%s8437_s5 + $0x40] sm:$0xff]  ;;  %v2568_v63 = vld [vmem:[%s8437_s5 + $0x48] sm:$0xff] }
 0xc50   : > { %v6532_v28 = vpack.c.bf16 %v2568_v63, %v2567_v62 }
 0xc51   : > { %v2366_v14 = vmul.f32 %v2365_v4, %v7434_v11  ;;  %v2594_v11 = vld [vmem:[%s8437_s5 + $0x118] sm:$0xff]  ;;  %v2599_v4 = vld [vmem:[%s8437_s5 + $0x140] sm:$0xff] }
 0xc52   : > { %v6552_v30 = vpack.c.bf16 %v2594_v11, %v2593_v32  ;;  %v2619_v32 = vld [vmem:[%s8437_s5 + $0x1e0] sm:$0xff]  ;;  %v2620_v11 = vld [vmem:[%s8437_s5 + $0x1e8] sm:$0xff] }
 0xc53   : > { %v2371_v24 = vadd.f32 %v2370_v5, %v2366_v14  ;;  %v2600_v5 = vld [vmem:[%s8437_s5 + $0x148] sm:$0xff]  ;;  %v2569_v14 = vld [vmem:[%s8437_s5 + $0x50] sm:$0xff]  ;;  %v6570_v36 = vpack.c.bf16 %v2620_v11, %v2619_v32 }
 0xc54   : > { %v6564_v13 = vpack.c.bf16 %v2600_v5, %v2599_v4 }
 0xc55   : > { %5528 = vmatmul.mubr.msk.f32.vlgmr.msra.gmra.mrb[24].mxu0 %vm414_vm0, %v2371_v24  ;;  %5529 = vmatmul.mubr.msk.f32.vlgmr.msra.gmra.mrb[24].mxu1 %vm414_vm0, %v2371_v24  ;;  %v2602_v24 = vld [vmem:[%s8437_s5 + $0x158] sm:$0xff] }
 0xc56   : > { %6517 = vmatpush3.bf16.msra.mxu0 %v6516_v3  ;;  %6549 = vmatpush3.bf16.msra.mxu1 %v6548_v16  ;;  %v2570_v3 = vld [vmem:[%s8437_s5 + $0x58] sm:$0xff]  ;;  %v6534_v16 = vpack.c.bf16 %v2586_v8, %v2585_v6  ;;  %v6568_v34 = vpack.c.bf16 %v2602_v24, %v2601_v20  ;;  %v5530_v20 = vld [vmem:[%s8438_s6 + $0x8] ss:$0 sm:$0xff] }
 0xc57   : > { %6519 = vmatprep.subr.bf16.mxu0 %v6518_v12  ;;  %6551 = vmatprep.subr.bf16.mxu1 %v6550_v31  ;;  %v2587_v12 = vld [vmem:[%s8437_s5 + $0xe0] sm:$0xff]  ;;  %v2588_v31 = vld [vmem:[%s8437_s5 + $0xe8] sm:$0xff]  ;;  %v6536_v33 = vpack.c.bf16 %v2570_v3, %v2569_v14 }
 0xc58   : > { %v6538_v35 = vpack.c.bf16 %v2588_v31, %v2587_v12 }
 0xc5a   : > { %6521 = vmatpush3.bf16.msra.mxu0 %v6520_v37  ;;  %6553 = vmatpush3.bf16.msra.mxu1 %v6552_v30  ;;  %v2571_v37 = vld [vmem:[%s8437_s5 + $0x60] sm:$0xff]  ;;  %v2572_v30 = vld [vmem:[%s8437_s5 + $0x68] sm:$0xff] }
 0xc5b   : > { %6523 = vmatprep.subr.bf16.mxu0 %v6522_v42  ;;  %6555 = vmatprep.subr.bf16.mxu1 %v6554_v43  ;;  %v6540_v40 = vpack.c.bf16 %v2572_v30, %v2571_v37  ;;  %v2604_v42 = vld [vmem:[%s8437_s5 + $0x168] sm:$0xff]  ;;  %v5538_v37 = vld [vmem:[%s8434_s2 + $0x200] sm:$0xff] }
 0xc5c   : > { %v6572_v43 = vpack.c.bf16 %v2604_v42, %v2603_v38  ;;  %v5539_v38 = vld [vmem:[%s8434_s2 + $0x208] sm:$0xff]  ;;  %v5535_v42 = vld [vmem:[%s8434_s2 + $0x190] sm:$0xff] }
 0xc5e   : > { %6525 = vmatpush3.bf16.msra.mxu0 %v6524_v46  ;;  %6557 = vmatpush3.bf16.msra.mxu1 %v6556_v47  ;;  %v2574_v46 = vld [vmem:[%s8437_s5 + $0x78] sm:$0xff]  ;;  %v6574_v47 = vpack.c.bf16 %v2622_v18, %v2621_v21  ;;  %v7744_v18 = vld [vmem:[%s8438_s6 + $0x10] sm:$0xff] }
 0xc5f   : > { %6527 = vmatprep.subr.bf16.mxu0 %v6526_v50  ;;  %6559 = vmatprep.subr.bf16.mxu1 %v6558_v51  ;;  %v6544_v48 = vpack.c.bf16 %v2574_v46, %v2573_v45  ;;  %v2606_v50 = vld [vmem:[%s8437_s5 + $0x178] sm:$0xff]  ;;  %v7748_v45 = vrot.slane %v7744_v18, %v7092_v26  ;;  %v7754_v46 = vrot.slane %v7744_v18, %v7095_v27 }
 0xc60   : > { %v6576_v51 = vpack.c.bf16 %v2606_v50, %v2605_v49  ;;  %v5541_v21 = vld [vmem:[%s8434_s2 + $0x218] sm:$0xff] }
 0xc62   : > { %6529 = vmatpush3.bf16.msra.mxu0 %v6528_v53  ;;  %6561 = vmatpush3.bf16.msra.mxu1 %v6560_v59 }
 0xc63   : > { %6531 = vmatprep.subr.bf16.mxu0 %v6530_v1  ;;  %6563 = vmatprep.subr.bf16.mxu1 %v6562_v2 }
 0xc66   : > { %6533 = vmatpush3.bf16.msra.mxu0 %v6532_v28  ;;  %6565 = vmatpush3.bf16.msra.mxu1 %v6564_v13 }
 0xc67   : > { %6535 = vmatprep.subr.bf16.mxu0 %v6534_v16  ;;  %6567 = vmatprep.subr.bf16.mxu1 %v6566_v19 }
 0xc6a   : > { %6537 = vmatpush3.bf16.msra.mxu0 %v6536_v33  ;;  %6569 = vmatpush3.bf16.msra.mxu1 %v6568_v34 }
 0xc6b   : > { %6539 = vmatprep.subr.bf16.mxu0 %v6538_v35  ;;  %6571 = vmatprep.subr.bf16.mxu1 %v6570_v36  ;;  %v5533_v36 = vld [vmem:[%s8434_s2 + $0x180] sm:$0xff] }
 0xc6e   : > { %6541 = vmatpush3.bf16.msra.mxu0 %v6540_v40  ;;  %6573 = vmatpush3.bf16.msra.mxu1 %v6572_v43  ;;  %v6585_v40 = vpack.c.bf16 %v5539_v38, %v5538_v37  ;;  %v5536_v43 = vld [vmem:[%s8434_s2 + $0x198] sm:$0xff]  ;;  %v5564_v37 = vld [vmem:[%s8434_s2 + $0x1c8] sm:$0xff] }
 0xc6f   : > { %6543 = vmatprep.subr.bf16.mxu0 %v6542_v44  ;;  %6575 = vmatprep.subr.bf16.mxu1 %v6574_v47  ;;  %v6582_v29 = vpack.c.bf16 %v5536_v43, %v5535_v42  ;;  %v6588_v44 = vpack.c.bf16 %v5541_v21, %v5540_v17  ;;  %v5569_v38 = vld [vmem:[%s8434_s2 + $0x248] sm:$0xff]  ;;  %v5565_v43 = vld [vmem:[%s8434_s2 + $0x1d0] sm:$0xff]  ;;  %v5566_v17 = vld [vmem:[%s8434_s2 + $0x1d8] sm:$0xff] }
 0xc70   : > { %v5571_v21 = vld [vmem:[%s8434_s2 + $0x258] sm:$0xff] }
 0xc72   : > { %6545 = vmatpush3.bf16.msra.mxu0 %v6544_v48  ;;  %6577 = vmatpush3.bf16.msra.mxu1 %v6576_v51 }
 0xc73   : > { %6578 = vmatprep.subr.bf16.mxu0 %v6917_v15  ;;  %6584 = vmatprep.subr.bf16.mxu1 %v6917_v15 }
 0xd28   : > { %v2479_v58 = vpop.f32.mrb[24].mxu0  ;;  %v2550_v53 = vpop.f32.mrb[24].mxu1 }
 0xd29   : > { %v2480_v59 = vadd.f32 %v2479_v58, %v2393_v54  ;;  %v2551_v62 = vadd.f32 %v2550_v53, %v2401_v55  ;;  %v2481_v63 = vpop.f32.mrb[25].mxu0  ;;  %v2552_v1 = vpop.f32.mrb[25].mxu1  ;;  %v5543_v58 = vld [vmem:[%s8434_s2 + $0x280] sm:$0xff]  ;;  %v2800_v53 = vrot.slane %v7744_v18, %v7120_v41 }
 0xd2a   : > { %v2482_v2 = vadd.f32 %v2481_v63, %v2397_v56  ;;  %v2553_v4 = vadd.f32 %v2552_v1, %v2405_v57  ;;  %v2794_v56 = vrot.slane %v7744_v18, %v7115_v39  ;;  %v5548_v63 = vld [vmem:[%s8434_s2 + $0x1a0] sm:$0xff]  ;;  %v5549_v1 = vld [vmem:[%s8434_s2 + $0x1a8] sm:$0xff] }
 0xd2b   : > { %v2555_v8 = vmax.f32 %v2480_v59, 0.0  ;;  %v2557_v9 = vmax.f32 %v2551_v62, 0.0  ;;  %v5544_v62 = vld [vmem:[%s8434_s2 + $0x288] sm:$0xff] }
 0xd2c   : > { %v2556_v5 = vmax.f32 %v2482_v2, 0.0  ;;  %v2558_v6 = vmax.f32 %v2553_v4, 0.0  ;;  %v6591_v4 = vpack.c.bf16 %v5544_v62, %v5543_v58  ;;  %v5581_v58 = vld [vmem:[%s8434_s2 + $0x1f8] sm:$0xff]  ;;  %v5583_v62 = vld [vmem:[%s8434_s2 + $0x260] sm:$0xff] }
 0xd2e   : > { %2687 = vmatprep.mubr.f32.mxu0 %v2556_v5  ;;  %2757 = vmatprep.mubr.f32.mxu1 %v2558_v6  ;;  %v6597_v5 = vpack.c.bf16 %v5549_v1, %v5548_v63  ;;  %v5545_v6 = vld [vmem:[%s8434_s2 + $0x290] sm:$0xff]  ;;  %v5584_v63 = vld [vmem:[%s8434_s2 + $0x268] sm:$0xff]  ;;  %v5588_v1 = vld [vmem:[%s8434_s2 + $0x2e0] sm:$0xff] }
 0xd2f   : > { %2688 = vmatmul.mubr.f32.vlgmr.msra.gmra.mrb[26].mxu0 %v2555_v8  ;;  %2758 = vmatmul.mubr.f32.vlgmr.msra.gmra.mrb[26].mxu1 %v2557_v9  ;;  %v5546_v9 = vld [vmem:[%s8434_s2 + $0x298] sm:$0xff] }
 0xd30   : > { %6220 = vmatprep.mubr.msk.f32.mxu0 %vm6918_vm1, %v6919_v23  ;;  %6231 = vmatprep.mubr.msk.f32.mxu1 %vm6918_vm1, %v6919_v23 }
 0xd31   : > { %6586 = vmatpush3.bf16.msra.mxu1 %v6585_v40 }
 0xd32   : > { %6587 = vmatprep.subr.bf16.mxu1 %v6917_v15 }
 0xd35   : > { %6589 = vmatpush3.bf16.msra.mxu1 %v6588_v44  ;;  %v6618_v44 = vpack.c.bf16 %v5566_v17, %v5565_v43 }
 0xd36   : > { %6596 = vmatprep.subr.bf16.mxu1 %v6917_v15 }
 0xe02   : > { %v5818_v10 = vpop.f32.mrb[26].mxu0  ;;  %v5853_v28 = vpop.f32.mrb[26].mxu1 }
 0xe03   : > { %v5819_v13 = vpop.f32.mrb[27].mxu0  ;;  %v5854_v14 = vpop.f32.mrb[27].mxu1 }
 0xe04   : > { %v5820_v3 = vadd.f32 %v5819_v13, %v5818_v10  ;;  %v5855_v16 = vadd.f32 %v5854_v14, %v5853_v28  ;;  %v5550_v10 = vld [vmem:[%s8434_s2 + $0x1b0] sm:$0xff]  ;;  %v5551_v28 = vld [vmem:[%s8434_s2 + $0x1b8] sm:$0xff]  ;;  %v6594_v13 = vpack.c.bf16 %v5546_v9, %v5545_v6 }
 0xe05   : > { %v6600_v14 = vpack.c.bf16 %v5551_v28, %v5550_v10  ;;  %v5585_v6 = vld [vmem:[%s8434_s2 + $0x270] sm:$0xff]  ;;  %v5586_v9 = vld [vmem:[%s8434_s2 + $0x278] sm:$0xff] }
 0xe06   : > { %v2760_v19 = vadd.f32 %v5855_v16, %v5820_v3  ;;  %v5553_v3 = vld [vmem:[%s8434_s2 + $0x220] sm:$0xff]  ;;  %v5554_v16 = vld [vmem:[%s8434_s2 + $0x228] sm:$0xff]  ;;  %v5590_v10 = vld [vmem:[%s8434_s2 + $0x2f0] sm:$0xff] }
 0xe07   : > { %v5591_v28 = vld [vmem:[%s8434_s2 + $0x2f8] sm:$0xff] }
 0xe08   : > { %v2763_v24 = vadd.f32 %v2760_v19, %v7429_v7  ;;  %v5534_v7 = vld [vmem:[%s8434_s2 + $0x188] sm:$0xff]  ;;  %v5558_v19 = vld [vmem:[%s8434_s2 + $0x2a0] sm:$0xff] }
 0xe09   : > { %v6579_v30 = vpack.c.bf16 %v5534_v7, %v5533_v36  ;;  %v5563_v7 = vld [vmem:[%s8434_s2 + $0x1c0] sm:$0xff] }
 0xe0a   : > { %v7707_v12 = vadd.f32 %v5530_v20, %v2763_v24  ;;  %v5559_v20 = vld [vmem:[%s8434_s2 + $0x2a8] sm:$0xff]  ;;  %v6603_v24 = vpack.c.bf16 %v5554_v16, %v5553_v3  ;;  %v6615_v40 = vpack.c.bf16 %v5564_v37, %v5563_v7 }
 0xe0b   : > { %6580 = vmatpush3.bf16.msra.mxu0 %v6579_v30  ;;  %v5568_v30 = vld [vmem:[%s8434_s2 + $0x240] sm:$0xff] }
 0xe0c   : > { %v2772_v31 = vsel %vm414_vm0, %v7707_v12, 0.0  ;;  %6581 = vmatprep.subr.bf16.mxu0 %v6917_v15  ;;  %v6621_v42 = vpack.c.bf16 %v5569_v38, %v5568_v30 }
 0xe0d   : > { %2773 = vadd.xlane.f32.xlu0 %v2772_v31  ;;  %v6609_v31 = vpack.c.bf16 %v5559_v20, %v5558_v19 }
 0xe0f   : > { %6583 = vmatpush3.bf16.msra.mxu0 %v6582_v29  ;;  %v5570_v29 = vld [vmem:[%s8434_s2 + $0x250] sm:$0xff] }
 0xe10   : > { %6590 = vmatprep.subr.bf16.mxu0 %v6917_v15 }
 0xe9a   : > { %v2774_v32 = vpop.xlane.xlu0 %2773 }
 0xe9b   : > { %v2775_v11 = vmul.f32 0.03125, %v2774_v32  ;;  %v5555_v32 = vld [vmem:[%s8434_s2 + $0x230] sm:$0xff] }
 0xe9d   : > { %v2776_v33 = vsub.f32 %v7707_v12, %v2775_v11  ;;  %v5556_v11 = vld [vmem:[%s8434_s2 + $0x238] sm:$0xff] }
 0xe9f   : > { %v2777_v34 = vmul.f32 %v2776_v33, %v2776_v33 }
 0xea1   : > { %v2778_v35 = vsel %vm414_vm0, %v2777_v34, 0.0  ;;  %v5561_v34 = vld [vmem:[%s8434_s2 + $0x2b8] sm:$0xff] }
 0xea2   : > { %2779 = vadd.xlane.f32.xlu1 %v2778_v35  ;;  %v6606_v35 = vpack.c.bf16 %v5556_v11, %v5555_v32 }
 0xeb3   : > { %3127 = vrot.lane.b32.xlu1 %v7748_v45, %s8458_s30 }
 0xeb7   : > { %3048 = vrot.lane.b32.xlu1 %v7754_v46, %s8458_s30 }
 0xf2f   : > { %v2780_v47 = vpop.xlane.xlu1 %2779 }
 0xf30   : > { %v2781_v48 = vmul.f32 0.032258064, %v2780_v47  ;;  %v6624_v47 = vpack.c.bf16 %v5571_v21, %v5570_v29 }
 0xf32   : > { %6811 = vrsqrt.f32 %v2781_v48  ;;  %vm2784_vm7 = vcmp.eq.f32.partialorder %v2781_v48, inf  ;;  %v2787_v51 = vand.u32 2147483648, %v2781_v48  ;;  %vm2786_vm8 = vcmp.eq.f32.partialorder %v2781_v48, 0.0 }
 0xf33   : > { %v3128_v32 = vpop.permute.xlu1 %3127 }
 0xf37   : > { %v3049_v7 = vpop.permute.xlu1 %3048 }
 0xf3c   : > { %v6812_v49 = vpop.eup %6811 }
 0xf3d   : > { %v2783_v50 = vmul.f32 %v6812_v49, %v2781_v48  ;;  %v5574_v49 = vld [vmem:[%s8434_s2 + $0x2c8] sm:$0xff] }
 0xf3f   : > { %v2785_v52 = vsel %vm2784_vm7, %v2781_v48, %v2783_v50  ;;  %v5573_v48 = vld [vmem:[%s8434_s2 + $0x2c0] sm:$0xff] }
 0xf40   : > { %v2788_v54 = vsel %vm2786_vm8, %v2787_v51, %v2785_v52  ;;  %v5578_v50 = vld [vmem:[%s8434_s2 + $0x1e0] sm:$0xff]  ;;  %v5579_v51 = vld [vmem:[%s8434_s2 + $0x1e8] sm:$0xff]  ;;  %v6627_v52 = vpack.c.bf16 %v5574_v49, %v5573_v48 }
 0xf41   : > { %v2789_v55 = vadd.f32 1e-06, %v2788_v54  ;;  %v6633_v54 = vpack.c.bf16 %v5579_v51, %v5578_v50 }
 0xf43   : > { %6813 = vrcp.f32 %v2789_v55  ;;  %v5575_v55 = vld [vmem:[%s8434_s2 + $0x2d0] sm:$0xff] }
 0xf4d   : > { %v6814_v57 = vpop.eup %6813 }
 0xf4e   : > { %v2795_v59 = vmul.f32 %v6814_v57, %v2794_v56  ;;  %v5576_v56 = vld [vmem:[%s8434_s2 + $0x2d8] sm:$0xff]  ;;  %v5580_v57 = vld [vmem:[%s8434_s2 + $0x1f0] sm:$0xff] }
 0xf50   : > { %v2796_v2 = vmul.f32 %v2795_v59, %v2776_v33  ;;  %v5560_v33 = vld [vmem:[%s8434_s2 + $0x2b0] sm:$0xff]  ;;  %v6636_v59 = vpack.c.bf16 %v5581_v58, %v5580_v57 }
 0xf51   : > { %v6612_v36 = vpack.c.bf16 %v5561_v34, %v5560_v33 }
 0xf52   : > { %v7777_v8 = vadd.f32 %v2800_v53, %v2796_v2  ;;  %v6630_v53 = vpack.c.bf16 %v5576_v56, %v5575_v55  ;;  %v5589_v2 = vld [vmem:[%s8434_s2 + $0x2e8] sm:$0xff] }
 0xf54   : > { %6221 = vmatmul.mubr.msk.f32.vlgmr.msra.gmra.mrb[28].mxu0 %vm414_vm0, %v7777_v8  ;;  %6232 = vmatmul.mubr.msk.f32.vlgmr.msra.gmra.mrb[28].mxu1 %vm414_vm0, %v7777_v8 }
 0xf55   : > { %6592 = vmatpush3.bf16.msra.mxu0 %v6591_v4  ;;  %6598 = vmatpush3.bf16.msra.mxu1 %v6597_v5  ;;  %v6639_v4 = vpack.c.bf16 %v5584_v63, %v5583_v62  ;;  %v6645_v5 = vpack.c.bf16 %v5589_v2, %v5588_v1 }
 0xf56   : > { %6593 = vmatprep.subr.bf16.mxu0 %v6917_v15  ;;  %6599 = vmatprep.subr.bf16.mxu1 %v6917_v15 }
 0xf57   : > { %6242 = vmatprep.mubr.msk.f32.mxu0 %vm6918_vm1, %v6919_v23  ;;  %6253 = vmatprep.mubr.msk.f32.mxu1 %vm6918_vm1, %v6919_v23 }
 0xf59   : > { %6595 = vmatpush3.bf16.msra.mxu0 %v6594_v13  ;;  %6601 = vmatpush3.bf16.msra.mxu1 %v6600_v14  ;;  %v6642_v13 = vpack.c.bf16 %v5586_v9, %v5585_v6  ;;  %v6648_v14 = vpack.c.bf16 %v5591_v28, %v5590_v10 }
 0xf5a   : > { %6602 = vmatprep.subr.bf16.mxu0 %v6917_v15  ;;  %6608 = vmatprep.subr.bf16.mxu1 %v6917_v15 }
 0xf5c   : > { %6243 = vmatmul.mubr.msk.f32.vlgmr.msra.gmra.mrb[30].mxu0 %vm414_vm0, %v7777_v8  ;;  %6254 = vmatmul.mubr.msk.f32.vlgmr.msra.gmra.mrb[30].mxu1 %vm414_vm0, %v7777_v8 }
 0xf5d   : > { %6604 = vmatpush3.bf16.msra.mxu0 %v6603_v24  ;;  %6610 = vmatpush3.bf16.msra.mxu1 %v6609_v31 }
 0xf5e   : > { %6605 = vmatprep.subr.bf16.mxu0 %v6917_v15  ;;  %6611 = vmatprep.subr.bf16.mxu1 %v6917_v15 }
 0xf5f   : > { %6264 = vmatprep.mubr.msk.f32.mxu0 %vm6918_vm1, %v6919_v23  ;;  %6275 = vmatprep.mubr.msk.f32.mxu1 %vm6918_vm1, %v6919_v23 }
 0xf61   : > { %6607 = vmatpush3.bf16.msra.mxu0 %v6606_v35  ;;  %6613 = vmatpush3.bf16.msra.mxu1 %v6612_v36 }
 0xf62   : > { %6614 = vmatprep.subr.bf16.mxu0 %v6917_v15  ;;  %6620 = vmatprep.subr.bf16.mxu1 %v6917_v15 }
 0xf64   : > { %6265 = vmatmul.mubr.msk.f32.vlgmr.msra.gmra.mrb[32].mxu0 %vm414_vm0, %v7777_v8  ;;  %6276 = vmatmul.mubr.msk.f32.vlgmr.msra.gmra.mrb[32].mxu1 %vm414_vm0, %v7777_v8 }
 0xf65   : > { %6616 = vmatpush3.bf16.msra.mxu0 %v6615_v40  ;;  %6622 = vmatpush3.bf16.msra.mxu1 %v6621_v42 }
 0xf66   : > { %6617 = vmatprep.subr.bf16.mxu0 %v6917_v15  ;;  %6623 = vmatprep.subr.bf16.mxu1 %v6917_v15 }
 0xf67   : > { %6286 = vmatprep.mubr.msk.f32.mxu0 %vm6918_vm1, %v6919_v23  ;;  %6297 = vmatprep.mubr.msk.f32.mxu1 %vm6918_vm1, %v6919_v23 }
 0xf69   : > { %6619 = vmatpush3.bf16.msra.mxu0 %v6618_v44  ;;  %6625 = vmatpush3.bf16.msra.mxu1 %v6624_v47 }
 0xf6a   : > { %6626 = vmatprep.subr.bf16.mxu0 %v6917_v15  ;;  %6632 = vmatprep.subr.bf16.mxu1 %v6917_v15 }
 0xf6c   : > { %6287 = vmatmul.mubr.msk.f32.vlgmr.msra.gmra.mrb[34].mxu0 %vm414_vm0, %v7777_v8  ;;  %6298 = vmatmul.mubr.msk.f32.vlgmr.msra.gmra.mrb[34].mxu1 %vm414_vm0, %v7777_v8 }
 0xf6d   : > { %6628 = vmatpush3.bf16.msra.mxu0 %v6627_v52  ;;  %6634 = vmatpush3.bf16.msra.mxu1 %v6633_v54 }
 0xf6e   : > { %6629 = vmatprep.subr.bf16.mxu0 %v6917_v15  ;;  %6635 = vmatprep.subr.bf16.mxu1 %v6917_v15 }
 0xf6f   : > { %6308 = vmatprep.mubr.msk.f32.mxu0 %vm6918_vm1, %v6919_v23  ;;  %6319 = vmatprep.mubr.msk.f32.mxu1 %vm6918_vm1, %v6919_v23 }
 0xf71   : > { %6631 = vmatpush3.bf16.msra.mxu0 %v6630_v53  ;;  %6637 = vmatpush3.bf16.msra.mxu1 %v6636_v59 }
 0xf72   : > { %6638 = vmatprep.subr.bf16.mxu0 %v6917_v15  ;;  %6644 = vmatprep.subr.bf16.mxu1 %v6917_v15 }
 0xf74   : > { %6309 = vmatmul.mubr.msk.f32.vlgmr.msra.gmra.mrb[36].mxu0 %vm414_vm0, %v7777_v8  ;;  %6320 = vmatmul.mubr.msk.f32.vlgmr.msra.gmra.mrb[36].mxu1 %vm414_vm0, %v7777_v8 }
 0xf75   : > { %6640 = vmatpush3.bf16.msra.mxu0 %v6639_v4  ;;  %6646 = vmatpush3.bf16.msra.mxu1 %v6645_v5 }
 0xf76   : > { %6641 = vmatprep.subr.bf16.mxu0 %v6917_v15  ;;  %6647 = vmatprep.subr.bf16.mxu1 %v6917_v15 }
 0xf77   : > { %6330 = vmatprep.mubr.msk.f32.mxu0 %vm6918_vm1, %v6919_v23  ;;  %6341 = vmatprep.mubr.msk.f32.mxu1 %vm6918_vm1, %v6919_v23 }
 0xf79   : > { %6643 = vmatpush3.bf16.msra.mxu0 %v6642_v13  ;;  %6649 = vmatpush3.bf16.msra.mxu1 %v6648_v14 }
 0xf7a   : > { %6344 = vmatprep.subr.mxu0 %v6919_v23  ;;  %6349 = vmatprep.subr.mxu1 %v6919_v23 }
 0xf7c   : > { %6331 = vmatmul.mubr.msk.f32.vlgmr.msra.gmra.mrb[38].mxu0 %vm414_vm0, %v7777_v8  ;;  %6342 = vmatmul.mubr.msk.f32.vlgmr.msra.gmra.mrb[38].mxu1 %vm414_vm0, %v7777_v8  ;;  %v7959_v8 = vrot.slane %v7744_v18, %v613_v60 }
 0xf7d   : > { %6346 = vmatprep.mubr.msk.f32.mxu0 %vm6918_vm1, %v6919_v23  ;;  %6351 = vmatprep.mubr.msk.f32.mxu1 %vm6918_vm1, %v6919_v23 }
0x1027   : > { %v2880_v3 = vpop.f32.mrb[28].mxu0  ;;  %v2959_v16 = vpop.f32.mrb[28].mxu1 }
0x1028   : > { %v2960_v19 = vadd.f32 %v2959_v16, %v7748_v45  ;;  %v6222_v20 = vpop.f32.mrb[29].mxu0  ;;  %v6233_v24 = vpop.f32.mrb[29].mxu1  ;;  %v2881_v31 = vadd.f32 %v2880_v3, %v7754_v46 }
0x102a   : > { %6345 = vmatpush3.xpose.msk.msra.mxu0 %vm1390_vm4, %v2960_v19 }
0x102b   : > { %6354 = vmatprep.subr.mxu0 %v6919_v23 }
0x102d   : > { %6347 = vmatmul.mubr.msk.f32.vlgmr.msra.gmra.mrb[40].mxu0 %vm1390_vm4, %v2881_v31 }
0x102e   : > { %6356 = vmatprep.mubr.msk.f32.mxu0 %vm6918_vm1, %v6919_v23 }
0x102f   : > { %v3038_v11 = vpop.f32.mrb[30].mxu0  ;;  %v3117_v33 = vpop.f32.mrb[30].mxu1 }
0x1030   : > { %v3039_v34 = vadd.f32 %v3038_v11, %v7959_v8  ;;  %v6244_v35 = vpop.f32.mrb[31].mxu0  ;;  %v6255_v36 = vpop.f32.mrb[31].mxu1  ;;  %v3118_v42 = vadd.f32 %v3117_v33, %v3049_v7  ;;  %v5596_v33 = vld [vmem:[%s8435_s3 + $0x20] sm:$0xff] }
0x1032   : > { %6350 = vmatpush3.msra.mxu1 %v3039_v34  ;;  %v5600_v34 = vld [vmem:[%s8435_s3 + $0x28] sm:$0xff] }
0x1033   : > { %6359 = vmatprep.subr.mxu1 %v6919_v23 }
0x1037   : > { %v3196_v37 = vpop.f32.mrb[32].mxu0  ;;  %v3275_v30 = vpop.f32.mrb[32].mxu1 }
0x1038   : > { %v3197_v60 = vadd.f32 %v3196_v37, %v3128_v32  ;;  %v6266_v38 = vpop.f32.mrb[33].mxu0  ;;  %v6277_v40 = vpop.f32.mrb[33].mxu1 }
0x103a   : > { %6355 = vmatpush3.xpose.msk.msra.mxu0 %vm1390_vm4, %v3197_v60 }
0x103b   : > { %6364 = vmatprep.subr.mxu0 %v6919_v23 }
0x103d   : > { %6357 = vmatmul.mubr.msk.f32.vlgmr.msra.gmra.mrb[42].mxu0 %vm1390_vm4, %v3118_v42 }
0x103e   : > { %6366 = vmatprep.mubr.msk.f32.mxu0 %vm6918_vm1, %v6919_v23  ;;  %6365 = vmatpush3.msra.mxu0 %v5600_v34 }
0x103f   : > { %v7971_v43 = vpop.f32.mrb[34].mxu0  ;;  %v7973_v17 = vpop.f32.mrb[34].mxu1  ;;  %6374 = vmatprep.subr.mxu0 %v6919_v23 }
0x1040   : > { %v6288_v29 = vpop.f32.mrb[35].mxu0  ;;  %v6299_v21 = vpop.f32.mrb[35].mxu1 }
0x1047   : > { %v7975_v44 = vpop.f32.mrb[36].mxu0  ;;  %v7977_v47 = vpop.f32.mrb[36].mxu1 }
0x1048   : > { %v6310_v48 = vpop.f32.mrb[37].mxu0  ;;  %v6321_v49 = vpop.f32.mrb[37].mxu1 }
0x104f   : > { %v7979_v50 = vpop.f32.mrb[38].mxu0  ;;  %v7981_v51 = vpop.f32.mrb[38].mxu1 }
0x1050   : > { %v6332_v52 = vpop.f32.mrb[39].mxu0  ;;  %v6343_v54 = vpop.f32.mrb[39].mxu1 }
0x1100   : > { %v3819_v55 = vpop.f32.mrb[40].mxu0 }
0x1101   : > { %v3823_v56 = vmul.f32 0.35355338, %v3819_v55  ;;  %v6348_v57 = vpop.f32.mrb[41].mxu0 }
0x1103   : > { %v3824_v58 = vsel %vm1390_vm4, %v3823_v56, -inf }
0x1104   : > { %3825 = vmax.xlane.f32.xlu1 %v3824_v58 }
0x1110   : > { %v3982_v53 = vpop.f32.mrb[42].mxu0 }
0x1111   : > { %v3986_v59 = vmul.f32 0.35355338, %v3982_v53  ;;  %v6358_v62 = vpop.f32.mrb[43].mxu0 }
0x1113   : > { %v3987_v63 = vsel %vm1390_vm4, %v3986_v59, -inf }
0x1114   : > { %3988 = vmax.xlane.f32.xlu0 %v3987_v63 }
0x1115   : > { %3362 = vrot.lane.b32.xlu1 %v7748_v45, %s8459_s1 }
0x1191   : > { %v3826_v1 = vpop.xlane.xlu1 %3825 }
0x1192   : > { %v3827_v2 = vsub.f32 %v3823_v56, %v3826_v1 }
0x1194   : > { %v3828_v4 = vmul.f32 1.442695, %v3827_v2 }
0x1195   : > { %v3363_v7 = vpop.permute.xlu1 %3362 }
0x1196   : > { %6815 = vpow2.f32 %v3828_v4  ;;  %v3432_v37 = vadd.f32 %v7973_v17, %v3363_v7 }
0x11a0   : > { %v6816_v5 = vpop.eup %6815 }
0x11a1   : > { %v3989_v6 = vpop.xlane.xlu0 %3988  ;;  %v3830_v9 = vsel %vm1390_vm4, %v6816_v5, 0.0 }
0x11a2   : > { %v3990_v10 = vsub.f32 %v3986_v59, %v3989_v6  ;;  %3831 = vadd.xlane.f32.xlu0 %v3830_v9 }
0x11a4   : > { %v3991_v28 = vmul.f32 1.442695, %v3990_v10 }
0x11a6   : > { %6817 = vpow2.f32 %v3991_v28 }
0x11b0   : > { %v6818_v13 = vpop.eup %6817 }
0x11b1   : > { %v3993_v14 = vsel %vm1390_vm4, %v6818_v13, 0.0 }
0x11b2   : > { %3994 = vadd.xlane.f32.xlu0 %v3993_v14 }
0x11c8   : > { %3206 = vrot.lane.b32.xlu0 %v7959_v8, %s8458_s30 }
0x11cc   : > { %3284 = vrot.lane.b32.xlu0 %v7754_v46, %s8459_s1 }
0x122f   : > { %v3832_v3 = vpop.xlane.xlu0 %3831 }
0x1230   : > { %6819 = vrcp.f32 %v3832_v3 }
0x123a   : > { %v6820_v16 = vpop.eup %6819 }
0x123b   : > { %v3834_v19 = vmul.f32 %v6820_v16, %v6816_v5 }
0x123d   : > { %6352 = vmatmul.mubr.msk.f32.vlgmr.msra.gmra.mrb[40].mxu1 %vm1390_vm4, %v3834_v19 }
0x123e   : > { %6361 = vmatprep.mubr.msk.f32.mxu1 %vm6918_vm1, %v6919_v23 }
0x123f   : > { %v3995_v20 = vpop.xlane.xlu0 %3994 }
0x1240   : > { %6821 = vrcp.f32 %v3995_v20 }
0x1243   : > { %v3207_v24 = vpop.permute.xlu0 %3206 }
0x1244   : > { %v3276_v31 = vadd.f32 %v3275_v30, %v3207_v24 }
0x1246   : > { %6360 = vmatpush3.msra.mxu1 %v3276_v31  ;;  %v5611_v31 = vld [vmem:[%s8435_s3 + $0x38] sm:$0xff] }
0x1247   : > { %6369 = vmatprep.subr.mxu1 %v6919_v23  ;;  %v3285_v30 = vpop.permute.xlu0 %3284 }
0x1248   : > { %v3354_v40 = vadd.f32 %v7971_v43, %v3285_v30  ;;  %v4697_v30 = vrot.slane %v7744_v18, %v2339_v0  ;;  %v5614_v0 = vld [vmem:[%s8436_s4 + $0x88] sm:$0xff] }
0x124a   : > { %v6822_v32 = vpop.eup %6821 }
0x124b   : > { %v3997_v11 = vmul.f32 %v6822_v32, %v6818_v13 }
0x124d   : > { %6362 = vmatmul.mubr.msk.f32.vlgmr.msra.gmra.mrb[42].mxu1 %vm1390_vm4, %v3997_v11 }
0x124e   : > { %6371 = vmatprep.mubr.msk.f32.mxu1 %vm6918_vm1, %v6919_v23  ;;  %6370 = vmatpush3.msra.mxu1 %v5596_v33 }
0x124f   : > { %6379 = vmatprep.subr.mxu1 %v6919_v23 }
0x1310   : > { %v3904_v35 = vpop.f32.mrb[40].mxu1 }
0x1311   : > { %v6353_v36 = vpop.f32.mrb[41].mxu1  ;;  %6372 = vmatmul.mubr.msk.f32.vlgmr.msra.gmra.mrb[44].mxu1 %vm1390_vm4, %v3904_v35 }
0x1312   : > { %6381 = vmatprep.mubr.msk.f32.mxu1 %vm6918_vm1, %v6919_v23 }
0x1320   : > { %v4067_v60 = vpop.f32.mrb[42].mxu1 }
0x1321   : > { %v6363_v38 = vpop.f32.mrb[43].mxu1  ;;  %6367 = vmatmul.mubr.msk.f32.vlgmr.msra.gmra.mrb[44].mxu0 %vm1390_vm4, %v4067_v60 }
0x1322   : > { %6375 = vmatpush3.xpose.msk.msra.mxu0 %vm1390_vm4, %v3432_v37  ;;  %6376 = vmatprep.mubr.msk.f32.mxu0 %vm6918_vm1, %v6919_v23 }
0x1323   : > { %6384 = vmatprep.subr.mxu0 %v6919_v23 }
0x1325   : > { %6377 = vmatmul.mubr.msk.f32.vlgmr.msra.gmra.mrb[46].mxu0 %vm1390_vm4, %v3354_v40 }
0x1326   : > { %6386 = vmatprep.mubr.msk.f32.mxu0 %vm6918_vm1, %v6919_v23 }
0x13e4   : > { %v4215_v42 = vpop.f32.mrb[44].mxu1 }
0x13e5   : > { %v6373_v17 = vpop.f32.mrb[45].mxu1 }
0x13f4   : > { %v4142_v29 = vpop.f32.mrb[44].mxu0 }
0x13f5   : > { %v4216_v21 = vadd.f32 %v4215_v42, %v4142_v29  ;;  %v6368_v48 = vpop.f32.mrb[45].mxu0 }
0x13f8   : > { %v4291_v49 = vpop.f32.mrb[46].mxu0 }
0x13f9   : > { %v4295_v52 = vmul.f32 0.35355338, %v4291_v49  ;;  %v6378_v54 = vpop.f32.mrb[47].mxu0 }
0x13fb   : > { %v4296_v55 = vsel %vm1390_vm4, %v4295_v52, -inf }
0x13fc   : > { %4297 = vmax.xlane.f32.xlu0 %v4296_v55  ;;  %v5620_v55 = vld [vmem:[%s8436_s4 + $0xb8] sm:$0xff] }
0x1412   : > { %3440 = vrot.lane.b32.xlu0 %v7959_v8, %s8459_s1  ;;  %s6859_s1 = scalar_lea.vmem %s6858_s28, 32 }
0x1416   : > { %3518 = vrot.lane.b32.xlu0 %v7754_v46, %s8460_s20 }
0x1489   : > { %v4298_v43 = vpop.xlane.xlu0 %4297 }
0x148a   : > { %v4299_v56 = vsub.f32 %v4295_v52, %v4298_v43  ;;  %v5616_v52 = vld [vmem:[%s8436_s4 + $0x98] sm:$0xff]  ;;  %v5613_v43 = vld [vmem:[%s8436_s4 + $0x80] sm:$0xff] }
0x148c   : > { %v4300_v57 = vmul.f32 1.442695, %v4299_v56  ;;  %v5617_v56 = vld [vmem:[%s8436_s4 + $0xa0] sm:$0xff] }
0x148d   : > { %v3441_v58 = vpop.permute.xlu0 %3440 }
0x148e   : > { %6823 = vpow2.f32 %v4300_v57  ;;  %v3510_v53 = vadd.f32 %v7975_v44, %v3441_v58  ;;  %v6658_v57 = vpack.c.bf16 %v5620_v55, %v5616_v52  ;;  %v6652_v58 = vpack.c.bf16 %v5617_v56, %v5613_v43  ;;  %v5666_v52 = vld [vmem:[%s8437_s5 + $0x310] sm:$0xff]  ;;  %v5653_v55 = vld [vmem:[%s8437_s5 + $0x2a8] sm:$0xff]  ;;  %v5684_v43 = vld [vmem:[%s8437_s5 + $0x3a0] sm:$0xff] }
0x148f   : > { %v5685_v56 = vld [vmem:[%s8437_s5 + $0x3a8] sm:$0xff] }
0x1490   : > { %6380 = vmatpush3.msra.mxu1 %v3510_v53  ;;  %v5615_v53 = vld [vmem:[%s8436_s4 + $0x90] sm:$0xff] }
0x1491   : > { %6389 = vmatprep.subr.mxu1 %v6919_v23  ;;  %v3519_v4 = vpop.permute.xlu0 %3518 }
0x1492   : > { %v3588_v44 = vadd.f32 %v7977_v47, %v3519_v4 }
0x1498   : > { %v6824_v59 = vpop.eup %6823 }
0x1499   : > { %v4302_v62 = vsel %vm1390_vm4, %v6824_v59, 0.0 }
0x149a   : > { %4303 = vadd.xlane.f32.xlu1 %v4302_v62  ;;  %v5622_v62 = vld [vmem:[%s8436_s4 + $0xc8] sm:$0xff] }
0x14ab   : > { %3596 = vrot.lane.b32.xlu1 %v7748_v45, %s8460_s20  ;;  %v5606_v45 = vld [vmem:[%s8435_s3 + $0x30] sm:$0xff] }
0x14ac   : > { %6385 = vmatpush3.msra.mxu0 %v5606_v45  ;;  %v5625_v45 = vld [vmem:[%s8436_s4 + $0xe0] sm:$0xff] }
0x14ad   : > { %6394 = vmatprep.subr.mxu0 %v6919_v23 }
0x1527   : > { %v4304_v63 = vpop.xlane.xlu1 %4303 }
0x1528   : > { %6825 = vrcp.f32 %v4304_v63 }
0x152b   : > { %v3597_v46 = vpop.permute.xlu1 %3596 }
0x152c   : > { %v3666_v5 = vadd.f32 %v7979_v50, %v3597_v46  ;;  %v5626_v46 = vld [vmem:[%s8436_s4 + $0xe8] sm:$0xff] }
0x152d   : > { %v6654_v4 = vpack.c.bf16 %v5626_v46, %v5622_v62  ;;  %v5668_v46 = vld [vmem:[%s8437_s5 + $0x320] sm:$0xff] }
0x1532   : > { %v6826_v1 = vpop.eup %6825 }
0x1533   : > { %v4306_v2 = vmul.f32 %v6826_v1, %v6824_v59  ;;  %v5619_v59 = vld [vmem:[%s8436_s4 + $0xb0] sm:$0xff]  ;;  %v5624_v1 = vld [vmem:[%s8436_s4 + $0xd8] sm:$0xff] }
0x1534   : > { %v6660_v63 = vpack.c.bf16 %v5619_v59, %v5615_v53  ;;  %v5636_v53 = vld [vmem:[%s8437_s5 + $0x220] sm:$0xff]  ;;  %v5637_v59 = vld [vmem:[%s8437_s5 + $0x228] sm:$0xff] }
0x1535   : > { %6382 = vmatmul.mubr.msk.f32.vlgmr.msra.gmra.mrb[46].mxu1 %vm1390_vm4, %v4306_v2  ;;  %v5628_v2 = vld [vmem:[%s8436_s4 + $0xf8] sm:$0xff] }
0x1536   : > { %6390 = vmatpush3.xpose.msk.msra.mxu1 %vm1390_vm4, %v3666_v5  ;;  %6391 = vmatprep.mubr.msk.f32.mxu1 %vm6918_vm1, %v6919_v23  ;;  %v6662_v5 = vpack.c.bf16 %v5628_v2, %v5624_v1  ;;  %v5669_v1 = vld [vmem:[%s8437_s5 + $0x328] sm:$0xff]  ;;  %v5654_v2 = vld [vmem:[%s8437_s5 + $0x2b0] sm:$0xff] }
0x1537   : > { %6399 = vmatprep.subr.mxu1 %v6919_v23 }
0x1539   : > { %6392 = vmatmul.mubr.msk.f32.vlgmr.msra.gmra.mrb[48].mxu1 %vm1390_vm4, %v3588_v44  ;;  %v5621_v44 = vld [vmem:[%s8436_s4 + $0xc0] sm:$0xff] }
0x153a   : > { %6401 = vmatprep.mubr.msk.f32.mxu1 %vm6918_vm1, %v6919_v23  ;;  %6400 = vmatpush3.msra.mxu1 %v5611_v31 }
0x153b   : > { %6659 = vmatprep.subr.bf16.mxu1 %v6658_v57 }
0x1608   : > { %v4376_v50 = vpop.f32.mrb[46].mxu1 }
0x1609   : > { %v6383_v6 = vpop.f32.mrb[47].mxu1  ;;  %6387 = vmatmul.mubr.msk.f32.vlgmr.msra.gmra.mrb[48].mxu0 %vm1390_vm4, %v4376_v50  ;;  %v5623_v50 = vld [vmem:[%s8436_s4 + $0xd0] sm:$0xff] }
0x160a   : > { %6396 = vmatprep.mubr.msk.f32.mxu0 %vm6918_vm1, %v6919_v23  ;;  %v6656_v6 = vpack.c.bf16 %v5625_v45, %v5621_v44  ;;  %v5687_v44 = vld [vmem:[%s8437_s5 + $0x3b8] sm:$0xff]  ;;  %v6676_v45 = vpack.c.bf16 %v5637_v59, %v5636_v53  ;;  %v5694_v59 = vld [vmem:[%s8437_s5 + $0x3f0] sm:$0xff] }
0x160b   : > { %v5663_v53 = vld [vmem:[%s8437_s5 + $0x2f8] sm:$0xff] }
0x160c   : > { %v4528_v47 = vpop.f32.mrb[48].mxu1 }
0x160d   : > { %v4532_v9 = vmul.f32 0.35355338, %v4528_v47  ;;  %v6393_v10 = vpop.f32.mrb[49].mxu1  ;;  %v5627_v47 = vld [vmem:[%s8436_s4 + $0xf0] sm:$0xff] }
0x160e   : > { %v5648_v10 = vld [vmem:[%s8437_s5 + $0x280] sm:$0xff] }
0x160f   : > { %v4533_v28 = vsel %vm1390_vm4, %v4532_v9, -inf }
0x1610   : > { %4534 = vmax.xlane.f32.xlu0 %v4533_v28  ;;  %v5649_v28 = vld [vmem:[%s8437_s5 + $0x288] sm:$0xff] }
0x1626   : > { %3674 = vrot.lane.b32.xlu0 %v7959_v8, %s8460_s20  ;;  %s5393_s20 = sshll.u32 %s403_s18, 4  ;;  %s8391_s20 = int_to_ptr.vmem [resolvable:$true] %s5393_s20 }
0x1627   : > { %s6853_s0 = scalar_lea.vmem %s8391_s20, 16  ;;  %p6860_p0 = scmp.lt.s32.totalorder %s8391_s20, %s6858_s28 }
0x1628   : > { %p6854_p11 = scmp.ne.s32.totalorder %s8391_s20, %s6853_s0  ;;  %p6861_p1 = scmp.lt.s32.totalorder %s6859_s1, %s6853_s0 }
0x162a   : > { %p6855_p12 = pnand %p6854_p11, %p7027_p5  ;;  %p6862_p2 = por %p6861_p1, %p6860_p0 }
0x162c   : > { %p6856_p13 = pneg %p6855_p12 }
0x162e   : > { %p6863_p3 = pnand %p6862_p2, %p6856_p13 }
0x169d   : > { %v4535_v13 = vpop.xlane.xlu0 %4534 }
0x169e   : > { %v4536_v14 = vsub.f32 %v4532_v9, %v4535_v13  ;;  %v6664_v9 = vpack.c.bf16 %v5627_v47, %v5623_v50  ;;  %v5680_v13 = vld [vmem:[%s8437_s5 + $0x380] sm:$0xff]  ;;  %v6708_v50 = vpack.c.bf16 %v5669_v1, %v5668_v46  ;;  %v5639_v47 = vld [vmem:[%s8437_s5 + $0x238] sm:$0xff]  ;;  %v5646_v46 = vld [vmem:[%s8437_s5 + $0x270] sm:$0xff] }
0x169f   : > { %v5647_v1 = vld [vmem:[%s8437_s5 + $0x278] sm:$0xff] }
0x16a0   : > { %v4537_v3 = vmul.f32 1.442695, %v4536_v14  ;;  %v6666_v14 = vpack.c.bf16 %v5649_v28, %v5648_v10  ;;  %v5670_v28 = vld [vmem:[%s8437_s5 + $0x330] sm:$0xff] }
0x16a1   : > { %v3675_v16 = vpop.permute.xlu0 %3674 }
0x16a2   : > { %6827 = vpow2.f32 %v4537_v3  ;;  %v3744_v19 = vadd.f32 %v7981_v51, %v3675_v16  ;;  %v5681_v3 = vld [vmem:[%s8437_s5 + $0x388] sm:$0xff] }
0x16a3   : > { %v6698_v16 = vpack.c.bf16 %v5681_v3, %v5680_v13  ;;  %v5671_v13 = vld [vmem:[%s8437_s5 + $0x338] sm:$0xff]  ;;  %v5657_v3 = vld [vmem:[%s8437_s5 + $0x2c8] sm:$0xff] }
0x16a4   : > { %6395 = vmatpush3.msra.mxu0 %v3744_v19 }
0x16ac   : > { %v6828_v20 = vpop.eup %6827 }
0x16ad   : > { %v4539_v24 = vsel %vm1390_vm4, %v6828_v20, 0.0 }
0x16ae   : > { %4540 = vadd.xlane.f32.xlu1 %v4539_v24 }
0x16dc   : > { %v4451_v32 = vpop.f32.mrb[48].mxu0 }
0x16dd   : > { %v4455_v11 = vadd.f32 %v4451_v32, %v4216_v21  ;;  %v6388_v8 = vpop.f32.mrb[49].mxu0 }
0x173b   : > { %v4541_v33 = vpop.xlane.xlu1 %4540 }
0x173c   : > { %6829 = vrcp.f32 %v4541_v33 }
0x1746   : > { %v6830_v34 = vpop.eup %6829 }
0x1747   : > { %v4543_v35 = vmul.f32 %v6830_v34, %v6828_v20  ;;  %v4721_v34 = vrot.slane %v7744_v18, %v2363_v61  ;;  %v5665_v61 = vld [vmem:[%s8437_s5 + $0x308] sm:$0xff] }
0x1749   : > { %6397 = vmatmul.mubr.msk.f32.vlgmr.msra.gmra.mrb[50].mxu0 %vm1390_vm4, %v4543_v35 }
0x174a   : > { %4836 = vmatprep.mubr.f32.mxu0 %v6919_v23 }
0x181c   : > { %v4613_v51 = vpop.f32.mrb[50].mxu0 }
0x181d   : > { %v6398_v36 = vpop.f32.mrb[51].mxu0  ;;  %6402 = vmatmul.mubr.msk.f32.vlgmr.msra.gmra.mrb[50].mxu1 %vm1390_vm4, %v4613_v51  ;;  %v5632_v51 = vld [vmem:[%s8437_s5 + $0x200] sm:$0xff] }
0x181e   : > { %4907 = vmatprep.mubr.f32.mxu1 %v6919_v23  ;;  %6661 = vmatpush1.bf16.msra.mxu1 %v6660_v63  ;;  %v5633_v36 = vld [vmem:[%s8437_s5 + $0x208] sm:$0xff]  ;;  %v6706_v63 = vpack.c.bf16 %v5685_v56, %v5684_v43 }
0x181f   : > { %6663 = vmatprep.subr.bf16.mxu1 %v6662_v5  ;;  %v5686_v5 = vld [vmem:[%s8437_s5 + $0x3b0] sm:$0xff]  ;;  %v5677_v56 = vld [vmem:[%s8437_s5 + $0x368] sm:$0xff] }
0x1820   : > { %v6710_v10 = vpack.c.bf16 %v5687_v44, %v5686_v5  ;;  %v5678_v5 = vld [vmem:[%s8437_s5 + $0x370] sm:$0xff]  ;;  %v5679_v44 = vld [vmem:[%s8437_s5 + $0x378] sm:$0xff] }
0x1822   : > { %6665 = vmatpush1.bf16.msra.mxu1 %v6664_v9 }
0x1823   : > { %6699 = vmatprep.subr.bf16.mxu1 %v6698_v16  ;;  %v5688_v16 = vld [vmem:[%s8437_s5 + $0x3c0] sm:$0xff] }
0x18f0   : > { %v4688_v7 = vpop.f32.mrb[50].mxu1 }
0x18f1   : > { %v4692_v37 = vadd.f32 %v4688_v7, %v4455_v11  ;;  %v6403_v60 = vpop.f32.mrb[51].mxu1 }
0x18f2   : > { %v5650_v60 = vld [vmem:[%s8437_s5 + $0x290] sm:$0xff] }
0x18f3   : > { %v4693_v38 = vadd.f32 %v4692_v37, %v7707_v12  ;;  %v5618_v12 = vld [vmem:[%s8436_s4 + $0xa8] sm:$0xff]  ;;  %v4727_v37 = vrot.slane %v7744_v18, %v2369_v22  ;;  %v5683_v22 = vld [vmem:[%s8437_s5 + $0x398] sm:$0xff] }
0x18f4   : > { %v6650_v54 = vpack.c.bf16 %v5618_v12, %v5614_v0  ;;  %v6702_v12 = vpack.c.bf16 %v5683_v22, %v5682_v25  ;;  %v5674_v22 = vld [vmem:[%s8437_s5 + $0x350] sm:$0xff] }
0x18f5   : > { %v8064_v40 = vadd.f32 %v4697_v30, %v4693_v38  ;;  %v5664_v30 = vld [vmem:[%s8437_s5 + $0x300] sm:$0xff]  ;;  %v5651_v38 = vld [vmem:[%s8437_s5 + $0x298] sm:$0xff] }
0x18f6   : > { %6651 = vmatprep.subr.bf16.mxu0 %v6650_v54  ;;  %v6670_v0 = vpack.c.bf16 %v5651_v38, %v5650_v60  ;;  %v5652_v54 = vld [vmem:[%s8437_s5 + $0x2a0] sm:$0xff]  ;;  %v5643_v60 = vld [vmem:[%s8437_s5 + $0x258] sm:$0xff] }
0x18f7   : > { %v4699_v42 = vsel %vm414_vm0, %v8064_v40, 0.0  ;;  %6653 = vmatpush1.bf16.msra.mxu0 %v6652_v58  ;;  %v6674_v62 = vpack.c.bf16 %v5653_v55, %v5652_v54  ;;  %v5645_v54 = vld [vmem:[%s8437_s5 + $0x268] sm:$0xff]  ;;  %v5676_v55 = vld [vmem:[%s8437_s5 + $0x360] sm:$0xff] }
0x18f8   : > { %4700 = vadd.xlane.f32.xlu1 %v4699_v42  ;;  %6655 = vmatprep.subr.bf16.mxu0 %v6654_v4  ;;  %v6668_v42 = vpack.c.bf16 %v5633_v36, %v5632_v51  ;;  %v5655_v4 = vld [vmem:[%s8437_s5 + $0x2b8] sm:$0xff]  ;;  %v5690_v36 = vld [vmem:[%s8437_s5 + $0x3d0] sm:$0xff] }
0x18f9   : > { %v6678_v9 = vpack.c.bf16 %v5655_v4, %v5654_v2  ;;  %v5659_v51 = vld [vmem:[%s8437_s5 + $0x2d8] sm:$0xff]  ;;  %v6696_v4 = vpack.c.bf16 %v5647_v1, %v5646_v46 }
0x18fb   : > { %6657 = vmatpush1.bf16.msra.mxu0 %v6656_v6  ;;  %v5638_v6 = vld [vmem:[%s8437_s5 + $0x230] sm:$0xff] }
0x18fc   : > { %6667 = vmatprep.subr.bf16.mxu0 %v6666_v14  ;;  %v5656_v14 = vld [vmem:[%s8437_s5 + $0x2c0] sm:$0xff] }
0x1985   : > { %v4701_v17 = vpop.xlane.xlu1 %4700 }
0x1986   : > { %v4702_v29 = vmul.f32 0.03125, %v4701_v17  ;;  %v6700_v17 = vpack.c.bf16 %v5665_v61, %v5664_v30  ;;  %v5642_v61 = vld [vmem:[%s8437_s5 + $0x250] sm:$0xff] }
0x1988   : > { %v8069_v21 = vsub.f32 %v8064_v40, %v4702_v29  ;;  %v5634_v29 = vld [vmem:[%s8437_s5 + $0x210] sm:$0xff] }
0x198a   : > { %v4704_v48 = vmul.f32 %v8069_v21, %v8069_v21 }
0x198c   : > { %v4705_v49 = vsel %vm414_vm0, %v4704_v48, 0.0  ;;  %v5635_v48 = vld [vmem:[%s8437_s5 + $0x218] sm:$0xff] }
0x198d   : > { %4706 = vadd.xlane.f32.xlu1 %v4705_v49  ;;  %v6672_v57 = vpack.c.bf16 %v5635_v48, %v5634_v29  ;;  %v5692_v29 = vld [vmem:[%s8437_s5 + $0x3e0] sm:$0xff]  ;;  %v5693_v48 = vld [vmem:[%s8437_s5 + $0x3e8] sm:$0xff] }
0x1a1a   : > { %v4707_v19 = vpop.xlane.xlu1 %4706 }
0x1a1b   : > { %v4708_v20 = vmul.f32 0.032258064, %v4707_v19  ;;  %v5689_v19 = vld [vmem:[%s8437_s5 + $0x3c8] sm:$0xff] }
0x1a1d   : > { %6831 = vrsqrt.f32 %v4708_v20  ;;  %vm4711_vm9 = vcmp.eq.f32.partialorder %v4708_v20, inf  ;;  %v4714_v32 = vand.u32 2147483648, %v4708_v20  ;;  %vm4713_vm10 = vcmp.eq.f32.partialorder %v4708_v20, 0.0 }
0x1a27   : > { %v6832_v24 = vpop.eup %6831 }
0x1a28   : > { %v4710_v31 = vmul.f32 %v6832_v24, %v4708_v20  ;;  %v6712_v24 = vpack.c.bf16 %v5671_v13, %v5670_v28 }
0x1a2a   : > { %v4712_v11 = vsel %vm4711_vm9, %v4708_v20, %v4710_v31  ;;  %v6680_v20 = vpack.c.bf16 %v5639_v47, %v5638_v6  ;;  %v5640_v31 = vld [vmem:[%s8437_s5 + $0x240] sm:$0xff] }
0x1a2b   : > { %v4715_v8 = vsel %vm4713_vm10, %v4714_v32, %v4712_v11  ;;  %v5641_v32 = vld [vmem:[%s8437_s5 + $0x248] sm:$0xff]  ;;  %v6682_v11 = vpack.c.bf16 %v5657_v3, %v5656_v14 }
0x1a2c   : > { %v4716_v33 = vadd.f32 1e-06, %v4715_v8  ;;  %v6714_v8 = vpack.c.bf16 %v5689_v19, %v5688_v16 }
0x1a2e   : > { %6833 = vrcp.f32 %v4716_v33  ;;  %v5672_v33 = vld [vmem:[%s8437_s5 + $0x340] sm:$0xff] }
0x1a38   : > { %v6834_v35 = vpop.eup %6833 }
0x1a39   : > { %v4722_v7 = vmul.f32 %v6834_v35, %v4721_v34  ;;  %v5673_v34 = vld [vmem:[%s8437_s5 + $0x348] sm:$0xff]  ;;  %v5658_v35 = vld [vmem:[%s8437_s5 + $0x2d0] sm:$0xff] }
0x1a3a   : > { %v6716_v30 = vpack.c.bf16 %v5673_v34, %v5672_v33  ;;  %v6686_v38 = vpack.c.bf16 %v5659_v51, %v5658_v35 }
0x1a3b   : > { %v4723_v18 = vmul.f32 %v4722_v7, %v8069_v21  ;;  %v5667_v21 = vld [vmem:[%s8437_s5 + $0x318] sm:$0xff] }
0x1a3c   : > { %v6704_v58 = vpack.c.bf16 %v5667_v21, %v5666_v52  ;;  %v5691_v7 = vld [vmem:[%s8437_s5 + $0x3d8] sm:$0xff]  ;;  %v6722_v52 = vpack.c.bf16 %v5693_v48, %v5692_v29  ;;  %v5644_v21 = vld [vmem:[%s8437_s5 + $0x260] sm:$0xff] }
0x1a3d   : > { %v4728_v49 = vadd.f32 %v4727_v37, %v4723_v18  ;;  %v6684_v37 = vpack.c.bf16 %v5641_v32, %v5640_v31  ;;  %v6718_v25 = vpack.c.bf16 %v5691_v7, %v5690_v36  ;;  %v5675_v18 = vld [vmem:[%s8437_s5 + $0x358] sm:$0xff]  ;;  %v6692_v43 = vpack.c.bf16 %v5645_v54, %v5644_v21 }
0x1a3e   : > { %v5696_v7 = vld [vmem:[%s8438_s6 + $0x18] ss:$0 sm:$0xff] }
0x1a3f   : > { %5630 = vmatmul.mubr.msk.f32.vlgmr.msra.gmra.mrb[52].mxu0 %vm414_vm0, %v4728_v49  ;;  %5631 = vmatmul.mubr.msk.f32.vlgmr.msra.gmra.mrb[52].mxu1 %vm414_vm0, %v4728_v49  ;;  %v6688_v49 = vpack.c.bf16 %v5643_v60, %v5642_v61  ;;  %v5170_v29 = vld [vmem:[%s8441_s9 + $0x18] sm:$0xff] }
0x1a40   : > { %6669 = vmatpush3.bf16.msra.mxu0 %v6668_v42  ;;  %6701 = vmatpush3.bf16.msra.mxu1 %v6700_v17  ;;  %v5660_v42 = vld [vmem:[%s8437_s5 + $0x2e0] sm:$0xff]  ;;  %v5661_v17 = vld [vmem:[%s8437_s5 + $0x2e8] sm:$0xff] }
0x1a41   : > { %6671 = vmatprep.subr.bf16.mxu0 %v6670_v0  ;;  %6703 = vmatprep.subr.bf16.mxu1 %v6702_v12  ;;  %v6720_v0 = vpack.c.bf16 %v5675_v18, %v5674_v22  ;;  %v6690_v12 = vpack.c.bf16 %v5661_v17, %v5660_v42  ;;  %v5167_v18 = vld [vmem:[%s8441_s9] sm:$0xff]  ;;  %v5168_v42 = vld [vmem:[%s8441_s9 + $0x8] sm:$0xff] }
0x1a42   : > { %v6731_v17 = vpack.c.bf16 %v5168_v42, %v5167_v18  ;;  %v5285_v18 = vld [vmem:[%s8443_s11] sm:$0x1] }
0x1a44   : > { %6673 = vmatpush3.bf16.msra.mxu0 %v6672_v57  ;;  %6705 = vmatpush3.bf16.msra.mxu1 %v6704_v58  ;;  %v6724_v57 = vpack.c.bf16 %v5677_v56, %v5676_v55  ;;  %v5662_v58 = vld [vmem:[%s8437_s5 + $0x2f0] sm:$0xff]  ;;  %v5129_v56 = vld [vmem:[%s8440_s8] sm:$0x1f] }
0x1a45   : > { %6675 = vmatprep.subr.bf16.mxu0 %v6674_v62  ;;  %6707 = vmatprep.subr.bf16.mxu1 %v6706_v63  ;;  %v6694_v62 = vpack.c.bf16 %v5663_v53, %v5662_v58  ;;  %v5695_v63 = vld [vmem:[%s8437_s5 + $0x3f8] sm:$0xff] }
0x1a46   : > { %v6726_v2 = vpack.c.bf16 %v5695_v63, %v5694_v59  ;;  %v5158_v59 = vrot.slane %v5129_v56, %v7120_v41 }
0x1a48   : > { %6677 = vmatpush3.bf16.msra.mxu0 %v6676_v45  ;;  %6709 = vmatpush3.bf16.msra.mxu1 %v6708_v50  ;;  %v6728_v45 = vpack.c.bf16 %v5679_v44, %v5678_v5  ;;  %v5629_v50 = vld [vmem:[%s8439_s7 + $0x4] sm:$0xf] }
0x1a49   : > { %6679 = vmatprep.subr.bf16.mxu0 %v6678_v9  ;;  %6711 = vmatprep.subr.bf16.mxu1 %v6710_v10  ;;  %v4752_v6 = vrot.slane %v5629_v50, %v7115_v39  ;;  %v4760_v47 = vrot.slane %v5629_v50, %v7095_v27  ;;  %v4756_v9 = vrot.slane %v5629_v50, %v7120_v41 }
0x1a4a   : > { %v4764_v10 = vrot.slane %v5629_v50, %v7092_v26  ;;  %v5172_v50 = vrot.slane %v5129_v56, 2 }
0x1a4c   : > { %6681 = vmatpush3.bf16.msra.mxu0 %v6680_v20  ;;  %6713 = vmatpush3.bf16.msra.mxu1 %v6712_v24 }
0x1a4d   : > { %6683 = vmatprep.subr.bf16.mxu0 %v6682_v11  ;;  %6715 = vmatprep.subr.bf16.mxu1 %v6714_v8 }
0x1a50   : > { %6685 = vmatpush3.bf16.msra.mxu0 %v6684_v37  ;;  %6717 = vmatpush3.bf16.msra.mxu1 %v6716_v30 }
0x1a51   : > { %6687 = vmatprep.subr.bf16.mxu0 %v6686_v38  ;;  %6719 = vmatprep.subr.bf16.mxu1 %v6718_v25 }
0x1a54   : > { %6689 = vmatpush3.bf16.msra.mxu0 %v6688_v49  ;;  %6721 = vmatpush3.bf16.msra.mxu1 %v6720_v0 }
0x1a55   : > { %6691 = vmatprep.subr.bf16.mxu0 %v6690_v12  ;;  %6723 = vmatprep.subr.bf16.mxu1 %v6722_v52 }
0x1a58   : > { %6693 = vmatpush3.bf16.msra.mxu0 %v6692_v43  ;;  %6725 = vmatpush3.bf16.msra.mxu1 %v6724_v57  ;;  %v5152_v57 = vrot.slane %v5129_v56, %v7115_v39 }
0x1a59   : > { %6695 = vmatprep.subr.bf16.mxu0 %v6694_v62  ;;  %6727 = vmatprep.subr.bf16.mxu1 %v6726_v2 }
0x1a5c   : > { %6697 = vmatpush3.bf16.msra.mxu0 %v6696_v4  ;;  %6729 = vmatpush3.bf16.msra.mxu1 %v6728_v45 }
0x1a5d   : > { %6730 = vmatprep.subr.bf16.mxu0 %v6917_v15  ;;  %6736 = vmatprep.subr.bf16.mxu1 %v6917_v15 }
0x1b12   : > { %v4838_v28 = vpop.f32.mrb[52].mxu0  ;;  %v4909_v13 = vpop.f32.mrb[52].mxu1 }
0x1b13   : > { %v4839_v14 = vadd.f32 %v4838_v28, %v4752_v6  ;;  %v4910_v3 = vadd.f32 %v4909_v13, %v4760_v47  ;;  %v4840_v16 = vpop.f32.mrb[53].mxu0  ;;  %v4911_v19 = vpop.f32.mrb[53].mxu1 }
0x1b14   : > { %v4841_v20 = vadd.f32 %v4840_v16, %v4756_v9  ;;  %v4912_v24 = vadd.f32 %v4911_v19, %v4764_v10  ;;  %v5282_v16 = vld [vmem:[%s8442_s10 + $0x8] sm:$0xff]  ;;  %v5283_v19 = vld [vmem:[%s8442_s10 + $0x10] sm:$0xff] }
0x1b15   : > { %v4914_v11 = vmax.f32 %v4839_v14, 0.0  ;;  %v4916_v8 = vmax.f32 %v4910_v3, 0.0  ;;  %v5281_v3 = vld [vmem:[%s8442_s10] sm:$0xff] }
0x1b16   : > { %v4915_v31 = vmax.f32 %v4841_v20, 0.0  ;;  %v4917_v32 = vmax.f32 %v4912_v24, 0.0  ;;  %v6737_v20 = vpack.c.bf16 %v5282_v16, %v5281_v3  ;;  %v5284_v24 = vld [vmem:[%s8442_s10 + $0x18] sm:$0xff] }
0x1b18   : > { %5047 = vmatprep.mubr.f32.mxu0 %v4915_v31  ;;  %5117 = vmatprep.mubr.f32.mxu1 %v4917_v32  ;;  %v6740_v31 = vpack.c.bf16 %v5284_v24, %v5283_v19 }
0x1b19   : > { %5048 = vmatmul.mubr.f32.vlgmr.msra.gmra.mrb[54].mxu0 %v4914_v11  ;;  %5118 = vmatmul.mubr.f32.vlgmr.msra.gmra.mrb[54].mxu1 %v4916_v8 }
0x1b1a   : > { %6412 = vmatprep.mubr.msk.f32.mxu0 %vm6918_vm1, %v6919_v23  ;;  %6423 = vmatprep.mubr.msk.f32.mxu1 %vm6918_vm1, %v6919_v23 }
0x1b1b   : > { %6732 = vmatpush3.bf16.msra.mxu0 %v6731_v17  ;;  %6738 = vmatpush3.bf16.msra.mxu1 %v6737_v20 }
0x1b1c   : > { %6733 = vmatprep.subr.bf16.mxu0 %v6917_v15  ;;  %6739 = vmatprep.subr.bf16.mxu1 %v6917_v15 }
0x1b1f   : > { %6741 = vmatpush3.bf16.msra.mxu1 %v6740_v31 }
0x1bec   : > { %v5972_v26 = vpop.f32.mrb[54].mxu0  ;;  %v6007_v27 = vpop.f32.mrb[54].mxu1 }
0x1bed   : > { %v5973_v33 = vpop.f32.mrb[55].mxu0  ;;  %v6008_v34 = vpop.f32.mrb[55].mxu1 }
0x1bee   : > { %v5974_v35 = vadd.f32 %v5973_v33, %v5972_v26  ;;  %v6009_v51 = vadd.f32 %v6008_v34, %v6007_v27 }
0x1bf0   : > { %v5120_v36 = vadd.f32 %v6009_v51, %v5974_v35  ;;  %v5268_v51 = vrot.slane %v5129_v56, 3 }
0x1bf2   : > { %v5123_v37 = vadd.f32 %v5120_v36, %v8064_v40  ;;  %v5169_v40 = vld [vmem:[%s8441_s9 + $0x10] sm:$0xff] }
0x1bf3   : > { %v6734_v48 = vpack.c.bf16 %v5170_v29, %v5169_v40 }
0x1bf4   : > { %v5128_v30 = vadd.f32 %v5696_v7, %v5123_v37  ;;  %v5271_v37 = vrot.slane %v5129_v56, 4 }
0x1bf5   : > { %6735 = vmatpush3.bf16.msra.mxu0 %v6734_v48 }
0x1bf6   : > { %v5130_v61 = vsel %vm414_vm0, %v5128_v30, 0.0 }
0x1bf7   : > { %5131 = vadd.xlane.f32.xlu1 %v5130_v61 }
0x1c84   : > { %v5132_v60 = vpop.xlane.xlu1 %5131 }
0x1c85   : > { %v5133_v38 = vmul.f32 0.03125, %v5132_v60 }
0x1c87   : > { %v5134_v23 = vsub.f32 %v5128_v30, %v5133_v38 }
0x1c89   : > { %v5135_v25 = vmul.f32 %v5134_v23, %v5134_v23 }
0x1c8b   : > { %v5136_v22 = vsel %vm414_vm0, %v5135_v25, 0.0 }
0x1c8c   : > { %5137 = vadd.xlane.f32.xlu0 %v5136_v22 }
0x1d19   : > { %v5138_v49 = vpop.xlane.xlu0 %5137 }
0x1d1a   : > { %v5139_v0 = vmul.f32 0.032258064, %v5138_v49 }
0x1d1c   : > { %6835 = vrsqrt.f32 %v5139_v0  ;;  %vm5142_vm11 = vcmp.eq.f32.partialorder %v5139_v0, inf  ;;  %v5145_v21 = vand.u32 2147483648, %v5139_v0  ;;  %vm5144_vm12 = vcmp.eq.f32.partialorder %v5139_v0, 0.0 }
0x1d26   : > { %v6836_v12 = vpop.eup %6835 }
0x1d27   : > { %v5141_v52 = vmul.f32 %v6836_v12, %v5139_v0 }
0x1d29   : > { %v5143_v54 = vsel %vm5142_vm11, %v5139_v0, %v5141_v52 }
0x1d2a   : > { %v5146_v55 = vsel %vm5144_vm12, %v5145_v21, %v5143_v54 }
0x1d2b   : > { %v5147_v43 = vadd.f32 1e-06, %v5146_v55 }
0x1d2d   : > { %6837 = vrcp.f32 %v5147_v43 }
0x1d37   : > { %v6838_v58 = vpop.eup %6837 }
0x1d38   : > { %v5153_v53 = vmul.f32 %v6838_v58, %v5152_v57 }
0x1d3a   : > { %v5154_v62 = vmul.f32 %v5153_v53, %v5134_v23 }
0x1d3c   : > { %v5159_v63 = vadd.f32 %v5158_v59, %v5154_v62 }
0x1d3e   : > { %v5160_v46 = vsel %vm414_vm0, %v5159_v63, -inf }
0x1d3f   : > { %v5161_v1 = vrot.slane %v5160_v46, 4 }
0x1d41   : > { %v5162_v2 = vmax.f32 %v5160_v46, %v5161_v1 }
0x1d43   : > { %v5163_v4 = vrot.slane %v5162_v2, 2 }
0x1d45   : > { %v5164_v5 = vmax.f32 %v5162_v2, %v5163_v4 }
0x1d47   : > { %v5165_v44 = vrot.slane %v5164_v5, 1 }
0x1d49   : > { %v5166_v45 = vmax.f32 %v5164_v5, %v5165_v44 }
0x1d4b   : > { %6413 = vmatmul.mubr.msk.f32.vlgmr.msra.gmra.mrb[56].mxu0 %vm414_vm0, %v5166_v45 }
0x1e1e   : > { %v5243_v6 = vpop.f32.mrb[56].mxu0 }
0x1e1f   : > { %v5244_v39 = vadd.f32 %v5243_v6, %v5172_v50  ;;  %v6414_v47 = vpop.f32.mrb[57].mxu0 }
0x1e21   : > { %v5248_v9 = vsel %vm5247_vm13, %v5244_v39, 0.0 }
0x1e22   : > { %5249 = vadd.xlane.f32.xlu1 %v5248_v9 }
0x1eaf   : > { %v5250_v41 = vpop.xlane.xlu1 %5249 }
0x1eb0   : > { %v5251_v10 = vmul.f32 0.03125, %v5250_v41 }
0x1eb2   : > { %v5252_v28 = vsub.f32 %v5244_v39, %v5251_v10 }
0x1eb4   : > { %v5253_v13 = vmul.f32 %v5252_v28, %v5252_v28 }
0x1eb6   : > { %v5254_v14 = vsel %vm5247_vm13, %v5253_v13, 0.0 }
0x1eb7   : > { %5255 = vadd.xlane.f32.xlu1 %v5254_v14 }
0x1f44   : > { %v5256_v32 = vpop.xlane.xlu1 %5255 }
0x1f45   : > { %v5257_v11 = vmul.f32 0.03125, %v5256_v32 }
0x1f47   : > { %v5258_v8 = vadd.f32 1e-05, %v5257_v11 }
0x1f49   : > { %6839 = vrsqrt.f32 %v5258_v8  ;;  %vm5261_vm14 = vcmp.eq.f32.partialorder %v5258_v8, inf  ;;  %v5264_v33 = vand.u32 2147483648, %v5258_v8  ;;  %vm5263_vm15 = vcmp.eq.f32.partialorder %v5258_v8, 0.0 }
0x1f53   : > { %v6840_v26 = vpop.eup %6839 }
0x1f54   : > { %v5260_v27 = vmul.f32 %v6840_v26, %v5258_v8 }
0x1f56   : > { %v5262_v34 = vsel %vm5261_vm14, %v5258_v8, %v5260_v27 }
0x1f57   : > { %v5265_v35 = vsel %vm5263_vm15, %v5264_v33, %v5262_v34 }
0x1f58   : > { %6841 = vrcp.f32 %v5265_v35 }
0x1f62   : > { %v6842_v36 = vpop.eup %6841 }
0x1f63   : > { %v5267_v7 = vmul.f32 %v6842_v36, %v5252_v28 }
0x1f65   : > { %v5270_v30 = vmul.f32 %v5268_v51, %v5267_v7 }
0x1f67   : > { %v5273_v61 = vadd.f32 %v5271_v37, %v5270_v30 }
0x1f69   : > { %v5274_v15 = vsub.f32 0.0, %v5273_v61 }
0x1f6b   : > { %v5275_v60 = vmul.f32 1.442695, %v5274_v15 }
0x1f6d   : > { %6843 = vpow2.f32 %v5275_v60 }
0x1f77   : > { %v6844_v38 = vpop.eup %6843 }
0x1f78   : > { %v5277_v23 = vadd.f32 1.0, %v6844_v38 }
0x1f7a   : > { %6845 = vrcp.f32 %v5277_v23 }
0x1f84   : > { %v6846_v25 = vpop.eup %6845 }
0x1f85   : > { %v5280_v22 = vmul.f32 %v6846_v25, %v5273_v61 }
0x1f87   : > { %6424 = vmatmul.mubr.msk.f32.vlgmr.msra.gmra.mrb[56].mxu1 %vm414_vm0, %v5280_v22 }
0x205a   : > { %v5355_v42 = vpop.f32.mrb[56].mxu1 }
0x205b   : > { %v5356_v40 = vadd.f32 %v5355_v42, %v5285_v18  ;;  %v6425_v17 = vpop.f32.mrb[57].mxu1 }
0x205d   : > { %v5359_v29 = vsel %vm5247_vm13, %v5356_v40, -inf }
0x205e   : > { %5360 = vmax.xlane.f32.xlu1 %v5359_v29 }
0x20eb   : > { %v5361_v48 = vpop.xlane.xlu1 %5360 }
0x20ec   : > { %v5362_v49 = vsub.f32 %v5356_v40, %v5361_v48 }
0x20ee   : > { %v5363_v0 = vmul.f32 1.442695, %v5362_v49 }
0x20f0   : > { %6847 = vpow2.f32 %v5363_v0 }
0x20fa   : > { %v6848_v12 = vpop.eup %6847 }
0x20fb   : > { %v5365_v52 = vsel %vm5247_vm13, %v6848_v12, 0.0 }
0x20fc   : > { %5366 = vadd.xlane.f32.xlu1 %v5365_v52 }
0x2189   : > { %v5367_v21 = vpop.xlane.xlu1 %5366 }
0x218a   : > { %6849 = vrcp.f32 %v5367_v21 }
0x2194   : > { %v6850_v54 = vpop.eup %6849 }
0x2195   : > { %v5369_v55 = vmul.f32 %v6850_v54, %v6848_v12 }
0x2197   : > { %v5370_v43 = vmax.f32 %v5369_v55, 0.0 }
0x2199   : > { %v5371_v56 = vmin.f32 %v5370_v43, 0.1 }
0x219b   : > { %v5372_v57 = vsel %vm5247_vm13, %v5371_v56, 0.0 }
0x219c   : > { %5373 = vadd.xlane.f32.xlu1 %v5372_v57 }
0x2229   : > { %v5374_v58 = vpop.xlane.xlu1 %5373 }
0x222a   : > { %v5375_v53 = vadd.f32 1e-08, %v5374_v58 }
0x222c   : > { %6851 = vrcp.f32 %v5375_v53 }
0x2236   : > { %v6852_v59 = vpop.eup %6851 }
0x2237   : > { %v5377_v62 = vmul.f32 %v6852_v59, %v5371_v56 }
0x2239   : > { %v5378_v63 = vsel %vm414_vm0, %v5377_v62, 0.0 }
0x223a   : > { %5379 = vst [vmem:[%s403_s18] sm:$0x1] %v5378_v63 }
0x223b   : > { %6866 = shalt.err (!%p6863_p3)
}
0x223c   : > { %s6867_s30 = scalar_lea.hbm %s8389_s29, 16  ;;  %s6871_s18 = scalar_lea.hbm %s8444_s12, 32 }
0x223d   : > { %p6868_p4 = scmp.ne.s32.totalorder %s8389_s29, %s6867_s30  ;;  %p6872_p9 = scmp.lt.u32.totalorder %s8389_s29, %s8444_s12 }
0x223e   : > { %p6873_p10 = scmp.lt.u32.totalorder %s6871_s18, %s6867_s30  ;;  %p6875_p12 = scmp.lt.u32.totalorder %s6867_s30, %s8389_s29 }
0x223f   : > { %p6869_p7 = pnand %p6868_p4, %p7027_p5 }
0x2240   : > { %p6874_p11 = por %p6873_p10, %p6872_p9 }
0x2241   : > { %p6870_p8 = pneg %p6869_p7 }
0x2242   : > { %p6876_p13 = por %p6875_p12, %p6874_p11 }
0x2244   : > { %p6877_p0 = pnand %p6876_p13, %p6870_p8 }
0x2246   : > { %6880 = shalt.err (!%p6877_p0)
}
0x2247   : > { %6742 = dma.vmem_to_hbm [thread:$0]  (%p7027_p5), %s8391_s20, 16, %s8389_s29, %s5381_s19  }
0x2248 PF: > { %p6748_p1 = scmp.ge.s32.totalorder %s6915_s24, 2  ;;  %s5405_s0 = sand.u32 1, %s6903_s21  }
0x2249   : > { %s5406_s25 = scalar_lea.sflag [#allocation3], %s5405_s0 }
0x224a   : > { %p6745_p2 = pnand %p6748_p1, %p7031_p6 }
0x224c   : > { %6898 = dma.done.wait (!%p6745_p2), %s5406_s25, 16  }
0x224d   : > { %6900 = vsyncadd (!%p6745_p2), %s5406_s25, 4294967280  ;;  %s8461_s28 = sld [smem:[#allocation5_spill]]  ;;  %p22_p3 = scmp.ge.s32.totalorder %s7014_s27, 4  }
0x224e   : > { %s8462_s21 = smov %s6907_s22  ;;  %s8463_s22 = smov %s6911_s23 }
0x224f   : > { %s8465_s24 = smov %s7014_s27  ;;  %24 = sbr.rel (!%p22_p3) target bundleno = 6 (0x6), region = 137 }
0x2253   : > { %s8464_s23 = smov %s8461_s28 }
0x2256   :  { %5410 = vsyncpa [#allocation3], 1 }
0x2257   :  { %5412 = vsyncpa [#allocation3 + $0x1], 1 }

</bundles_post_ra>
